<compile_context>
chip_gen: v5e
topology: v5e:2x2
jax: 0.10.0
libtpu: 0.0.40
codegen_flags: <defaults>
</compile_context>

<pallas_src>
import functools

import jax
import jax.numpy as jnp
from jax.experimental import pallas as pl
from jax.experimental.pallas import tpu as pltpu

BN_EPS = 1e-5
LANE = 128


# ---------------------------------------------------------------------------
# Helpers
# ---------------------------------------------------------------------------
def _round_up(x, m):
    return (x + m - 1) // m * m


@functools.lru_cache(maxsize=1)
def _vmem_capacity_bytes():
    try:
        cap = int(pltpu.get_tpu_info().vmem_capacity_bytes)
        if cap > 0:
            return cap
    except Exception:
        pass
    return 64 * 1024 * 1024  # conservative fallback (v7x per-TC capacity)


def _plan(m, k, cp, force_tm=None):
    """Pick (tn, tm, fused) from the real per-grid-step working set."""
    tn = 256 if cp % 256 == 0 else 128
    budget = int(0.55 * _vmem_capacity_bytes())
    m16 = _round_up(max(m, 1), 16)          # multiple of 16 (bf16 sublane packing)
    if force_tm is not None:
        tm = max(16, _round_up(min(force_tm, m16), 16))
        return tn, tm, tm >= m16
    # Fused single-pass working set (grid only over Cout tiles):
    fused_need = (m16 * k * 2               # resident bf16 patch matrix
                  + 2 * k * tn * 2          # double-buffered weight tile
                  + 2 * m16 * tn * 2        # double-buffered bf16 output tile
                  + m16 * tn * 4            # f32 conv temporary
                  + 4 * tn * 4)
    if fused_need <= budget:
        return tn, m16, True
    # Two-pass Kernel A per-grid-step working set (double-buffered tiles).
    per_row = 2 * (k * 2 + tn * 2) + tn * 4
    fixed = 2 * (k * tn * 2) + 2 * (2 * tn * 4)
    tm = (budget - fixed) // max(per_row, 1)
    tm = max(16, min(int(tm), 2048)) // 16 * 16
    tm = min(tm, m16)
    return tn, tm, False


# ---------------------------------------------------------------------------
# Fused kernel: conv matmul + BN(batch stats) + ReLU in one pass (bf16 out)
# ---------------------------------------------------------------------------
def fused_conv_bn_relu_kernel(p_ref, w_ref, affine_ref, o_ref, *, inv_m, pad_rows):
    y = jnp.dot(p_ref[...], w_ref[...], preferred_element_type=jnp.float32)
    mean = jnp.sum(y, axis=0, keepdims=True) * inv_m          # pad rows are zero
    centered = y - mean
    var = jnp.sum(centered * centered, axis=0, keepdims=True)
    if pad_rows:
        # each zero pad row contributed mean^2 to the centered sum -> remove it
        var = var - float(pad_rows) * (mean * mean)
    var = jnp.maximum(var * inv_m, 0.0)
    scale = affine_ref[0:1, :] * jax.lax.rsqrt(var + BN_EPS)  # gamma / std
    beta = affine_ref[1:2, :]
    o_ref[...] = jnp.maximum(centered * scale + beta, 0.0).astype(o_ref.dtype)


# ---------------------------------------------------------------------------
# Two-pass Kernel A: conv matmul -> bf16 y + per-M-tile partial (sum, sumsq)
# (no cross-step accumulation -> both grid axes are parallel / dual-TC safe)
# ---------------------------------------------------------------------------
def conv_partial_stats_kernel(p_ref, w_ref, y_ref, pstats_ref):
    y = jnp.dot(p_ref[...], w_ref[...], preferred_element_type=jnp.float32)
    y_ref[...] = y.astype(y_ref.dtype)
    pstats_ref[0:1, :] = jnp.sum(y, axis=0, keepdims=True)
    pstats_ref[1:2, :] = jnp.sum(y * y, axis=0, keepdims=True)


# ---------------------------------------------------------------------------
# Two-pass Kernel B: pure FMA + ReLU with precomputed (scale, shift)
# ---------------------------------------------------------------------------
def fma_relu_kernel(y_ref, ss_ref, o_ref):
    scale = ss_ref[0:1, :]
    shift = ss_ref[1:2, :]
    o_ref[...] = jnp.maximum(
        y_ref[...].astype(jnp.float32) * scale + shift, 0.0).astype(o_ref.dtype)


# ---------------------------------------------------------------------------
# Glue: im2col patch extraction (reshape/slice only, bf16)
# ---------------------------------------------------------------------------
def im2col(x_nhwc, ksize=3, stride=2, pad=1):
    # TODO(synk): move this 9x patch materialization into the kernel via
    # halo'd NHWC tile DMAs + 9 per-tap matmuls (manual make_async_copy).
    n, h, w, c = x_nhwc.shape
    xp = jnp.pad(x_nhwc, ((0, 0), (pad, pad), (pad, pad), (0, 0)))
    hout = (h + 2 * pad - ksize) // stride + 1
    wout = (w + 2 * pad - ksize) // stride + 1
    taps = []
    for di in range(ksize):
        for dj in range(ksize):
            taps.append(
                xp[:, di:di + stride * hout:stride, dj:dj + stride * wout:stride, :])
    patches = jnp.concatenate(taps, axis=-1)          # (N, Hout, Wout, 9*C)
    return patches.reshape(n * hout * wout, ksize * ksize * c), (n, hout, wout)


# ---------------------------------------------------------------------------
# One VGG block: conv(3x3, stride, pad=1) + BN(batch stats) + ReLU
# Activations stay channel-padded to a multiple of 128 lanes.
# ---------------------------------------------------------------------------
def vgg_block(x_nhwc, block_params, stride, force_tm=None):
    w_pad, affine = block_params                       # (K_pad, Cout_pad) bf16, (2, Cout_pad) f32
    k, cp = w_pad.shape

    patches, (n, hout, wout) = im2col(x_nhwc, ksize=3, stride=stride, pad=1)
    m, k_real = patches.shape
    if k_real != k:                                    # block 1: pad K up to weight rows
        patches = jnp.pad(patches, ((0, 0), (0, k - k_real)))

    tn, tm, fused = _plan(m, k, cp, force_tm)
    n_c = cp // tn
    vmem_limit = int(0.75 * _vmem_capacity_bytes())
    inv_m = 1.0 / float(m)

    if fused:
        m_pad = _round_up(m, 16)
        if m_pad != m:
            # zero rows contribute 0 to the stats sums (no conv bias) -> exact
            patches = jnp.pad(patches, ((0, m_pad - m), (0, 0)))
        act = pl.pallas_call(
            functools.partial(fused_conv_bn_relu_kernel,
                              inv_m=inv_m, pad_rows=m_pad - m),
            out_shape=jax.ShapeDtypeStruct((m_pad, cp), jnp.bfloat16),
            grid_spec=pltpu.PrefetchScalarGridSpec(
                num_scalar_prefetch=0,
                grid=(n_c,),
                in_specs=[
                    pl.BlockSpec((m_pad, k), lambda j: (0, 0)),   # resident patches
                    pl.BlockSpec((k, tn), lambda j: (0, j)),      # weight tile
                    pl.BlockSpec((2, tn), lambda j: (0, j)),      # gamma / beta
                ],
                out_specs=pl.BlockSpec((m_pad, tn), lambda j: (0, j))),
            compiler_params=pltpu.CompilerParams(
                dimension_semantics=("parallel",),
                vmem_limit_bytes=vmem_limit),
        )(patches, w_pad, affine)
    else:
        m_pad = _round_up(m, tm)
        if m_pad != m:
            patches = jnp.pad(patches, ((0, m_pad - m), (0, 0)))
        n_m = m_pad // tm

        # ---- Kernel A: matmul + bf16 y + per-tile partial stats ------------
        y, pstats = pl.pallas_call(
            conv_partial_stats_kernel,
            out_shape=(jax.ShapeDtypeStruct((m_pad, cp), jnp.bfloat16),
                       jax.ShapeDtypeStruct((n_m, 2, cp), jnp.float32)),
            grid_spec=pltpu.PrefetchScalarGridSpec(
                num_scalar_prefetch=0,
                grid=(n_c, n_m),
                in_specs=[
                    pl.BlockSpec((tm, k), lambda j, i: (i, 0)),
                    pl.BlockSpec((k, tn), lambda j, i: (0, j)),
                ],
                out_specs=[
                    pl.BlockSpec((tm, tn), lambda j, i: (i, j)),
                    pl.BlockSpec((None, 2, tn), lambda j, i: (i, 0, j)),
                ]),
            compiler_params=pltpu.CompilerParams(
                dimension_semantics=("parallel", "parallel"),
                vmem_limit_bytes=vmem_limit),
        )(patches, w_pad)

        # ---- Tiny cross-tile reduction + BN finalize in XLA (2*cp elems) ---
        stats = jnp.sum(pstats, axis=0)                 # (2, cp)
        mean = stats[0] * inv_m
        var = jnp.maximum(stats[1] * inv_m - mean * mean, 0.0)
        scale = affine[0] * jax.lax.rsqrt(var + BN_EPS)
        shift = affine[1] - mean * scale
        ss = jnp.stack([scale, shift], axis=0)           # (2, cp)

        # ---- Kernel B: FMA + ReLU, full-cp-wide lane-dense blocks ----------
        act = pl.pallas_call(
            fma_relu_kernel,
            out_shape=jax.ShapeDtypeStruct((m_pad, cp), jnp.bfloat16),
            grid_spec=pltpu.PrefetchScalarGridSpec(
                num_scalar_prefetch=0,
                grid=(n_m,),
                in_specs=[
                    pl.BlockSpec((tm, cp), lambda i: (i, 0)),
                    pl.BlockSpec((2, cp), lambda i: (0, 0)),
                ],
                out_specs=pl.BlockSpec((tm, cp), lambda i: (i, 0))),
            compiler_params=pltpu.CompilerParams(
                dimension_semantics=("parallel",),
                vmem_limit_bytes=vmem_limit),
        )(y, ss)

    if m_pad != m:
        act = act[:m]
    return act.reshape(n, hout, wout, cp)


# ---------------------------------------------------------------------------
# Parameter init (deterministic, synthetic — no checkpoint loading)
# ---------------------------------------------------------------------------
def init_block_params(key, cin, cout, cin_pad, cout_pad):
    k1, k2, k3 = jax.random.split(key, 3)
    fan_in = 9 * cin
    w = jax.random.normal(k1, (3, 3, cin, cout), jnp.float32) / jnp.sqrt(fan_in)
    gamma = 1.0 + 0.1 * jax.random.normal(k2, (cout,), jnp.float32)
    beta = 0.1 * jax.random.normal(k3, (cout,), jnp.float32)
    # NOTE: conv bias omitted — with training-mode BN right after, it is
    # exactly cancelled by the per-channel mean subtraction.
    w_full = jnp.zeros((3, 3, cin_pad, cout_pad), jnp.float32)
    w_full = w_full.at[:, :, :cin, :cout].set(w)
    k_rows = 9 * cin_pad
    k_pad = _round_up(k_rows, LANE)
    w_mat = jnp.zeros((k_pad, cout_pad), jnp.float32)
    w_mat = w_mat.at[:k_rows, :].set(w_full.reshape(k_rows, cout_pad))
    affine = jnp.zeros((2, cout_pad), jnp.float32)
    affine = affine.at[0, :cout].set(gamma).at[1, :cout].set(beta)
    return w_mat.astype(jnp.bfloat16), affine


def build_cfg(block_dims):
    d0, d1, d2 = block_dims
    # (cin, cout, stride) for the 9 blocks, mirroring VGG_BACKBONE.__init__
    return ((1, d0, 2), (d0, d0, 1), (d0, d0, 1),
            (d0, d1, 2), (d1, d1, 1), (d1, d1, 1),
            (d1, d2, 2), (d2, d2, 1), (d2, d2, 1))


def init_backbone_params(key, block_dims):
    cfg = build_cfg(block_dims)
    keys = jax.random.split(key, len(cfg))
    params = []
    cin_pad = 1                                        # block 1 sees the raw image
    for k, (cin, cout, _) in zip(keys, cfg):
        cout_pad = _round_up(cout, LANE)
        params.append(init_block_params(k, cin, cout, cin_pad, cout_pad))
        cin_pad = cout_pad                             # padded channels flow through
    return params


# ---------------------------------------------------------------------------
# Full VGG_BACKBONE forward
# ---------------------------------------------------------------------------
@functools.partial(jax.jit, static_argnames=("block_dims",))
def vgg_backbone_forward(x_nchw, params, block_dims):
    cfg = build_cfg(block_dims)
    cur = jnp.transpose(x_nchw, (0, 2, 3, 1)).astype(jnp.bfloat16)   # NCHW->NHWC
    feats = []
    for idx, (cin, cout, stride) in enumerate(cfg):
        cur = vgg_block(cur, params[idx], stride)
        if idx in (2, 5, 8):                            # after block_3 / 6 / 9
            feats.append(cur[..., :cout])               # drop lane padding at taps only
    x0, x1, x2 = feats
    to_nchw = lambda t: jnp.transpose(t, (0, 3, 1, 2)).astype(jnp.float32)
    return {
        "feats_c": to_nchw(x2),
        "feats_f": None,
        "feats_x2": to_nchw(x1),
        "feats_x1": to_nchw(x0),
    }


if __name__ == "__main__":
    key = jax.random.PRNGKey(0)
    k_x, k_p, k_t = jax.random.split(key, 3)

    block_dims = (32, 64, 128)                          # config.block_dims
    x = jax.random.normal(k_x, (2, 1, 16, 16), jnp.float32)   # NCHW, 1-channel image

    params = init_backbone_params(k_p, block_dims)
    out = vgg_backbone_forward(x, params, block_dims)
    jax.block_until_ready(out["feats_c"])
    jax.block_until_ready(out["feats_x2"])
    jax.block_until_ready(out["feats_x1"])

    assert out["feats_x1"].shape == (2, block_dims[0], 8, 8)
    assert out["feats_x2"].shape == (2, block_dims[1], 4, 4)
    assert out["feats_c"].shape == (2, block_dims[2], 2, 2)
    assert out["feats_f"] is None

    # Exercise the two-pass (tiled-M) path used for large images and check it
    # against the fused path (only bf16 rounding of the intermediate y differs).
    xt = jax.random.normal(k_t, (2, 16, 16, LANE), jnp.float32).astype(jnp.bfloat16)
    bp = init_block_params(jax.random.PRNGKey(7), LANE, LANE, LANE, LANE)
    fused_fn = jax.jit(functools.partial(vgg_block, stride=1))
    tiled_fn = jax.jit(functools.partial(vgg_block, stride=1, force_tm=64))
    a_fused = fused_fn(xt, bp)
    a_tiled = tiled_fn(xt, bp)
    jax.block_until_ready(a_tiled)
    max_diff = float(jnp.max(jnp.abs(a_fused.astype(jnp.float32)
                                     - a_tiled.astype(jnp.float32))))
    assert max_diff < 0.25, f"two-pass path mismatch: {max_diff}"

    print("KERNEL_OK")
</pallas_src>

<mosaic_0001>
module attributes {stable_mosaic.version = 11 : i64} {
  func.func @fused_conv_bn_relu_kernel(%arg0: i32, %arg1: memref<128x128xbf16, #tpu.memory_space<vmem>>, %arg2: memref<128x128xbf16, #tpu.memory_space<vmem>>, %arg3: memref<2x128xf32, #tpu.memory_space<vmem>>, %arg4: memref<128x128xbf16, #tpu.memory_space<vmem>>) attributes {dimension_semantics = [#tpu.dimension_semantics<parallel>], iteration_bounds = array<i64: 1>, scalar_prefetch = 0 : i64, scratch_operands = 0 : i64, tpu.core_type = #tpu.core_type<tc>, window_params = [{pipeline_mode = #tpu.pipeline_mode<synchronous>, transform_indices = @transform_0, window_bounds = array<i64: 128, 128>}, {transform_indices = @transform_1, window_bounds = array<i64: 128, 128>}, {transform_indices = @transform_2, window_bounds = array<i64: 2, 128>}, {transform_indices = @transform_3, window_bounds = array<i64: 128, 128>}]} {
    %c0 = arith.constant 0 : index
    %c0_0 = arith.constant 0 : index
    %0 = vector.load %arg1[%c0, %c0_0] : memref<128x128xbf16, #tpu.memory_space<vmem>>, vector<128x128xbf16>
    %c0_1 = arith.constant 0 : index
    %c0_2 = arith.constant 0 : index
    %1 = vector.load %arg2[%c0_1, %c0_2] : memref<128x128xbf16, #tpu.memory_space<vmem>>, vector<128x128xbf16>
    %cst = arith.constant dense<0.000000e+00> : vector<128x128xf32>
    %2 = tpu.matmul %0, %1, %cst {dimension_numbers = #tpu.dot_dimension_numbers<[1], [0], [0], [1], [0, 0, 1, 1], [], []>} : vector<128x128xbf16>, vector<128x128xbf16>, vector<128x128xf32> -> vector<128x128xf32>
    %cst_3 = arith.constant dense<0.000000e+00> : vector<128xf32>
    %3 = vector.multi_reduction <add>, %2, %cst_3 [0] : vector<128x128xf32> to vector<128xf32>
    %4 = vector.shape_cast %3 : vector<128xf32> to vector<1x128xf32>
    %cst_4 = arith.constant 7.812500e-03 : f32
    %5 = vector.broadcast %cst_4 : f32 to vector<1x128xf32>
    %6 = arith.mulf %4, %5 : vector<1x128xf32>
    %7 = vector.broadcast %6 : vector<1x128xf32> to vector<128x128xf32>
    %8 = arith.subf %2, %7 : vector<128x128xf32>
    %9 = arith.mulf %8, %8 : vector<128x128xf32>
    %cst_5 = arith.constant dense<0.000000e+00> : vector<128xf32>
    %10 = vector.multi_reduction <add>, %9, %cst_5 [0] : vector<128x128xf32> to vector<128xf32>
    %11 = vector.shape_cast %10 : vector<128xf32> to vector<1x128xf32>
    %cst_6 = arith.constant 7.812500e-03 : f32
    %12 = vector.broadcast %cst_6 : f32 to vector<1x128xf32>
    %13 = arith.mulf %11, %12 : vector<1x128xf32>
    %cst_7 = arith.constant 0.000000e+00 : f32
    %14 = vector.broadcast %cst_7 : f32 to vector<1x128xf32>
    %15 = arith.maximumf %13, %14 : vector<1x128xf32>
    %c0_8 = arith.constant 0 : index
    %c0_9 = arith.constant 0 : index
    %16 = vector.load %arg3[%c0_8, %c0_9] : memref<2x128xf32, #tpu.memory_space<vmem>>, vector<1x128xf32>
    %cst_10 = arith.constant 9.99999974E-6 : f32
    %17 = vector.broadcast %cst_10 : f32 to vector<1x128xf32>
    %18 = arith.addf %15, %17 : vector<1x128xf32>
    %19 = math.rsqrt %18 : vector<1x128xf32>
    %20 = arith.mulf %16, %19 : vector<1x128xf32>
    %c1 = arith.constant 1 : index
    %c0_11 = arith.constant 0 : index
    %21 = vector.load %arg3[%c1, %c0_11] : memref<2x128xf32, #tpu.memory_space<vmem>>, vector<1x128xf32>
    %22 = vector.broadcast %20 : vector<1x128xf32> to vector<128x128xf32>
    %23 = arith.mulf %8, %22 : vector<128x128xf32>
    %24 = vector.broadcast %21 : vector<1x128xf32> to vector<128x128xf32>
    %25 = arith.addf %23, %24 : vector<128x128xf32>
    %cst_12 = arith.constant 0.000000e+00 : f32
    %26 = vector.broadcast %cst_12 : f32 to vector<128x128xf32>
    %27 = arith.maximumf %25, %26 : vector<128x128xf32>
    %28 = arith.truncf %27 : vector<128x128xf32> to vector<128x128xbf16>
    %c0_13 = arith.constant 0 : index
    %c0_14 = arith.constant 0 : index
    %29 = vector.load %arg4[%c0_13, %c0_14] : memref<128x128xbf16, #tpu.memory_space<vmem>>, vector<128x128xbf16>
    tpu.vector_store %arg4[%c0_13, %c0_14], %28 {strides = array<i32>} : memref<128x128xbf16, #tpu.memory_space<vmem>>, vector<128x128xbf16>,
    return
  }
  func.func @transform_0(%arg0: i32) -> (i32, i32) {
    %c0_i32 = arith.constant 0 : i32
    %c0_i32_0 = arith.constant 0 : i32
    %c0_i32_1 = arith.constant 0 : i32
    return %c0_i32, %c0_i32_0 : i32, i32
  }
  func.func @transform_1(%arg0: i32) -> (i32, i32) {
    %c0_i32 = arith.constant 0 : i32
    %c0_i32_0 = arith.constant 0 : i32
    return %c0_i32, %arg0 : i32, i32
  }
  func.func @transform_2(%arg0: i32) -> (i32, i32) {
    %c0_i32 = arith.constant 0 : i32
    %c0_i32_0 = arith.constant 0 : i32
    return %c0_i32, %arg0 : i32, i32
  }
  func.func @transform_3(%arg0: i32) -> (i32, i32) {
    %c0_i32 = arith.constant 0 : i32
    %c0_i32_0 = arith.constant 0 : i32
    return %c0_i32, %arg0 : i32, i32
  }
}

module attributes {stable_mosaic.version = 11 : i64} {
  func.func @fused_conv_bn_relu_kernel(%arg0: i32, %arg1: memref<128x1152xbf16, #tpu.memory_space<vmem>>, %arg2: memref<1152x128xbf16, #tpu.memory_space<vmem>>, %arg3: memref<2x128xf32, #tpu.memory_space<vmem>>, %arg4: memref<128x128xbf16, #tpu.memory_space<vmem>>) attributes {dimension_semantics = [#tpu.dimension_semantics<parallel>], iteration_bounds = array<i64: 1>, scalar_prefetch = 0 : i64, scratch_operands = 0 : i64, tpu.core_type = #tpu.core_type<tc>, window_params = [{pipeline_mode = #tpu.pipeline_mode<synchronous>, transform_indices = @transform_0, window_bounds = array<i64: 128, 1152>}, {transform_indices = @transform_1, window_bounds = array<i64: 1152, 128>}, {transform_indices = @transform_2, window_bounds = array<i64: 2, 128>}, {transform_indices = @transform_3, window_bounds = array<i64: 128, 128>}]} {
    %c0 = arith.constant 0 : index
    %c0_0 = arith.constant 0 : index
    %0 = vector.load %arg1[%c0, %c0_0] : memref<128x1152xbf16, #tpu.memory_space<vmem>>, vector<128x1152xbf16>
    %c0_1 = arith.constant 0 : index
    %c0_2 = arith.constant 0 : index
    %1 = vector.load %arg2[%c0_1, %c0_2] : memref<1152x128xbf16, #tpu.memory_space<vmem>>, vector<1152x128xbf16>
    %cst = arith.constant dense<0.000000e+00> : vector<128x128xf32>
    %2 = tpu.matmul %0, %1, %cst {dimension_numbers = #tpu.dot_dimension_numbers<[1], [0], [0], [1], [0, 0, 1, 1], [], []>} : vector<128x1152xbf16>, vector<1152x128xbf16>, vector<128x128xf32> -> vector<128x128xf32>
    %cst_3 = arith.constant dense<0.000000e+00> : vector<128xf32>
    %3 = vector.multi_reduction <add>, %2, %cst_3 [0] : vector<128x128xf32> to vector<128xf32>
    %4 = vector.shape_cast %3 : vector<128xf32> to vector<1x128xf32>
    %cst_4 = arith.constant 7.812500e-03 : f32
    %5 = vector.broadcast %cst_4 : f32 to vector<1x128xf32>
    %6 = arith.mulf %4, %5 : vector<1x128xf32>
    %7 = vector.broadcast %6 : vector<1x128xf32> to vector<128x128xf32>
    %8 = arith.subf %2, %7 : vector<128x128xf32>
    %9 = arith.mulf %8, %8 : vector<128x128xf32>
    %cst_5 = arith.constant dense<0.000000e+00> : vector<128xf32>
    %10 = vector.multi_reduction <add>, %9, %cst_5 [0] : vector<128x128xf32> to vector<128xf32>
    %11 = vector.shape_cast %10 : vector<128xf32> to vector<1x128xf32>
    %cst_6 = arith.constant 7.812500e-03 : f32
    %12 = vector.broadcast %cst_6 : f32 to vector<1x128xf32>
    %13 = arith.mulf %11, %12 : vector<1x128xf32>
    %cst_7 = arith.constant 0.000000e+00 : f32
    %14 = vector.broadcast %cst_7 : f32 to vector<1x128xf32>
    %15 = arith.maximumf %13, %14 : vector<1x128xf32>
    %c0_8 = arith.constant 0 : index
    %c0_9 = arith.constant 0 : index
    %16 = vector.load %arg3[%c0_8, %c0_9] : memref<2x128xf32, #tpu.memory_space<vmem>>, vector<1x128xf32>
    %cst_10 = arith.constant 9.99999974E-6 : f32
    %17 = vector.broadcast %cst_10 : f32 to vector<1x128xf32>
    %18 = arith.addf %15, %17 : vector<1x128xf32>
    %19 = math.rsqrt %18 : vector<1x128xf32>
    %20 = arith.mulf %16, %19 : vector<1x128xf32>
    %c1 = arith.constant 1 : index
    %c0_11 = arith.constant 0 : index
    %21 = vector.load %arg3[%c1, %c0_11] : memref<2x128xf32, #tpu.memory_space<vmem>>, vector<1x128xf32>
    %22 = vector.broadcast %20 : vector<1x128xf32> to vector<128x128xf32>
    %23 = arith.mulf %8, %22 : vector<128x128xf32>
    %24 = vector.broadcast %21 : vector<1x128xf32> to vector<128x128xf32>
    %25 = arith.addf %23, %24 : vector<128x128xf32>
    %cst_12 = arith.constant 0.000000e+00 : f32
    %26 = vector.broadcast %cst_12 : f32 to vector<128x128xf32>
    %27 = arith.maximumf %25, %26 : vector<128x128xf32>
    %28 = arith.truncf %27 : vector<128x128xf32> to vector<128x128xbf16>
    %c0_13 = arith.constant 0 : index
    %c0_14 = arith.constant 0 : index
    %29 = vector.load %arg4[%c0_13, %c0_14] : memref<128x128xbf16, #tpu.memory_space<vmem>>, vector<128x128xbf16>
    tpu.vector_store %arg4[%c0_13, %c0_14], %28 {strides = array<i32>} : memref<128x128xbf16, #tpu.memory_space<vmem>>, vector<128x128xbf16>,
    return
  }
  func.func @transform_0(%arg0: i32) -> (i32, i32) {
    %c0_i32 = arith.constant 0 : i32
    %c0_i32_0 = arith.constant 0 : i32
    %c0_i32_1 = arith.constant 0 : i32
    return %c0_i32, %c0_i32_0 : i32, i32
  }
  func.func @transform_1(%arg0: i32) -> (i32, i32) {
    %c0_i32 = arith.constant 0 : i32
    %c0_i32_0 = arith.constant 0 : i32
    return %c0_i32, %arg0 : i32, i32
  }
  func.func @transform_2(%arg0: i32) -> (i32, i32) {
    %c0_i32 = arith.constant 0 : i32
    %c0_i32_0 = arith.constant 0 : i32
    return %c0_i32, %arg0 : i32, i32
  }
  func.func @transform_3(%arg0: i32) -> (i32, i32) {
    %c0_i32 = arith.constant 0 : i32
    %c0_i32_0 = arith.constant 0 : i32
    return %c0_i32, %arg0 : i32, i32
  }
}

module attributes {stable_mosaic.version = 11 : i64} {
  func.func @fused_conv_bn_relu_kernel(%arg0: i32, %arg1: memref<32x1152xbf16, #tpu.memory_space<vmem>>, %arg2: memref<1152x128xbf16, #tpu.memory_space<vmem>>, %arg3: memref<2x128xf32, #tpu.memory_space<vmem>>, %arg4: memref<32x128xbf16, #tpu.memory_space<vmem>>) attributes {dimension_semantics = [#tpu.dimension_semantics<parallel>], iteration_bounds = array<i64: 1>, scalar_prefetch = 0 : i64, scratch_operands = 0 : i64, tpu.core_type = #tpu.core_type<tc>, window_params = [{pipeline_mode = #tpu.pipeline_mode<synchronous>, transform_indices = @transform_0, window_bounds = array<i64: 32, 1152>}, {transform_indices = @transform_1, window_bounds = array<i64: 1152, 128>}, {transform_indices = @transform_2, window_bounds = array<i64: 2, 128>}, {transform_indices = @transform_3, window_bounds = array<i64: 32, 128>}]} {
    %c0 = arith.constant 0 : index
    %c0_0 = arith.constant 0 : index
    %0 = vector.load %arg1[%c0, %c0_0] : memref<32x1152xbf16, #tpu.memory_space<vmem>>, vector<32x1152xbf16>
    %c0_1 = arith.constant 0 : index
    %c0_2 = arith.constant 0 : index
    %1 = vector.load %arg2[%c0_1, %c0_2] : memref<1152x128xbf16, #tpu.memory_space<vmem>>, vector<1152x128xbf16>
    %cst = arith.constant dense<0.000000e+00> : vector<32x128xf32>
    %2 = tpu.matmul %0, %1, %cst {dimension_numbers = #tpu.dot_dimension_numbers<[1], [0], [0], [1], [0, 0, 1, 1], [], []>} : vector<32x1152xbf16>, vector<1152x128xbf16>, vector<32x128xf32> -> vector<32x128xf32>
    %cst_3 = arith.constant dense<0.000000e+00> : vector<128xf32>
    %3 = vector.multi_reduction <add>, %2, %cst_3 [0] : vector<32x128xf32> to vector<128xf32>
    %4 = vector.shape_cast %3 : vector<128xf32> to vector<1x128xf32>
    %cst_4 = arith.constant 3.125000e-02 : f32
    %5 = vector.broadcast %cst_4 : f32 to vector<1x128xf32>
    %6 = arith.mulf %4, %5 : vector<1x128xf32>
    %7 = vector.broadcast %6 : vector<1x128xf32> to vector<32x128xf32>
    %8 = arith.subf %2, %7 : vector<32x128xf32>
    %9 = arith.mulf %8, %8 : vector<32x128xf32>
    %cst_5 = arith.constant dense<0.000000e+00> : vector<128xf32>
    %10 = vector.multi_reduction <add>, %9, %cst_5 [0] : vector<32x128xf32> to vector<128xf32>
    %11 = vector.shape_cast %10 : vector<128xf32> to vector<1x128xf32>
    %cst_6 = arith.constant 3.125000e-02 : f32
    %12 = vector.broadcast %cst_6 : f32 to vector<1x128xf32>
    %13 = arith.mulf %11, %12 : vector<1x128xf32>
    %cst_7 = arith.constant 0.000000e+00 : f32
    %14 = vector.broadcast %cst_7 : f32 to vector<1x128xf32>
    %15 = arith.maximumf %13, %14 : vector<1x128xf32>
    %c0_8 = arith.constant 0 : index
    %c0_9 = arith.constant 0 : index
    %16 = vector.load %arg3[%c0_8, %c0_9] : memref<2x128xf32, #tpu.memory_space<vmem>>, vector<1x128xf32>
    %cst_10 = arith.constant 9.99999974E-6 : f32
    %17 = vector.broadcast %cst_10 : f32 to vector<1x128xf32>
    %18 = arith.addf %15, %17 : vector<1x128xf32>
    %19 = math.rsqrt %18 : vector<1x128xf32>
    %20 = arith.mulf %16, %19 : vector<1x128xf32>
    %c1 = arith.constant 1 : index
    %c0_11 = arith.constant 0 : index
    %21 = vector.load %arg3[%c1, %c0_11] : memref<2x128xf32, #tpu.memory_space<vmem>>, vector<1x128xf32>
    %22 = vector.broadcast %20 : vector<1x128xf32> to vector<32x128xf32>
    %23 = arith.mulf %8, %22 : vector<32x128xf32>
    %24 = vector.broadcast %21 : vector<1x128xf32> to vector<32x128xf32>
    %25 = arith.addf %23, %24 : vector<32x128xf32>
    %cst_12 = arith.constant 0.000000e+00 : f32
    %26 = vector.broadcast %cst_12 : f32 to vector<32x128xf32>
    %27 = arith.maximumf %25, %26 : vector<32x128xf32>
    %28 = arith.truncf %27 : vector<32x128xf32> to vector<32x128xbf16>
    %c0_13 = arith.constant 0 : index
    %c0_14 = arith.constant 0 : index
    %29 = vector.load %arg4[%c0_13, %c0_14] : memref<32x128xbf16, #tpu.memory_space<vmem>>, vector<32x128xbf16>
    tpu.vector_store %arg4[%c0_13, %c0_14], %28 {strides = array<i32>} : memref<32x128xbf16, #tpu.memory_space<vmem>>, vector<32x128xbf16>,
    return
  }
  func.func @transform_0(%arg0: i32) -> (i32, i32) {
    %c0_i32 = arith.constant 0 : i32
    %c0_i32_0 = arith.constant 0 : i32
    %c0_i32_1 = arith.constant 0 : i32
    return %c0_i32, %c0_i32_0 : i32, i32
  }
  func.func @transform_1(%arg0: i32) -> (i32, i32) {
    %c0_i32 = arith.constant 0 : i32
    %c0_i32_0 = arith.constant 0 : i32
    return %c0_i32, %arg0 : i32, i32
  }
  func.func @transform_2(%arg0: i32) -> (i32, i32) {
    %c0_i32 = arith.constant 0 : i32
    %c0_i32_0 = arith.constant 0 : i32
    return %c0_i32, %arg0 : i32, i32
  }
  func.func @transform_3(%arg0: i32) -> (i32, i32) {
    %c0_i32 = arith.constant 0 : i32
    %c0_i32_0 = arith.constant 0 : i32
    return %c0_i32, %arg0 : i32, i32
  }
}

module attributes {stable_mosaic.version = 11 : i64} {
  func.func @fused_conv_bn_relu_kernel(%arg0: i32, %arg1: memref<16x1152xbf16, #tpu.memory_space<vmem>>, %arg2: memref<1152x128xbf16, #tpu.memory_space<vmem>>, %arg3: memref<2x128xf32, #tpu.memory_space<vmem>>, %arg4: memref<16x128xbf16, #tpu.memory_space<vmem>>) attributes {dimension_semantics = [#tpu.dimension_semantics<parallel>], iteration_bounds = array<i64: 1>, scalar_prefetch = 0 : i64, scratch_operands = 0 : i64, tpu.core_type = #tpu.core_type<tc>, window_params = [{pipeline_mode = #tpu.pipeline_mode<synchronous>, transform_indices = @transform_0, window_bounds = array<i64: 16, 1152>}, {transform_indices = @transform_1, window_bounds = array<i64: 1152, 128>}, {transform_indices = @transform_2, window_bounds = array<i64: 2, 128>}, {transform_indices = @transform_3, window_bounds = array<i64: 16, 128>}]} {
    %c0 = arith.constant 0 : index
    %c0_0 = arith.constant 0 : index
    %0 = vector.load %arg1[%c0, %c0_0] : memref<16x1152xbf16, #tpu.memory_space<vmem>>, vector<16x1152xbf16>
    %c0_1 = arith.constant 0 : index
    %c0_2 = arith.constant 0 : index
    %1 = vector.load %arg2[%c0_1, %c0_2] : memref<1152x128xbf16, #tpu.memory_space<vmem>>, vector<1152x128xbf16>
    %cst = arith.constant dense<0.000000e+00> : vector<16x128xf32>
    %2 = tpu.matmul %0, %1, %cst {dimension_numbers = #tpu.dot_dimension_numbers<[1], [0], [0], [1], [0, 0, 1, 1], [], []>} : vector<16x1152xbf16>, vector<1152x128xbf16>, vector<16x128xf32> -> vector<16x128xf32>
    %cst_3 = arith.constant dense<0.000000e+00> : vector<128xf32>
    %3 = vector.multi_reduction <add>, %2, %cst_3 [0] : vector<16x128xf32> to vector<128xf32>
    %4 = vector.shape_cast %3 : vector<128xf32> to vector<1x128xf32>
    %cst_4 = arith.constant 1.250000e-01 : f32
    %5 = vector.broadcast %cst_4 : f32 to vector<1x128xf32>
    %6 = arith.mulf %4, %5 : vector<1x128xf32>
    %7 = vector.broadcast %6 : vector<1x128xf32> to vector<16x128xf32>
    %8 = arith.subf %2, %7 : vector<16x128xf32>
    %9 = arith.mulf %8, %8 : vector<16x128xf32>
    %cst_5 = arith.constant dense<0.000000e+00> : vector<128xf32>
    %10 = vector.multi_reduction <add>, %9, %cst_5 [0] : vector<16x128xf32> to vector<128xf32>
    %11 = vector.shape_cast %10 : vector<128xf32> to vector<1x128xf32>
    %12 = arith.mulf %6, %6 : vector<1x128xf32>
    %cst_6 = arith.constant 8.000000e+00 : f32
    %13 = vector.broadcast %cst_6 : f32 to vector<1x128xf32>
    %14 = arith.mulf %13, %12 : vector<1x128xf32>
    %15 = arith.subf %11, %14 : vector<1x128xf32>
    %cst_7 = arith.constant 1.250000e-01 : f32
    %16 = vector.broadcast %cst_7 : f32 to vector<1x128xf32>
    %17 = arith.mulf %15, %16 : vector<1x128xf32>
    %cst_8 = arith.constant 0.000000e+00 : f32
    %18 = vector.broadcast %cst_8 : f32 to vector<1x128xf32>
    %19 = arith.maximumf %17, %18 : vector<1x128xf32>
    %c0_9 = arith.constant 0 : index
    %c0_10 = arith.constant 0 : index
    %20 = vector.load %arg3[%c0_9, %c0_10] : memref<2x128xf32, #tpu.memory_space<vmem>>, vector<1x128xf32>
    %cst_11 = arith.constant 9.99999974E-6 : f32
    %21 = vector.broadcast %cst_11 : f32 to vector<1x128xf32>
    %22 = arith.addf %19, %21 : vector<1x128xf32>
    %23 = math.rsqrt %22 : vector<1x128xf32>
    %24 = arith.mulf %20, %23 : vector<1x128xf32>
    %c1 = arith.constant 1 : index
    %c0_12 = arith.constant 0 : index
    %25 = vector.load %arg3[%c1, %c0_12] : memref<2x128xf32, #tpu.memory_space<vmem>>, vector<1x128xf32>
    %26 = vector.broadcast %24 : vector<1x128xf32> to vector<16x128xf32>
    %27 = arith.mulf %8, %26 : vector<16x128xf32>
    %28 = vector.broadcast %25 : vector<1x128xf32> to vector<16x128xf32>
    %29 = arith.addf %27, %28 : vector<16x128xf32>
    %cst_13 = arith.constant 0.000000e+00 : f32
    %30 = vector.broadcast %cst_13 : f32 to vector<16x128xf32>
    %31 = arith.maximumf %29, %30 : vector<16x128xf32>
    %32 = arith.truncf %31 : vector<16x128xf32> to vector<16x128xbf16>
    %c0_14 = arith.constant 0 : index
    %c0_15 = arith.constant 0 : index
    %33 = vector.load %arg4[%c0_14, %c0_15] : memref<16x128xbf16, #tpu.memory_space<vmem>>, vector<16x128xbf16>
    tpu.vector_store %arg4[%c0_14, %c0_15], %32 {strides = array<i32>} : memref<16x128xbf16, #tpu.memory_space<vmem>>, vector<16x128xbf16>,
    return
  }
  func.func @transform_0(%arg0: i32) -> (i32, i32) {
    %c0_i32 = arith.constant 0 : i32
    %c0_i32_0 = arith.constant 0 : i32
    %c0_i32_1 = arith.constant 0 : i32
    return %c0_i32, %c0_i32_0 : i32, i32
  }
  func.func @transform_1(%arg0: i32) -> (i32, i32) {
    %c0_i32 = arith.constant 0 : i32
    %c0_i32_0 = arith.constant 0 : i32
    return %c0_i32, %arg0 : i32, i32
  }
  func.func @transform_2(%arg0: i32) -> (i32, i32) {
    %c0_i32 = arith.constant 0 : i32
    %c0_i32_0 = arith.constant 0 : i32
    return %c0_i32, %arg0 : i32, i32
  }
  func.func @transform_3(%arg0: i32) -> (i32, i32) {
    %c0_i32 = arith.constant 0 : i32
    %c0_i32_0 = arith.constant 0 : i32
    return %c0_i32, %arg0 : i32, i32
  }
}

</mosaic_0001>

<bundles_post_ra>
// kernel: vgg_backbone_forward.9
= control target key start
LH: loop header
LB: loop body
LE: loop exit
PB: predicated region body
PF: predicated region fallthrough
CT: control target
= control target key end

     0   :  { %s660_s1 = inlined_call_operand.vmem [shape: bf16[128,128], index: 1, kind: input, shape index: {}]   ;;  %s661_s0 = inlined_call_operand.vmem [shape: bf16[128,128], index: 0, kind: input, shape index: {}]   ;;  %s662_s2 = inlined_call_operand.vmem [shape: f32[2,128], index: 2, kind: input, shape index: {}]   ;;  %s663_s3 = inlined_call_operand.vmem [shape: bf16[128,128], index: 3, kind: output, shape index: {}]  }
   0x1   :  { %v447_v0 = vld [vmem:[%s660_s1 + $0x38] sm:$0xff]  ;;  %v446_v1 = vld [vmem:[%s660_s1 + $0x30] sm:$0xff]  ;;  %v445_v2 = vld [vmem:[%s660_s1 + $0x28] sm:$0xff] }
   0x2   :  { %142 = vmatpush.bf16.msra.mxu0 %v447_v0  ;;  %495 = vmatpush.bf16.msra.mxu1 %v447_v0  ;;  %v444_v3 = vld [vmem:[%s660_s1 + $0x20] sm:$0xff]  ;;  %v443_v4 = vld [vmem:[%s660_s1 + $0x18] sm:$0xff]  ;;  %v442_v5 = vld [vmem:[%s660_s1 + $0x10] sm:$0xff] }
   0x3   :  { %496 = vmatpush.bf16.msra.mxu2 %v447_v0  ;;  %497 = vmatpush.bf16.msra.mxu3 %v447_v0  ;;  %v441_v6 = vld [vmem:[%s660_s1 + $0x8] sm:$0xff]  ;;  %v440_v7 = vld [vmem:[%s660_s1] sm:$0xff]  ;;  %v434_v9 = vld [vmem:[%s661_s0 + $0x10] sm:$0xff] }
   0x4   :  { %v432_v8 = vld [vmem:[%s661_s0] sm:$0xff]  ;;  %v438_v11 = vld [vmem:[%s661_s0 + $0x30] sm:$0xff]  ;;  %v433_v12 = vld [vmem:[%s661_s0 + $0x8] sm:$0xff] }
   0x5   :  { %v436_v10 = vld [vmem:[%s661_s0 + $0x20] sm:$0xff]  ;;  %v435_v13 = vld [vmem:[%s661_s0 + $0x18] sm:$0xff]  ;;  %v437_v14 = vld [vmem:[%s661_s0 + $0x28] sm:$0xff] }
   0x6   :  { %143 = vmatpush.bf16.msra.mxu0 %v446_v1  ;;  %498 = vmatpush.bf16.msra.mxu1 %v446_v1  ;;  %v439_v15 = vld [vmem:[%s661_s0 + $0x38] sm:$0xff] }
   0x7   :  { %499 = vmatpush.bf16.msra.mxu2 %v446_v1  ;;  %500 = vmatpush.bf16.msra.mxu3 %v446_v1 }
   0xa   :  { %144 = vmatpush.bf16.msra.mxu0 %v445_v2  ;;  %501 = vmatpush.bf16.msra.mxu1 %v445_v2 }
   0xb   :  { %502 = vmatpush.bf16.msra.mxu2 %v445_v2  ;;  %503 = vmatpush.bf16.msra.mxu3 %v445_v2 }
   0xe   :  { %145 = vmatpush.bf16.msra.mxu0 %v444_v3  ;;  %504 = vmatpush.bf16.msra.mxu1 %v444_v3 }
   0xf   :  { %505 = vmatpush.bf16.msra.mxu2 %v444_v3  ;;  %506 = vmatpush.bf16.msra.mxu3 %v444_v3 }
  0x12   :  { %146 = vmatpush.bf16.msra.mxu0 %v443_v4  ;;  %507 = vmatpush.bf16.msra.mxu1 %v443_v4 }
  0x13   :  { %508 = vmatpush.bf16.msra.mxu2 %v443_v4  ;;  %509 = vmatpush.bf16.msra.mxu3 %v443_v4 }
  0x16   :  { %147 = vmatpush.bf16.msra.mxu0 %v442_v5  ;;  %510 = vmatpush.bf16.msra.mxu1 %v442_v5 }
  0x17   :  { %511 = vmatpush.bf16.msra.mxu2 %v442_v5  ;;  %512 = vmatpush.bf16.msra.mxu3 %v442_v5 }
  0x1a   :  { %148 = vmatpush.bf16.msra.mxu0 %v441_v6  ;;  %513 = vmatpush.bf16.msra.mxu1 %v441_v6 }
  0x1b   :  { %514 = vmatpush.bf16.msra.mxu2 %v441_v6  ;;  %515 = vmatpush.bf16.msra.mxu3 %v441_v6 }
  0x1e   :  { %149 = vmatpush.bf16.msra.mxu0 %v440_v7  ;;  %516 = vmatpush.bf16.msra.mxu1 %v440_v7 }
  0x1f   :  { %517 = vmatpush.bf16.msra.mxu2 %v440_v7  ;;  %518 = vmatpush.bf16.msra.mxu3 %v440_v7 }
  0x21   :  { %150 = vmatmul.bf16.vlgmr.msra.gmra.mxu0 %v432_v8  ;;  %160 = vmatmul.bf16.vlgmr.msra.gmra.mxu1 %v434_v9 }
  0x22   :  { %170 = vmatmul.bf16.vlgmr.msra.gmra.mxu2 %v436_v10  ;;  %180 = vmatmul.bf16.vlgmr.msra.gmra.mxu3 %v438_v11 }
  0x31   :  { %155 = vmatmul.bf16.gmra.mxu0 %v433_v12  ;;  %165 = vmatmul.bf16.gmra.mxu1 %v435_v13 }
  0x32   :  { %175 = vmatmul.bf16.gmra.mxu2 %v437_v14  ;;  %185 = vmatmul.bf16.gmra.mxu3 %v439_v15 }
  0x9e   :  { %v151_v16 = vpop.f32.mrf.mxu0  ;;  %v161_v17 = vpop.f32.mrf.mxu1 }
  0xa5   :  { %v171_v19 = vpop.f32.mrf.mxu2  ;;  %v181_v22 = vpop.f32.mrf.mxu3 }
  0xa6   :  { %v153_v18 = vpop.f32.mrf.mxu0  ;;  %v163_v20 = vpop.f32.mrf.mxu1 }
  0xa7   :  { %v191_v24 = vadd.f32 %v153_v18, %v151_v16 }
  0xad   :  { %v173_v23 = vpop.f32.mrf.mxu2  ;;  %v183_v30 = vpop.f32.mrf.mxu3 }
  0xae   :  { %v156_v21 = vpop.f32.mrf.mxu0  ;;  %v166_v25 = vpop.f32.mrf.mxu1 }
  0xaf   :  { %v192_v26 = vadd.f32 %v191_v24, %v156_v21 }
  0xb5   :  { %v176_v32 = vpop.f32.mrf.mxu2  ;;  %v186_v38 = vpop.f32.mrf.mxu3 }
  0xb6   :  { %v158_v27 = vpop.f32.mrf.mxu0  ;;  %v168_v34 = vpop.f32.mrf.mxu1 }
  0xb7   :  { %v193_v28 = vadd.f32 %v192_v26, %v158_v27 }
  0xb9   :  { %v194_v29 = vadd.f32 %v193_v28, %v161_v17 }
  0xbb   :  { %v195_v31 = vadd.f32 %v194_v29, %v163_v20 }
  0xbd   :  { %v196_v33 = vadd.f32 %v195_v31, %v166_v25  ;;  %v178_v40 = vpop.f32.mrf.mxu2  ;;  %v188_v45 = vpop.f32.mrf.mxu3 }
  0xbf   :  { %v197_v35 = vadd.f32 %v196_v33, %v168_v34 }
  0xc1   :  { %v198_v36 = vadd.f32 %v197_v35, %v171_v19 }
  0xc3   :  { %v199_v37 = vadd.f32 %v198_v36, %v173_v23 }
  0xc5   :  { %v200_v39 = vadd.f32 %v199_v37, %v176_v32 }
  0xc7   :  { %v201_v41 = vadd.f32 %v200_v39, %v178_v40 }
  0xc9   :  { %v202_v42 = vadd.f32 %v201_v41, %v181_v22 }
  0xcb   :  { %v203_v43 = vadd.f32 %v202_v42, %v183_v30 }
  0xcd   :  { %v204_v44 = vadd.f32 %v203_v43, %v186_v38 }
  0xcf   :  { %v205_v46 = vadd.f32 %v204_v44, %v188_v45 }
  0xd1   :  { %v206_v47 = vrot.slane %v205_v46, 4 }
  0xd3   :  { %v207_v48 = vadd.f32 %v206_v47, %v205_v46 }
  0xd5   :  { %v208_v49 = vrot.slane %v207_v48, 2 }
  0xd7   :  { %v209_v50 = vadd.f32 %v208_v49, %v207_v48 }
  0xd9   :  { %v210_v51 = vrot.slane %v209_v50, 1 }
  0xdb   :  { %v211_v52 = vadd.f32 %v210_v51, %v209_v50  ;;  %v268_v51 = vld [vmem:[%s662_s2] sm:$0x1] }
  0xdd   :  { %v212_v53 = vmul.f32 0.0078125, %v211_v52 }
  0xdf   :  { %v590_v54 = vsub.f32 %v151_v16, %v212_v53  ;;  %v592_v55 = vsub.f32 %v153_v18, %v212_v53  ;;  %v594_v56 = vsub.f32 %v156_v21, %v212_v53  ;;  %v600_v59 = vsub.f32 %v158_v27, %v212_v53 }
  0xe0   :  { %v602_v60 = vsub.f32 %v161_v17, %v212_v53  ;;  %v606_v63 = vsub.f32 %v163_v20, %v212_v53  ;;  %v610_v2 = vsub.f32 %v166_v25, %v212_v53  ;;  %v614_v5 = vsub.f32 %v168_v34, %v212_v53 }
  0xe1   :  { %v229_v57 = vmul.f32 %v590_v54, %v590_v54  ;;  %v230_v58 = vmul.f32 %v592_v55, %v592_v55  ;;  %v231_v61 = vmul.f32 %v594_v56, %v594_v56  ;;  %v232_v0 = vmul.f32 %v600_v59, %v600_v59 }
  0xe2   :  { %v233_v3 = vmul.f32 %v602_v60, %v602_v60  ;;  %v234_v6 = vmul.f32 %v606_v63, %v606_v63  ;;  %v221_v8 = vsub.f32 %v171_v19, %v212_v53  ;;  %v235_v9 = vmul.f32 %v610_v2, %v610_v2 }
  0xe3   :  { %v245_v62 = vadd.f32 %v230_v58, %v229_v57  ;;  %v222_v11 = vsub.f32 %v173_v23, %v212_v53  ;;  %v236_v12 = vmul.f32 %v614_v5, %v614_v5  ;;  %v223_v14 = vsub.f32 %v176_v32, %v212_v53 }
  0xe4   :  { %v237_v15 = vmul.f32 %v221_v8, %v221_v8  ;;  %v224_v17 = vsub.f32 %v178_v40, %v212_v53  ;;  %v225_v21 = vsub.f32 %v181_v22, %v212_v53  ;;  %v226_v26 = vsub.f32 %v183_v30, %v212_v53 }
  0xe5   :  { %v246_v1 = vadd.f32 %v245_v62, %v231_v61  ;;  %v238_v18 = vmul.f32 %v222_v11, %v222_v11  ;;  %v239_v24 = vmul.f32 %v223_v14, %v223_v14  ;;  %v227_v28 = vsub.f32 %v186_v38, %v212_v53 }
  0xe6   :  { %v240_v19 = vmul.f32 %v224_v17, %v224_v17  ;;  %v241_v29 = vmul.f32 %v225_v21, %v225_v21  ;;  %v228_v23 = vsub.f32 %v188_v45, %v212_v53  ;;  %v242_v33 = vmul.f32 %v226_v26, %v226_v26 }
  0xe7   :  { %v247_v4 = vadd.f32 %v246_v1, %v232_v0  ;;  %v243_v35 = vmul.f32 %v227_v28, %v227_v28 }
  0xe8   :  { %v244_v32 = vmul.f32 %v228_v23, %v228_v23 }
  0xe9   :  { %v248_v7 = vadd.f32 %v247_v4, %v233_v3  ;;  %v519_v3 = vld [vmem:[%s662_s2 + $0x1] ss:$0 sm:$0xff] }
  0xeb   :  { %v249_v10 = vadd.f32 %v248_v7, %v234_v6 }
  0xed   :  { %v250_v13 = vadd.f32 %v249_v10, %v235_v9 }
  0xef   :  { %v251_v16 = vadd.f32 %v250_v13, %v236_v12 }
  0xf1   :  { %v252_v20 = vadd.f32 %v251_v16, %v237_v15 }
  0xf3   :  { %v253_v25 = vadd.f32 %v252_v20, %v238_v18 }
  0xf5   :  { %v254_v27 = vadd.f32 %v253_v25, %v239_v24 }
  0xf7   :  { %v255_v31 = vadd.f32 %v254_v27, %v240_v19 }
  0xf9   :  { %v256_v34 = vadd.f32 %v255_v31, %v241_v29 }
  0xfb   :  { %v257_v36 = vadd.f32 %v256_v34, %v242_v33 }
  0xfd   :  { %v258_v37 = vadd.f32 %v257_v36, %v243_v35 }
  0xff   :  { %v259_v39 = vadd.f32 %v258_v37, %v244_v32 }
 0x101   :  { %v260_v40 = vrot.slane %v259_v39, 4 }
 0x103   :  { %v261_v41 = vadd.f32 %v260_v40, %v259_v39 }
 0x105   :  { %v262_v42 = vrot.slane %v261_v41, 2 }
 0x107   :  { %v263_v22 = vadd.f32 %v262_v42, %v261_v41 }
 0x109   :  { %v264_v43 = vrot.slane %v263_v22, 1 }
 0x10b   :  { %v265_v44 = vadd.f32 %v264_v43, %v263_v22 }
 0x10d   :  { %v266_v30 = vmul.f32 0.0078125, %v265_v44 }
 0x10f   :  { %v267_v46 = vmax.f32 %v266_v30, 0.0 }
 0x111   :  { %v269_v47 = vadd.f32 1e-05, %v267_v46 }
 0x113   :  { %520 = vrsqrt.f32 %v269_v47  ;;  %vm276_vm1 = vweird.f32 %v269_v47 }
 0x119   :  { %v521_v38 = vpop.eup %520 }
 0x11a   :  { %v271_v48 = vmul.f32 %v521_v38, %v269_v47  ;;  %vm277_vm0 = vweird.f32 %v521_v38 }
 0x11b   :  { %vm278_vm2 = vmor %vm276_vm1, %vm277_vm0 }
 0x11c   :  { %v272_v45 = vmul.f32 %v521_v38, %v271_v48 }
 0x11e   :  { %v273_v49 = vmul.f32 0.5, %v272_v45 }
 0x120   :  { %v274_v50 = vsub.f32 1.5, %v273_v49 }
 0x122   :  { %v275_v52 = vmul.f32 %v521_v38, %v274_v50 }
 0x124   :  { %v279_v53 = vsel %vm278_vm2, %v521_v38, %v275_v52 }
 0x125   :  { %v280_v57 = vmul.f32 %v279_v53, %v268_v51 }
 0x127   :  { %v282_v58 = vperm.slane %v280_v57, 0 }
 0x129   :  { %v283_v61 = vmul.f32 %v282_v58, %v590_v54  ;;  %v284_v62 = vmul.f32 %v282_v58, %v592_v55  ;;  %v285_v0 = vmul.f32 %v282_v58, %v594_v56  ;;  %v286_v1 = vmul.f32 %v282_v58, %v600_v59 }
 0x12a   :  { %v287_v4 = vmul.f32 %v282_v58, %v602_v60  ;;  %v288_v6 = vmul.f32 %v282_v58, %v606_v63  ;;  %v289_v7 = vmul.f32 %v282_v58, %v610_v2  ;;  %v290_v9 = vmul.f32 %v282_v58, %v614_v5 }
 0x12b   :  { %v291_v10 = vmul.f32 %v282_v58, %v221_v8  ;;  %v292_v54 = vmul.f32 %v282_v58, %v222_v11  ;;  %v293_v12 = vmul.f32 %v282_v58, %v223_v14  ;;  %v294_v55 = vmul.f32 %v282_v58, %v224_v17 }
 0x12c   :  { %v295_v13 = vmul.f32 %v282_v58, %v225_v21  ;;  %v296_v56 = vmul.f32 %v282_v58, %v226_v26  ;;  %v297_v15 = vmul.f32 %v282_v58, %v227_v28  ;;  %v298_v59 = vmul.f32 %v282_v58, %v228_v23 }
 0x12d   :  { %v300_v16 = vadd.f32 %v519_v3, %v283_v61  ;;  %v301_v18 = vadd.f32 %v519_v3, %v284_v62  ;;  %v302_v20 = vadd.f32 %v519_v3, %v285_v0  ;;  %v303_v24 = vadd.f32 %v519_v3, %v286_v1 }
 0x12e   :  { %v304_v25 = vadd.f32 %v519_v3, %v287_v4  ;;  %v305_v60 = vadd.f32 %v519_v3, %v288_v6  ;;  %v306_v19 = vadd.f32 %v519_v3, %v289_v7  ;;  %v307_v63 = vadd.f32 %v519_v3, %v290_v9 }
 0x12f   :  { %v308_v27 = vadd.f32 %v519_v3, %v291_v10  ;;  %v309_v2 = vadd.f32 %v519_v3, %v292_v54  ;;  %v310_v29 = vadd.f32 %v519_v3, %v293_v12  ;;  %v311_v5 = vadd.f32 %v519_v3, %v294_v55 }
 0x130   :  { %v312_v8 = vadd.f32 %v519_v3, %v295_v13  ;;  %v313_v11 = vadd.f32 %v519_v3, %v296_v56  ;;  %v314_v14 = vadd.f32 %v519_v3, %v297_v15  ;;  %v315_v17 = vadd.f32 %v519_v3, %v298_v59 }
 0x131   :  { %v316_v21 = vmax.f32 %v300_v16, 0.0  ;;  %v317_v26 = vmax.f32 %v301_v18, 0.0  ;;  %v318_v28 = vmax.f32 %v302_v20, 0.0  ;;  %v319_v31 = vmax.f32 %v303_v24, 0.0 }
 0x132   :  { %v320_v23 = vmax.f32 %v304_v25, 0.0  ;;  %v321_v33 = vmax.f32 %v305_v60, 0.0  ;;  %v322_v34 = vmax.f32 %v306_v19, 0.0  ;;  %v323_v35 = vmax.f32 %v307_v63, 0.0 }
 0x133   :  { %v324_v36 = vmax.f32 %v308_v27, 0.0  ;;  %v325_v32 = vmax.f32 %v309_v2, 0.0  ;;  %v326_v37 = vmax.f32 %v310_v29, 0.0  ;;  %v327_v39 = vmax.f32 %v311_v5, 0.0 }
 0x134   :  { %v328_v40 = vmax.f32 %v312_v8, 0.0  ;;  %v329_v41 = vmax.f32 %v313_v11, 0.0  ;;  %v451_v42 = vpack.c.bf16 %v317_v26, %v316_v21  ;;  %v456_v22 = vpack.c.bf16 %v319_v31, %v318_v28 }
 0x135   :  { %v461_v43 = vpack.c.bf16 %v321_v33, %v320_v23  ;;  %v330_v44 = vmax.f32 %v314_v14, 0.0  ;;  %v331_v30 = vmax.f32 %v315_v17, 0.0  ;;  %v466_v46 = vpack.c.bf16 %v323_v35, %v322_v34 }
 0x136   :  { %452 = vst [vmem:[%s663_s3] sm:$0xff] %v451_v42   ;;  %v471_v47 = vpack.c.bf16 %v325_v32, %v324_v36  ;;  %v476_v38 = vpack.c.bf16 %v327_v39, %v326_v37  ;;  %v481_v48 = vpack.c.bf16 %v329_v41, %v328_v40 }
 0x137   :  { %488 = vst [vmem:[%s663_s3 + $0x8] sm:$0xff] %v456_v22   ;;  %v486_v45 = vpack.c.bf16 %v331_v30, %v330_v44 }
 0x138   :  { %489 = vst [vmem:[%s663_s3 + $0x10] sm:$0xff] %v461_v43  }
 0x139   :  { %490 = vst [vmem:[%s663_s3 + $0x18] sm:$0xff] %v466_v46  }
 0x13a   :  { %491 = vst [vmem:[%s663_s3 + $0x20] sm:$0xff] %v471_v47  }
 0x13b   :  { %492 = vst [vmem:[%s663_s3 + $0x28] sm:$0xff] %v476_v38  }
 0x13c   :  { %493 = vst [vmem:[%s663_s3 + $0x30] sm:$0xff] %v481_v48  }
 0x13d   :  { %494 = vst [vmem:[%s663_s3 + $0x38] sm:$0xff] %v486_v45  }

// kernel: vgg_backbone_forward.10
= control target key start
LH: loop header
LB: loop body
LE: loop exit
PB: predicated region body
PF: predicated region fallthrough
CT: control target
= control target key end

     0   :  { %s3352_s1 = inlined_call_operand.vmem [shape: bf16[1152,128], index: 1, kind: input, shape index: {}]   ;;  %s3353_s0 = inlined_call_operand.vmem [shape: bf16[128,1152], index: 0, kind: input, shape index: {}]   ;;  %s3354_s2 = inlined_call_operand.vmem [shape: f32[2,128], index: 2, kind: input, shape index: {}]   ;;  %s3355_s3 = inlined_call_operand.vmem [shape: bf16[128,128], index: 3, kind: output, shape index: {}]  }
   0x1   :  { %v2311_v0 = vld [vmem:[%s3352_s1 + $0x38] sm:$0xff]  ;;  %v2310_v1 = vld [vmem:[%s3352_s1 + $0x30] sm:$0xff]  ;;  %v2309_v2 = vld [vmem:[%s3352_s1 + $0x28] sm:$0xff] }
   0x2   :  { %2423 = vmatpush.bf16.msra.mxu1 %v2311_v0  ;;  %2424 = vmatpush.bf16.msra.mxu2 %v2311_v0  ;;  %v2308_v3 = vld [vmem:[%s3352_s1 + $0x20] sm:$0xff]  ;;  %v2307_v4 = vld [vmem:[%s3352_s1 + $0x18] sm:$0xff]  ;;  %v2306_v5 = vld [vmem:[%s3352_s1 + $0x10] sm:$0xff] }
   0x3   :  { %2425 = vmatpush.bf16.msra.mxu3 %v2311_v0  ;;  %1038 = vmatpush.bf16.msra.mxu0 %v2311_v0  ;;  %v2305_v6 = vld [vmem:[%s3352_s1 + $0x8] sm:$0xff]  ;;  %v2304_v7 = vld [vmem:[%s3352_s1] sm:$0xff]  ;;  %v1730_v8 = vld [vmem:[%s3353_s0 + $0x90] sm:$0xf] }
   0x4   :  { %v2254_v9 = vld [vmem:[%s3353_s0 + $0xb0] sm:$0xf0]  ;;  %v1802_v10 = vld [vmem:[%s3353_s0 + $0x120] sm:$0xf]  ;;  %v2272_v11 = vld [vmem:[%s3353_s0 + $0x140] sm:$0xf0] }
   0x5   :  { %v1874_v12 = vld [vmem:[%s3353_s0 + $0x1b0] sm:$0xf]  ;;  %v2290_v13 = vld [vmem:[%s3353_s0 + $0x1d0] sm:$0xf0]  ;;  %v1658_v14 = vld [vmem:[%s3353_s0] sm:$0xf]  ;;  %v1731_v18 = vor.u32 %v2254_v9, %v1730_v8  ;;  %v1803_v19 = vor.u32 %v2272_v11, %v1802_v10 }
   0x6   :  { %2426 = vmatpush.bf16.msra.mxu1 %v2310_v1  ;;  %2427 = vmatpush.bf16.msra.mxu2 %v2310_v1  ;;  %v2236_v15 = vld [vmem:[%s3353_s0 + $0x20] sm:$0xf0]  ;;  %v2327_v16 = vld [vmem:[%s3352_s1 + $0xb8] sm:$0xff]  ;;  %v1875_v20 = vor.u32 %v2290_v13, %v1874_v12  ;;  %v2326_v24 = vld [vmem:[%s3352_s1 + $0xb0] sm:$0xff] }
   0x7   :  { %2428 = vmatpush.bf16.msra.mxu3 %v2310_v1  ;;  %1039 = vmatpush.bf16.msra.mxu0 %v2310_v1  ;;  %v2319_v17 = vld [vmem:[%s3352_s1 + $0x78] sm:$0xff]  ;;  %v1659_v21 = vor.u32 %v2236_v15, %v1658_v14  ;;  %v2318_v25 = vld [vmem:[%s3352_s1 + $0x70] sm:$0xff]  ;;  %v2325_v28 = vld [vmem:[%s3352_s1 + $0xa8] sm:$0xff] }
   0x8   :  { %v2335_v22 = vld [vmem:[%s3352_s1 + $0xf8] sm:$0xff]  ;;  %v2334_v26 = vld [vmem:[%s3352_s1 + $0xf0] sm:$0xff]  ;;  %v2317_v29 = vld [vmem:[%s3352_s1 + $0x68] sm:$0xff] }
   0x9   :  { %v2343_v23 = vld [vmem:[%s3352_s1 + $0x138] sm:$0xff]  ;;  %v2342_v27 = vld [vmem:[%s3352_s1 + $0x130] sm:$0xff]  ;;  %v2333_v30 = vld [vmem:[%s3352_s1 + $0xe8] sm:$0xff] }
   0xa   :  { %2429 = vmatpush.bf16.msra.mxu1 %v2309_v2  ;;  %2430 = vmatpush.bf16.msra.mxu2 %v2309_v2  ;;  %v2341_v31 = vld [vmem:[%s3352_s1 + $0x128] sm:$0xff]  ;;  %v2324_v32 = vld [vmem:[%s3352_s1 + $0xa0] sm:$0xff]  ;;  %v1766_v36 = vld [vmem:[%s3353_s0 + $0xd8] sm:$0xf] }
   0xb   :  { %2431 = vmatpush.bf16.msra.mxu3 %v2309_v2  ;;  %1040 = vmatpush.bf16.msra.mxu0 %v2309_v2  ;;  %v2316_v33 = vld [vmem:[%s3352_s1 + $0x60] sm:$0xff]  ;;  %v2263_v37 = vld [vmem:[%s3353_s0 + $0xf8] sm:$0xf0]  ;;  %v1838_v38 = vld [vmem:[%s3353_s0 + $0x168] sm:$0xf] }
   0xc   :  { %v2332_v34 = vld [vmem:[%s3352_s1 + $0xe0] sm:$0xff]  ;;  %v2281_v39 = vld [vmem:[%s3353_s0 + $0x188] sm:$0xf0]  ;;  %v1910_v40 = vld [vmem:[%s3353_s0 + $0x1f8] sm:$0xf]  ;;  %v1767_v46 = vor.u32 %v2263_v37, %v1766_v36 }
   0xd   :  { %v2340_v35 = vld [vmem:[%s3352_s1 + $0x120] sm:$0xff]  ;;  %v2299_v41 = vld [vmem:[%s3353_s0 + $0x218] sm:$0xf0]  ;;  %v1694_v42 = vld [vmem:[%s3353_s0 + $0x48] sm:$0xf]  ;;  %v1839_v47 = vor.u32 %v2281_v39, %v1838_v38 }
   0xe   :  { %2432 = vmatpush.bf16.msra.mxu1 %v2308_v3  ;;  %2433 = vmatpush.bf16.msra.mxu2 %v2308_v3  ;;  %v2245_v43 = vld [vmem:[%s3353_s0 + $0x68] sm:$0xf0]  ;;  %v2323_v44 = vld [vmem:[%s3352_s1 + $0x98] sm:$0xff]  ;;  %v1911_v48 = vor.u32 %v2299_v41, %v1910_v40  ;;  %v2322_v52 = vld [vmem:[%s3352_s1 + $0x90] sm:$0xff] }
   0xf   :  { %2434 = vmatpush.bf16.msra.mxu3 %v2308_v3  ;;  %1041 = vmatpush.bf16.msra.mxu0 %v2308_v3  ;;  %v2315_v45 = vld [vmem:[%s3352_s1 + $0x58] sm:$0xff]  ;;  %v1695_v49 = vor.u32 %v2245_v43, %v1694_v42  ;;  %v2314_v53 = vld [vmem:[%s3352_s1 + $0x50] sm:$0xff]  ;;  %v2321_v56 = vld [vmem:[%s3352_s1 + $0x88] sm:$0xff] }
  0x10   :  { %v2331_v50 = vld [vmem:[%s3352_s1 + $0xd8] sm:$0xff]  ;;  %v2330_v54 = vld [vmem:[%s3352_s1 + $0xd0] sm:$0xff]  ;;  %v2313_v57 = vld [vmem:[%s3352_s1 + $0x48] sm:$0xff] }
  0x11   :  { %v2339_v51 = vld [vmem:[%s3352_s1 + $0x118] sm:$0xff]  ;;  %v2338_v55 = vld [vmem:[%s3352_s1 + $0x110] sm:$0xff]  ;;  %v2329_v58 = vld [vmem:[%s3352_s1 + $0xc8] sm:$0xff] }
  0x12   :  { %2435 = vmatpush.bf16.msra.mxu1 %v2307_v4  ;;  %2436 = vmatpush.bf16.msra.mxu2 %v2307_v4  ;;  %v2337_v59 = vld [vmem:[%s3352_s1 + $0x108] sm:$0xff]  ;;  %v2320_v60 = vld [vmem:[%s3352_s1 + $0x80] sm:$0xff]  ;;  %v2359_v2 = vld [vmem:[%s3352_s1 + $0x1b8] sm:$0xff] }
  0x13   :  { %2437 = vmatpush.bf16.msra.mxu3 %v2307_v4  ;;  %1042 = vmatpush.bf16.msra.mxu0 %v2307_v4  ;;  %v2312_v61 = vld [vmem:[%s3352_s1 + $0x40] sm:$0xff]  ;;  %v1660_v1 = vld [vmem:[%s3353_s0 + $0x24] sm:$0xf0]  ;;  %v2351_v3 = vld [vmem:[%s3352_s1 + $0x178] sm:$0xff] }
  0x14   :  { %v2232_v62 = vld [vmem:[%s3353_s0 + $0x4] sm:$0xf]  ;;  %v1666_v4 = vld [vmem:[%s3353_s0 + $0x8] sm:$0xf]  ;;  %v1674_v8 = vld [vmem:[%s3353_s0 + $0x10] sm:$0xf] }
  0x15   :  { %v2328_v63 = vld [vmem:[%s3352_s1 + $0xc0] sm:$0xff]  ;;  %v2238_v9 = vld [vmem:[%s3353_s0 + $0x30] sm:$0xf0]  ;;  %v2367_v10 = vld [vmem:[%s3352_s1 + $0x1f8] sm:$0xff]  ;;  %v1663_v12 = vor.u32 %v2232_v62, %v1660_v1 }
  0x16   :  { %2438 = vmatpush.bf16.msra.mxu1 %v2306_v5  ;;  %2439 = vmatpush.bf16.msra.mxu2 %v2306_v5  ;;  %v2336_v0 = vld [vmem:[%s3352_s1 + $0x100] sm:$0xff]  ;;  %v2375_v11 = vld [vmem:[%s3352_s1 + $0x238] sm:$0xff]  ;;  %v1675_v15 = vor.u32 %v2238_v9, %v1674_v8  ;;  %v2250_v40 = vld [vmem:[%s3353_s0 + $0x94] sm:$0xf] }
  0x17   :  { %2440 = vmatpush.bf16.msra.mxu3 %v2306_v5  ;;  %1043 = vmatpush.bf16.msra.mxu0 %v2306_v5  ;;  %v2237_v5 = vld [vmem:[%s3353_s0 + $0x28] sm:$0xf0]  ;;  %v2356_v36 = vld [vmem:[%s3352_s1 + $0x1a0] sm:$0xff]  ;;  %v1732_v41 = vld [vmem:[%s3353_s0 + $0xb4] sm:$0xf0] }
  0x18   :  { %v1667_v13 = vor.u32 %v2237_v5, %v1666_v4  ;;  %v2364_v37 = vld [vmem:[%s3352_s1 + $0x1e0] sm:$0xff]  ;;  %v1738_v42 = vld [vmem:[%s3353_s0 + $0x98] sm:$0xf]  ;;  %v2255_v43 = vld [vmem:[%s3353_s0 + $0xb8] sm:$0xf0] }
  0x19   :  { %v2348_v38 = vld [vmem:[%s3352_s1 + $0x160] sm:$0xff]  ;;  %v1782_v62 = vld [vmem:[%s3353_s0 + $0xe8] sm:$0xf]  ;;  %v2354_v4 = vld [vmem:[%s3352_s1 + $0x190] sm:$0xff] }
  0x1a   :  { %2441 = vmatpush.bf16.msra.mxu1 %v2305_v6  ;;  %2442 = vmatpush.bf16.msra.mxu2 %v2305_v6  ;;  %v2372_v39 = vld [vmem:[%s3352_s1 + $0x220] sm:$0xff]  ;;  %v2362_v5 = vld [vmem:[%s3352_s1 + $0x1d0] sm:$0xff]  ;;  %v1804_v9 = vld [vmem:[%s3353_s0 + $0x144] sm:$0xf0] }
  0x1b   :  { %2443 = vmatpush.bf16.msra.mxu3 %v2305_v6  ;;  %1044 = vmatpush.bf16.msra.mxu0 %v2305_v6  ;;  %v2233_v6 = vld [vmem:[%s3353_s0 + $0xc] sm:$0xf]  ;;  %v2268_v8 = vld [vmem:[%s3353_s0 + $0x124] sm:$0xf] }
  0x1e   :  { %2444 = vmatpush.bf16.msra.mxu1 %v2304_v7  ;;  %2445 = vmatpush.bf16.msra.mxu2 %v2304_v7 }
  0x1f   :  { %2446 = vmatpush.bf16.msra.mxu3 %v2304_v7  ;;  %1045 = vmatpush.bf16.msra.mxu0 %v2304_v7  ;;  %v1668_v7 = vld [vmem:[%s3353_s0 + $0x2c] sm:$0xf0] }
  0x20   :  { %v1671_v14 = vor.u32 %v2233_v6, %v1668_v7  ;;  %v2346_v6 = vld [vmem:[%s3352_s1 + $0x150] sm:$0xff] }
  0x21   :  { %1056 = vmatmul.bf16.vlgmr.msra.gmra.mxu1 %v1731_v18  ;;  %1066 = vmatmul.bf16.vlgmr.msra.gmra.mxu2 %v1803_v19  ;;  %v2366_v18 = vld [vmem:[%s3352_s1 + $0x1f0] sm:$0xff] }
  0x22   :  { %1136 = vmatpush.bf16.msrb.mxu2 %v2327_v16  ;;  %1087 = vmatpush.bf16.msrb.mxu1 %v2319_v17  ;;  %v2358_v16 = vld [vmem:[%s3352_s1 + $0x1b0] sm:$0xff] }
  0x23   :  { %1076 = vmatmul.bf16.vlgmr.msra.gmra.mxu3 %v1875_v20  ;;  %1046 = vmatmul.bf16.vlgmr.msra.gmra.mxu0 %v1659_v21  ;;  %v2350_v17 = vld [vmem:[%s3352_s1 + $0x170] sm:$0xff]  ;;  %v2357_v20 = vld [vmem:[%s3352_s1 + $0x1a8] sm:$0xff] }
  0x24   :  { %1185 = vmatpush.bf16.msrb.mxu3 %v2335_v22  ;;  %1234 = vmatpush.bf16.msrb.mxu0 %v2343_v23  ;;  %v2374_v19 = vld [vmem:[%s3352_s1 + $0x230] sm:$0xff]  ;;  %v2349_v21 = vld [vmem:[%s3352_s1 + $0x168] sm:$0xff] }
  0x25   :  { %v2365_v22 = vld [vmem:[%s3352_s1 + $0x1e8] sm:$0xff]  ;;  %v2370_v7 = vld [vmem:[%s3352_s1 + $0x210] sm:$0xff] }
  0x26   :  { %1137 = vmatpush.bf16.msrb.mxu2 %v2326_v24  ;;  %1088 = vmatpush.bf16.msrb.mxu1 %v2318_v25  ;;  %v2373_v23 = vld [vmem:[%s3352_s1 + $0x228] sm:$0xff]  ;;  %v1696_v25 = vld [vmem:[%s3353_s0 + $0x6c] sm:$0xf0] }
  0x27   :  { %v2241_v24 = vld [vmem:[%s3353_s0 + $0x4c] sm:$0xf] }
  0x28   :  { %1186 = vmatpush.bf16.msrb.mxu3 %v2334_v26  ;;  %1235 = vmatpush.bf16.msrb.mxu0 %v2342_v27  ;;  %v1702_v26 = vld [vmem:[%s3353_s0 + $0x50] sm:$0xf]  ;;  %v2246_v27 = vld [vmem:[%s3353_s0 + $0x70] sm:$0xf0] }
  0x2a   :  { %1138 = vmatpush.bf16.msrb.mxu2 %v2325_v28  ;;  %1089 = vmatpush.bf16.msrb.mxu1 %v2317_v29  ;;  %v2242_v28 = vld [vmem:[%s3353_s0 + $0x54] sm:$0xf]  ;;  %v1704_v29 = vld [vmem:[%s3353_s0 + $0x74] sm:$0xf0] }
  0x2c   :  { %1187 = vmatpush.bf16.msrb.mxu3 %v2333_v30  ;;  %1236 = vmatpush.bf16.msrb.mxu0 %v2341_v31  ;;  %v1710_v30 = vld [vmem:[%s3353_s0 + $0x58] sm:$0xf]  ;;  %v2247_v31 = vld [vmem:[%s3353_s0 + $0x78] sm:$0xf0] }
  0x2e   :  { %1139 = vmatpush.bf16.msrb.mxu2 %v2324_v32  ;;  %1090 = vmatpush.bf16.msrb.mxu1 %v2316_v33  ;;  %v1699_v32 = vor.u32 %v2241_v24, %v1696_v25  ;;  %v1703_v33 = vor.u32 %v2246_v27, %v1702_v26  ;;  %v2277_v24 = vld [vmem:[%s3353_s0 + $0x16c] sm:$0xf]  ;;  %v1840_v25 = vld [vmem:[%s3353_s0 + $0x18c] sm:$0xf0]  ;;  %v2282_v27 = vld [vmem:[%s3353_s0 + $0x190] sm:$0xf0] }
  0x2f   :  { %v1846_v26 = vld [vmem:[%s3353_s0 + $0x170] sm:$0xf] }
  0x30   :  { %1188 = vmatpush.bf16.msrb.mxu3 %v2332_v34  ;;  %1237 = vmatpush.bf16.msrb.mxu0 %v2340_v35  ;;  %v1707_v34 = vor.u32 %v2242_v28, %v1704_v29  ;;  %v1711_v35 = vor.u32 %v2247_v31, %v1710_v30  ;;  %v2278_v28 = vld [vmem:[%s3353_s0 + $0x174] sm:$0xf]  ;;  %v1848_v29 = vld [vmem:[%s3353_s0 + $0x194] sm:$0xf0]  ;;  %v2283_v31 = vld [vmem:[%s3353_s0 + $0x198] sm:$0xf0] }
  0x31   :  { %1061 = vmatmul.bf16.gmra.mxu1 %v1767_v46  ;;  %1071 = vmatmul.bf16.gmra.mxu2 %v1839_v47  ;;  %v1746_v46 = vld [vmem:[%s3353_s0 + $0xa0] sm:$0xf]  ;;  %v2256_v47 = vld [vmem:[%s3353_s0 + $0xc0] sm:$0xf0]  ;;  %v1854_v30 = vld [vmem:[%s3353_s0 + $0x178] sm:$0xf] }
  0x32   :  { %1140 = vmatpush.bf16.msrb.mxu2 %v2323_v44  ;;  %1091 = vmatpush.bf16.msrb.mxu1 %v2315_v45  ;;  %v2251_v44 = vld [vmem:[%s3353_s0 + $0x9c] sm:$0xf]  ;;  %v1740_v45 = vld [vmem:[%s3353_s0 + $0xbc] sm:$0xf0] }
  0x33   :  { %1081 = vmatmul.bf16.gmra.mxu3 %v1911_v48  ;;  %1051 = vmatmul.bf16.gmra.mxu0 %v1695_v49  ;;  %v1735_v48 = vor.u32 %v2250_v40, %v1732_v41  ;;  %v1739_v49 = vor.u32 %v2255_v43, %v1738_v42  ;;  %v2286_v40 = vld [vmem:[%s3353_s0 + $0x1b4] sm:$0xf]  ;;  %v1876_v41 = vld [vmem:[%s3353_s0 + $0x1d4] sm:$0xf0]  ;;  %v2291_v43 = vld [vmem:[%s3353_s0 + $0x1d8] sm:$0xf0] }
  0x34   :  { %1189 = vmatpush.bf16.msrb.mxu3 %v2331_v50  ;;  %1238 = vmatpush.bf16.msrb.mxu0 %v2339_v51  ;;  %v1743_v50 = vor.u32 %v2251_v44, %v1740_v45  ;;  %v1747_v51 = vor.u32 %v2256_v47, %v1746_v46  ;;  %v1882_v42 = vld [vmem:[%s3353_s0 + $0x1b8] sm:$0xf]  ;;  %v2287_v44 = vld [vmem:[%s3353_s0 + $0x1bc] sm:$0xf]  ;;  %v1884_v45 = vld [vmem:[%s3353_s0 + $0x1dc] sm:$0xf0] }
  0x35   :  { %v1890_v46 = vld [vmem:[%s3353_s0 + $0x1c0] sm:$0xf]  ;;  %v2292_v47 = vld [vmem:[%s3353_s0 + $0x1e0] sm:$0xf0] }
  0x36   :  { %1141 = vmatpush.bf16.msrb.mxu2 %v2322_v52  ;;  %1092 = vmatpush.bf16.msrb.mxu1 %v2314_v53  ;;  %v2355_v52 = vld [vmem:[%s3352_s1 + $0x198] sm:$0xff] }
  0x37   :  { %v2363_v53 = vld [vmem:[%s3352_s1 + $0x1d8] sm:$0xff] }
  0x38   :  { %1190 = vmatpush.bf16.msrb.mxu3 %v2330_v54  ;;  %1239 = vmatpush.bf16.msrb.mxu0 %v2338_v55  ;;  %v2347_v54 = vld [vmem:[%s3352_s1 + $0x158] sm:$0xff] }
  0x39   :  { %v2371_v55 = vld [vmem:[%s3352_s1 + $0x218] sm:$0xff] }
  0x3a   :  { %1142 = vmatpush.bf16.msrb.mxu2 %v2321_v56  ;;  %1093 = vmatpush.bf16.msrb.mxu1 %v2313_v57  ;;  %v2259_v56 = vld [vmem:[%s3353_s0 + $0xdc] sm:$0xf]  ;;  %v1768_v57 = vld [vmem:[%s3353_s0 + $0xfc] sm:$0xf0] }
  0x3c   :  { %1191 = vmatpush.bf16.msrb.mxu3 %v2329_v58  ;;  %1240 = vmatpush.bf16.msrb.mxu0 %v2337_v59  ;;  %v1774_v58 = vld [vmem:[%s3353_s0 + $0xe0] sm:$0xf]  ;;  %v2264_v59 = vld [vmem:[%s3353_s0 + $0x100] sm:$0xf0] }
  0x3d   :  { %v1775_v1 = vor.u32 %v2264_v59, %v1774_v58  ;;  %v2295_v58 = vld [vmem:[%s3353_s0 + $0x1fc] sm:$0xf]  ;;  %v1912_v59 = vld [vmem:[%s3353_s0 + $0x21c] sm:$0xf0] }
  0x3e   :  { %1143 = vmatpush.bf16.msrb.mxu2 %v2320_v60  ;;  %1094 = vmatpush.bf16.msrb.mxu1 %v2312_v61  ;;  %v2260_v60 = vld [vmem:[%s3353_s0 + $0xe4] sm:$0xf]  ;;  %v1776_v61 = vld [vmem:[%s3353_s0 + $0x104] sm:$0xf0] }
  0x40   :  { %1192 = vmatpush.bf16.msrb.mxu3 %v2328_v63  ;;  %1241 = vmatpush.bf16.msrb.mxu0 %v2336_v0  ;;  %v2265_v63 = vld [vmem:[%s3353_s0 + $0x108] sm:$0xf0]  ;;  %v1771_v0 = vor.u32 %v2259_v56, %v1768_v57 }
  0x41   :  { %1095 = vmatmul.bf16.vlgmr.msrb.gmra.mxu1 %v1663_v12  ;;  %1144 = vmatmul.bf16.vlgmr.msrb.gmra.mxu2 %v1667_v13  ;;  %v2269_v12 = vld [vmem:[%s3353_s0 + $0x12c] sm:$0xf]  ;;  %v1812_v13 = vld [vmem:[%s3353_s0 + $0x14c] sm:$0xf0] }
  0x42   :  { %1332 = vmatpush.bf16.msra.mxu2 %v2359_v2  ;;  %1283 = vmatpush.bf16.msra.mxu1 %v2351_v3  ;;  %v1779_v2 = vor.u32 %v2260_v60, %v1776_v61  ;;  %v1783_v3 = vor.u32 %v2265_v63, %v1782_v62  ;;  %v1918_v60 = vld [vmem:[%s3353_s0 + $0x200] sm:$0xf]  ;;  %v2300_v61 = vld [vmem:[%s3353_s0 + $0x220] sm:$0xf0]  ;;  %v1920_v63 = vld [vmem:[%s3353_s0 + $0x224] sm:$0xf0] }
  0x43   :  { %1193 = vmatmul.bf16.vlgmr.msrb.gmra.mxu3 %v1671_v14  ;;  %1242 = vmatmul.bf16.vlgmr.msrb.gmra.mxu0 %v1675_v15  ;;  %v1818_v14 = vld [vmem:[%s3353_s0 + $0x130] sm:$0xf]  ;;  %v2274_v15 = vld [vmem:[%s3353_s0 + $0x150] sm:$0xf0]  ;;  %v2296_v62 = vld [vmem:[%s3353_s0 + $0x204] sm:$0xf] }
  0x44   :  { %1381 = vmatpush.bf16.msra.mxu3 %v2367_v10  ;;  %1430 = vmatpush.bf16.msra.mxu0 %v2375_v11  ;;  %v1810_v10 = vld [vmem:[%s3353_s0 + $0x128] sm:$0xf]  ;;  %v2273_v11 = vld [vmem:[%s3353_s0 + $0x148] sm:$0xf0] }
  0x46   :  { %1333 = vmatpush.bf16.msra.mxu2 %v2358_v16  ;;  %1284 = vmatpush.bf16.msra.mxu1 %v2350_v17  ;;  %v1807_v16 = vor.u32 %v2268_v8, %v1804_v9  ;;  %v1811_v17 = vor.u32 %v2273_v11, %v1810_v10 }
  0x48   :  { %1382 = vmatpush.bf16.msra.mxu3 %v2366_v18  ;;  %1431 = vmatpush.bf16.msra.mxu0 %v2374_v19  ;;  %v1815_v18 = vor.u32 %v2269_v12, %v1812_v13  ;;  %v1819_v19 = vor.u32 %v2274_v15, %v1818_v14  ;;  %v2234_v14 = vld [vmem:[%s3353_s0 + $0x14] sm:$0xf]  ;;  %v1676_v15 = vld [vmem:[%s3353_s0 + $0x34] sm:$0xf0] }
  0x4a   :  { %1334 = vmatpush.bf16.msra.mxu2 %v2357_v20  ;;  %1285 = vmatpush.bf16.msra.mxu1 %v2349_v21  ;;  %v2353_v20 = vld [vmem:[%s3352_s1 + $0x188] sm:$0xff] }
  0x4b   :  { %v2361_v21 = vld [vmem:[%s3352_s1 + $0x1c8] sm:$0xff] }
  0x4c   :  { %1383 = vmatpush.bf16.msra.mxu3 %v2365_v22  ;;  %1432 = vmatpush.bf16.msra.mxu0 %v2373_v23  ;;  %v2345_v22 = vld [vmem:[%s3352_s1 + $0x148] sm:$0xff] }
  0x4d   :  { %v2369_v23 = vld [vmem:[%s3352_s1 + $0x208] sm:$0xff] }
  0x4e   :  { %1335 = vmatpush.bf16.msra.mxu2 %v2356_v36  ;;  %1286 = vmatpush.bf16.msra.mxu1 %v2348_v38  ;;  %v2352_v36 = vld [vmem:[%s3352_s1 + $0x180] sm:$0xff] }
  0x4f   :  { %v2344_v38 = vld [vmem:[%s3352_s1 + $0x140] sm:$0xff] }
  0x50   :  { %1384 = vmatpush.bf16.msra.mxu3 %v2364_v37  ;;  %1433 = vmatpush.bf16.msra.mxu0 %v2372_v39  ;;  %v2360_v37 = vld [vmem:[%s3352_s1 + $0x1c0] sm:$0xff] }
  0x51   :  { %1100 = vmatmul.bf16.gmra.mxu1 %v1699_v32  ;;  %1149 = vmatmul.bf16.gmra.mxu2 %v1703_v33  ;;  %v1843_v32 = vor.u32 %v2277_v24, %v1840_v25  ;;  %v1847_v33 = vor.u32 %v2282_v27, %v1846_v26  ;;  %v2368_v39 = vld [vmem:[%s3352_s1 + $0x200] sm:$0xff]  ;;  %v1679_v24 = vor.u32 %v2234_v14, %v1676_v15 }
  0x52   :  { %1336 = vmatpush.bf16.msra.mxu2 %v2355_v52  ;;  %1287 = vmatpush.bf16.msra.mxu1 %v2347_v54  ;;  %v1891_v52 = vor.u32 %v2292_v47, %v1890_v46  ;;  %v2249_v46 = vld [vmem:[%s3353_s0 + $0x88] sm:$0xf0]  ;;  %v2252_v14 = vld [vmem:[%s3353_s0 + $0xa4] sm:$0xf] }
  0x53   :  { %1198 = vmatmul.bf16.gmra.mxu3 %v1707_v34  ;;  %1247 = vmatmul.bf16.gmra.mxu0 %v1711_v35  ;;  %v1851_v34 = vor.u32 %v2278_v28, %v1848_v29  ;;  %v1855_v35 = vor.u32 %v2283_v31, %v1854_v30 }
  0x54   :  { %1385 = vmatpush.bf16.msra.mxu3 %v2363_v53  ;;  %1434 = vmatpush.bf16.msra.mxu0 %v2371_v55 }
  0x56   :  { %1337 = vmatpush.bf16.msra.mxu2 %v2354_v4  ;;  %1288 = vmatpush.bf16.msra.mxu1 %v2346_v6  ;;  %v1915_v4 = vor.u32 %v2295_v58, %v1912_v59 }
  0x58   :  { %1386 = vmatpush.bf16.msra.mxu3 %v2362_v5  ;;  %1435 = vmatpush.bf16.msra.mxu0 %v2370_v7  ;;  %v1919_v5 = vor.u32 %v2300_v61, %v1918_v60  ;;  %v1923_v7 = vor.u32 %v2296_v62, %v1920_v63 }
  0x5a   :  { %1338 = vmatpush.bf16.msra.mxu2 %v2353_v20  ;;  %1289 = vmatpush.bf16.msra.mxu1 %v2345_v22  ;;  %v1690_v20 = vld [vmem:[%s3353_s0 + $0x20] sm:$0xf] }
  0x5c   :  { %1387 = vmatpush.bf16.msra.mxu3 %v2361_v21  ;;  %1436 = vmatpush.bf16.msra.mxu0 %v2369_v23  ;;  %v2240_v21 = vld [vmem:[%s3353_s0 + $0x40] sm:$0xf0] }
  0x5d   :  { %v1691_v28 = vor.u32 %v2240_v21, %v1690_v20  ;;  %v2258_v20 = vld [vmem:[%s3353_s0 + $0xd0] sm:$0xf0] }
  0x5e   :  { %1339 = vmatpush.bf16.msra.mxu2 %v2352_v36  ;;  %1290 = vmatpush.bf16.msra.mxu1 %v2344_v38  ;;  %v2243_v38 = vld [vmem:[%s3353_s0 + $0x5c] sm:$0xf] }
  0x60   :  { %1388 = vmatpush.bf16.msra.mxu3 %v2360_v37  ;;  %1437 = vmatpush.bf16.msra.mxu0 %v2368_v39  ;;  %v1712_v39 = vld [vmem:[%s3353_s0 + $0x7c] sm:$0xf0] }
  0x61   :  { %1105 = vmatmul.bf16.gmra.mxu1 %v1735_v48  ;;  %1154 = vmatmul.bf16.gmra.mxu2 %v1739_v49  ;;  %v1879_v48 = vor.u32 %v2286_v40, %v1876_v41  ;;  %v1883_v49 = vor.u32 %v2291_v43, %v1882_v42  ;;  %v1718_v41 = vld [vmem:[%s3353_s0 + $0x60] sm:$0xf]  ;;  %v2248_v42 = vld [vmem:[%s3353_s0 + $0x80] sm:$0xf0] }
  0x62   :  { %v2244_v43 = vld [vmem:[%s3353_s0 + $0x64] sm:$0xf] }
  0x63   :  { %1203 = vmatmul.bf16.gmra.mxu3 %v1743_v50  ;;  %1252 = vmatmul.bf16.gmra.mxu0 %v1747_v51  ;;  %v1887_v51 = vor.u32 %v2287_v44, %v1884_v45  ;;  %v1720_v44 = vld [vmem:[%s3353_s0 + $0x84] sm:$0xf0] }
  0x64   :  { %v1726_v45 = vld [vmem:[%s3353_s0 + $0x68] sm:$0xf] }
  0x65   :  { %v1727_v58 = vor.u32 %v2249_v46, %v1726_v45  ;;  %v1790_v45 = vld [vmem:[%s3353_s0 + $0xf0] sm:$0xf]  ;;  %v2266_v46 = vld [vmem:[%s3353_s0 + $0x110] sm:$0xf0] }
  0x71   :  { %1110 = vmatmul.bf16.gmra.mxu1 %v1771_v0  ;;  %1159 = vmatmul.bf16.gmra.mxu2 %v1775_v1  ;;  %v1926_v0 = vld [vmem:[%s3353_s0 + $0x208] sm:$0xf]  ;;  %v2301_v1 = vld [vmem:[%s3353_s0 + $0x228] sm:$0xf0] }
  0x72   :  { %v1927_v8 = vor.u32 %v2301_v1, %v1926_v0 }
  0x73   :  { %1208 = vmatmul.bf16.gmra.mxu3 %v1779_v2  ;;  %1257 = vmatmul.bf16.gmra.mxu0 %v1783_v3 }
  0x81   :  { %1115 = vmatmul.bf16.gmra.mxu1 %v1807_v16  ;;  %1164 = vmatmul.bf16.gmra.mxu2 %v1811_v17  ;;  %v1682_v16 = vld [vmem:[%s3353_s0 + $0x18] sm:$0xf]  ;;  %v2239_v17 = vld [vmem:[%s3353_s0 + $0x38] sm:$0xf0] }
  0x82   :  { %v1683_v25 = vor.u32 %v2239_v17, %v1682_v16  ;;  %v1754_v16 = vld [vmem:[%s3353_s0 + $0xa8] sm:$0xf]  ;;  %v2257_v17 = vld [vmem:[%s3353_s0 + $0xc8] sm:$0xf0] }
  0x83   :  { %1213 = vmatmul.bf16.gmra.mxu3 %v1815_v18  ;;  %1262 = vmatmul.bf16.gmra.mxu0 %v1819_v19  ;;  %v2235_v18 = vld [vmem:[%s3353_s0 + $0x1c] sm:$0xf]  ;;  %v1684_v19 = vld [vmem:[%s3353_s0 + $0x3c] sm:$0xf0] }
  0x84   :  { %v1687_v27 = vor.u32 %v2235_v18, %v1684_v19  ;;  %v1756_v18 = vld [vmem:[%s3353_s0 + $0xcc] sm:$0xf0] }
  0x85   :  { %v1762_v19 = vld [vmem:[%s3353_s0 + $0xb0] sm:$0xf] }
  0x91   :  { %1120 = vmatmul.bf16.gmra.mxu1 %v1843_v32  ;;  %1169 = vmatmul.bf16.gmra.mxu2 %v1847_v33 }
  0x93   :  { %1218 = vmatmul.bf16.gmra.mxu3 %v1851_v34  ;;  %1267 = vmatmul.bf16.gmra.mxu0 %v1855_v35 }
  0x9e   :  { %v2902_v50 = vpop.f32.mrf.mxu1 }
  0xa0   :  { %v1047_v53 = vpop.f32.mrf.mxu0 }
  0xa1   :  { %1125 = vmatmul.bf16.gmra.mxu1 %v1879_v48  ;;  %1174 = vmatmul.bf16.gmra.mxu2 %v1883_v49 }
  0xa3   :  { %1223 = vmatmul.bf16.gmra.mxu3 %v1887_v51  ;;  %1272 = vmatmul.bf16.gmra.mxu0 %v1891_v52  ;;  %v1715_v51 = vor.u32 %v2243_v38, %v1712_v39  ;;  %v1719_v52 = vor.u32 %v2248_v42, %v1718_v41 }
  0xa4   :  { %v2904_v54 = vpop.f32.mrf.mxu2 }
  0xa6   :  { %v2906_v55 = vpop.f32.mrf.mxu3  ;;  %v2908_v56 = vpop.f32.mrf.mxu1 }
  0xa8   :  { %v1049_v57 = vpop.f32.mrf.mxu0 }
  0xac   :  { %v2934_v2 = vpop.f32.mrf.mxu2 }
  0xae   :  { %v2936_v3 = vpop.f32.mrf.mxu3  ;;  %v2938_v6 = vpop.f32.mrf.mxu1 }
  0xb0   :  { %v1052_v9 = vpop.f32.mrf.mxu0 }
  0xb1   :  { %1130 = vmatmul.bf16.gmra.mxu1 %v1915_v4  ;;  %1179 = vmatmul.bf16.gmra.mxu2 %v1919_v5 }
  0xb3   :  { %1228 = vmatmul.bf16.gmra.mxu3 %v1923_v7  ;;  %1277 = vmatmul.bf16.gmra.mxu0 %v1927_v8 }
  0xb4   :  { %v2940_v10 = vpop.f32.mrf.mxu2 }
  0xb6   :  { %v2942_v11 = vpop.f32.mrf.mxu3  ;;  %v2944_v12 = vpop.f32.mrf.mxu1 }
  0xb8   :  { %v1054_v13 = vpop.f32.mrf.mxu0 }
  0xbc   :  { %v2970_v22 = vpop.f32.mrf.mxu2 }
  0xbe   :  { %v2972_v23 = vpop.f32.mrf.mxu3  ;;  %v1096_v26 = vpop.f32.mrf.mxu1 }
  0xbf   :  { %v1097_v29 = vadd.f32 %v1096_v26, %v1047_v53 }
  0xc0   :  { %v1243_v30 = vpop.f32.mrf.mxu0 }
  0xc1   :  { %1291 = vmatmul.bf16.vlgmr.msra.gmra.mxu1 %v1679_v24  ;;  %1340 = vmatmul.bf16.vlgmr.msra.gmra.mxu2 %v1683_v25 }
  0xc3   :  { %1389 = vmatmul.bf16.vlgmr.msra.gmra.mxu3 %v1687_v27  ;;  %1438 = vmatmul.bf16.vlgmr.msra.gmra.mxu0 %v1691_v28  ;;  %v1755_v27 = vor.u32 %v2257_v17, %v1754_v16 }
  0xc4   :  { %v1145_v31 = vpop.f32.mrf.mxu2 }
  0xc5   :  { %v1146_v32 = vadd.f32 %v1145_v31, %v1097_v29 }
  0xc6   :  { %v1194_v33 = vpop.f32.mrf.mxu3  ;;  %v1098_v34 = vpop.f32.mrf.mxu1 }
  0xc7   :  { %v1195_v35 = vadd.f32 %v1194_v33, %v1146_v32  ;;  %v1099_v36 = vadd.f32 %v1098_v34, %v1049_v57  ;;  %v1723_v57 = vor.u32 %v2244_v43, %v1720_v44  ;;  %v2261_v43 = vld [vmem:[%s3353_s0 + $0xec] sm:$0xf] }
  0xc8   :  { %v1245_v37 = vpop.f32.mrf.mxu0 }
  0xc9   :  { %v2980_v40 = vadd.f32 %v1243_v30, %v1195_v35  ;;  %v1763_v30 = vor.u32 %v2258_v20, %v1762_v19  ;;  %v1826_v19 = vld [vmem:[%s3353_s0 + $0x138] sm:$0xf]  ;;  %v2275_v20 = vld [vmem:[%s3353_s0 + $0x158] sm:$0xf0] }
  0xcc   :  { %v1147_v47 = vpop.f32.mrf.mxu2 }
  0xcd   :  { %v1148_v48 = vadd.f32 %v1147_v47, %v1099_v36  ;;  %v1792_v47 = vld [vmem:[%s3353_s0 + $0x114] sm:$0xf0] }
  0xce   :  { %v1196_v49 = vpop.f32.mrf.mxu3  ;;  %v1101_v53 = vpop.f32.mrf.mxu1 }
  0xcf   :  { %v1197_v59 = vadd.f32 %v1196_v49, %v1148_v48  ;;  %v1102_v60 = vadd.f32 %v1101_v53, %v1052_v9  ;;  %v1748_v9 = vld [vmem:[%s3353_s0 + $0xc4] sm:$0xf0]  ;;  %v1798_v48 = vld [vmem:[%s3353_s0 + $0xf8] sm:$0xf]  ;;  %v2267_v49 = vld [vmem:[%s3353_s0 + $0x118] sm:$0xf0] }
  0xd0   :  { %v1248_v61 = vpop.f32.mrf.mxu0  ;;  %v1751_v26 = vor.u32 %v2252_v14, %v1748_v9 }
  0xd1   :  { %1296 = vmatmul.bf16.gmra.mxu1 %v1715_v51  ;;  %1345 = vmatmul.bf16.gmra.mxu2 %v1719_v52  ;;  %v3000_v62 = vadd.f32 %v1245_v37, %v1197_v59 }
  0xd3   :  { %1394 = vmatmul.bf16.gmra.mxu3 %v1723_v57  ;;  %1443 = vmatmul.bf16.gmra.mxu0 %v1727_v58  ;;  %v1791_v58 = vor.u32 %v2266_v46, %v1790_v45  ;;  %v2279_v46 = vld [vmem:[%s3353_s0 + $0x17c] sm:$0xf] }
  0xd4   :  { %v1150_v63 = vpop.f32.mrf.mxu2 }
  0xd5   :  { %v1151_v0 = vadd.f32 %v1150_v63, %v1102_v60 }
  0xd6   :  { %v1199_v1 = vpop.f32.mrf.mxu3  ;;  %v1103_v4 = vpop.f32.mrf.mxu1 }
  0xd7   :  { %v1200_v5 = vadd.f32 %v1199_v1, %v1151_v0  ;;  %v1104_v7 = vadd.f32 %v1103_v4, %v1054_v13  ;;  %v2253_v13 = vld [vmem:[%s3353_s0 + $0xac] sm:$0xf] }
  0xd8   :  { %v1250_v8 = vpop.f32.mrf.mxu0  ;;  %v1759_v29 = vor.u32 %v2253_v13, %v1756_v18  ;;  %v2270_v13 = vld [vmem:[%s3353_s0 + $0x134] sm:$0xf] }
  0xd9   :  { %v3008_v15 = vadd.f32 %v1248_v61, %v1200_v5  ;;  %v1799_v61 = vor.u32 %v2267_v49, %v1798_v48  ;;  %v2284_v48 = vld [vmem:[%s3353_s0 + $0x1a0] sm:$0xf0] }
  0xda   :  { %v2280_v49 = vld [vmem:[%s3353_s0 + $0x184] sm:$0xf] }
  0xdc   :  { %v1152_v21 = vpop.f32.mrf.mxu2 }
  0xdd   :  { %v1153_v24 = vadd.f32 %v1152_v21, %v1104_v7  ;;  %v1828_v21 = vld [vmem:[%s3353_s0 + $0x15c] sm:$0xf0] }
  0xde   :  { %v1201_v25 = vpop.f32.mrf.mxu3  ;;  %v1106_v28 = vpop.f32.mrf.mxu1 }
  0xdf   :  { %v1202_v31 = vadd.f32 %v1201_v25, %v1153_v24  ;;  %v1107_v32 = vadd.f32 %v1106_v28, %v2902_v50  ;;  %v1784_v50 = vld [vmem:[%s3353_s0 + $0x10c] sm:$0xf0]  ;;  %v1834_v24 = vld [vmem:[%s3353_s0 + $0x140] sm:$0xf]  ;;  %v2276_v25 = vld [vmem:[%s3353_s0 + $0x160] sm:$0xf0] }
  0xe0   :  { %v1253_v33 = vpop.f32.mrf.mxu0  ;;  %v1787_v57 = vor.u32 %v2261_v43, %v1784_v50 }
  0xe1   :  { %1301 = vmatmul.bf16.gmra.mxu1 %v1751_v26  ;;  %1350 = vmatmul.bf16.gmra.mxu2 %v1755_v27  ;;  %v3029_v34 = vadd.f32 %v1250_v8, %v1202_v31 }
  0xe3   :  { %1399 = vmatmul.bf16.gmra.mxu3 %v1759_v29  ;;  %1448 = vmatmul.bf16.gmra.mxu0 %v1763_v30  ;;  %v1827_v30 = vor.u32 %v2275_v20, %v1826_v19  ;;  %v2288_v20 = vld [vmem:[%s3353_s0 + $0x1c4] sm:$0xf] }
  0xe4   :  { %v1155_v35 = vpop.f32.mrf.mxu2 }
  0xe5   :  { %v1156_v36 = vadd.f32 %v1155_v35, %v1107_v32 }
  0xe6   :  { %v1204_v37 = vpop.f32.mrf.mxu3  ;;  %v1108_v38 = vpop.f32.mrf.mxu1 }
  0xe7   :  { %v1205_v39 = vadd.f32 %v1204_v37, %v1156_v36  ;;  %v1109_v41 = vadd.f32 %v1108_v38, %v2908_v56  ;;  %v2262_v56 = vld [vmem:[%s3353_s0 + $0xf4] sm:$0xf] }
  0xe8   :  { %v1255_v42 = vpop.f32.mrf.mxu0  ;;  %v1795_v60 = vor.u32 %v2262_v56, %v1792_v47  ;;  %v1856_v56 = vld [vmem:[%s3353_s0 + $0x19c] sm:$0xf0] }
  0xe9   :  { %v3038_v44 = vadd.f32 %v1253_v33, %v1205_v39  ;;  %v1835_v33 = vor.u32 %v2276_v25, %v1834_v24  ;;  %v2293_v24 = vld [vmem:[%s3353_s0 + $0x1e8] sm:$0xf0] }
  0xea   :  { %v2289_v25 = vld [vmem:[%s3353_s0 + $0x1cc] sm:$0xf] }
  0xec   :  { %v1157_v51 = vpop.f32.mrf.mxu2 }
  0xed   :  { %v1158_v52 = vadd.f32 %v1157_v51, %v1109_v41 }
  0xee   :  { %v1206_v53 = vpop.f32.mrf.mxu3  ;;  %v1111_v59 = vpop.f32.mrf.mxu1 }
  0xef   :  { %v1207_v63 = vadd.f32 %v1206_v53, %v1158_v52  ;;  %v1112_v0 = vadd.f32 %v1111_v59, %v2938_v6  ;;  %v1820_v6 = vld [vmem:[%s3353_s0 + $0x154] sm:$0xf0]  ;;  %v1864_v52 = vld [vmem:[%s3353_s0 + $0x1a4] sm:$0xf0] }
  0xf0   :  { %v1258_v1 = vpop.f32.mrf.mxu0  ;;  %v1823_v29 = vor.u32 %v2270_v13, %v1820_v6  ;;  %v1870_v53 = vld [vmem:[%s3353_s0 + $0x188] sm:$0xf] }
  0xf1   :  { %1306 = vmatmul.bf16.gmra.mxu1 %v1787_v57  ;;  %1355 = vmatmul.bf16.gmra.mxu2 %v1791_v58  ;;  %v3059_v4 = vadd.f32 %v1255_v42, %v1207_v63  ;;  %v2285_v57 = vld [vmem:[%s3353_s0 + $0x1a8] sm:$0xf0] }
  0xf3   :  { %1404 = vmatmul.bf16.gmra.mxu3 %v1795_v60  ;;  %1453 = vmatmul.bf16.gmra.mxu0 %v1799_v61  ;;  %v1859_v61 = vor.u32 %v2279_v46, %v1856_v56 }
  0xf4   :  { %v1160_v5 = vpop.f32.mrf.mxu2 }
  0xf5   :  { %v1161_v7 = vadd.f32 %v1160_v5, %v1112_v0 }
  0xf6   :  { %v1209_v8 = vpop.f32.mrf.mxu3  ;;  %v1113_v14 = vpop.f32.mrf.mxu1 }
  0xf7   :  { %v1210_v9 = vadd.f32 %v1209_v8, %v1161_v7  ;;  %v1114_v16 = vadd.f32 %v1113_v14, %v2944_v12  ;;  %v2271_v12 = vld [vmem:[%s3353_s0 + $0x13c] sm:$0xf] }
  0xf8   :  { %v1260_v17 = vpop.f32.mrf.mxu0  ;;  %v1831_v32 = vor.u32 %v2271_v12, %v1828_v21  ;;  %v1892_v12 = vld [vmem:[%s3353_s0 + $0x1e4] sm:$0xf0] }
  0xf9   :  { %v3068_v18 = vadd.f32 %v1258_v1, %v1210_v9  ;;  %v1867_v1 = vor.u32 %v2280_v49, %v1864_v52  ;;  %v2297_v49 = vld [vmem:[%s3353_s0 + $0x20c] sm:$0xf] }
  0xfc   :  { %v1162_v26 = vpop.f32.mrf.mxu2 }
  0xfd   :  { %v1163_v27 = vadd.f32 %v1162_v26, %v1114_v16 }
  0xfe   :  { %v1211_v28 = vpop.f32.mrf.mxu3  ;;  %v1116_v31 = vpop.f32.mrf.mxu1 }
  0xff   :  { %v1212_v35 = vadd.f32 %v1211_v28, %v1163_v27  ;;  %v1117_v38 = vadd.f32 %v1116_v31, %v2904_v54  ;;  %v1862_v54 = vld [vmem:[%s3353_s0 + $0x180] sm:$0xf]  ;;  %v1900_v27 = vld [vmem:[%s3353_s0 + $0x1ec] sm:$0xf0] }
 0x100   :  { %v1263_v36 = vpop.f32.mrf.mxu0  ;;  %v1863_v63 = vor.u32 %v2284_v48, %v1862_v54  ;;  %v1906_v28 = vld [vmem:[%s3353_s0 + $0x1d0] sm:$0xf] }
 0x101   :  { %1311 = vmatmul.bf16.gmra.mxu1 %v1823_v29  ;;  %1360 = vmatmul.bf16.gmra.mxu2 %v1827_v30  ;;  %v3088_v37 = vadd.f32 %v1260_v17, %v1212_v35  ;;  %v2294_v29 = vld [vmem:[%s3353_s0 + $0x1f0] sm:$0xf0] }
 0x103   :  { %1409 = vmatmul.bf16.gmra.mxu3 %v1831_v32  ;;  %1458 = vmatmul.bf16.gmra.mxu0 %v1835_v33  ;;  %v1895_v33 = vor.u32 %v2288_v20, %v1892_v12 }
 0x104   :  { %v1165_v39 = vpop.f32.mrf.mxu2 }
 0x105   :  { %v1166_v41 = vadd.f32 %v1165_v39, %v1117_v38  ;;  %v1903_v38 = vor.u32 %v2289_v25, %v1900_v27 }
 0x106   :  { %v1214_v42 = vpop.f32.mrf.mxu3  ;;  %v1118_v43 = vpop.f32.mrf.mxu1 }
 0x107   :  { %v1215_v50 = vadd.f32 %v1214_v42, %v1166_v41  ;;  %v1119_v51 = vadd.f32 %v1118_v43, %v2934_v2  ;;  %v1871_v2 = vor.u32 %v2285_v57, %v1870_v53  ;;  %v2302_v53 = vld [vmem:[%s3353_s0 + $0x230] sm:$0xf0] }
 0x108   :  { %v1265_v45 = vpop.f32.mrf.mxu0  ;;  %v2298_v57 = vld [vmem:[%s3353_s0 + $0x214] sm:$0xf] }
 0x109   :  { %v3097_v47 = vadd.f32 %v1263_v36, %v1215_v50 }
 0x10c   :  { %v1167_v58 = vpop.f32.mrf.mxu2 }
 0x10d   :  { %v1168_v59 = vadd.f32 %v1167_v58, %v1119_v51  ;;  %v1928_v51 = vld [vmem:[%s3353_s0 + $0x22c] sm:$0xf0] }
 0x10e   :  { %v1216_v60 = vpop.f32.mrf.mxu3  ;;  %v1121_v0 = vpop.f32.mrf.mxu1 }
 0x10f   :  { %v1217_v5 = vadd.f32 %v1216_v60, %v1168_v59  ;;  %v1122_v14 = vadd.f32 %v1121_v0, %v2940_v10  ;;  %v1898_v10 = vld [vmem:[%s3353_s0 + $0x1c8] sm:$0xf]  ;;  %v1936_v59 = vld [vmem:[%s3353_s0 + $0x234] sm:$0xf0] }
 0x110   :  { %v1268_v7 = vpop.f32.mrf.mxu0  ;;  %v1899_v35 = vor.u32 %v2293_v24, %v1898_v10  ;;  %v1942_v60 = vld [vmem:[%s3353_s0 + $0x218] sm:$0xf] }
 0x111   :  { %1316 = vmatmul.bf16.gmra.mxu1 %v1859_v61  ;;  %1365 = vmatmul.bf16.gmra.mxu2 %v1863_v63  ;;  %v3118_v8 = vadd.f32 %v1265_v45, %v1217_v5  ;;  %v2303_v61 = vld [vmem:[%s3353_s0 + $0x238] sm:$0xf0] }
 0x113   :  { %1414 = vmatmul.bf16.gmra.mxu3 %v1867_v1  ;;  %1463 = vmatmul.bf16.gmra.mxu0 %v1871_v2  ;;  %v1931_v2 = vor.u32 %v2297_v49, %v1928_v51 }
 0x114   :  { %v1170_v9 = vpop.f32.mrf.mxu2 }
 0x115   :  { %v1171_v16 = vadd.f32 %v1170_v9, %v1122_v14  ;;  %v1939_v14 = vor.u32 %v2298_v57, %v1936_v59 }
 0x116   :  { %v1219_v17 = vpop.f32.mrf.mxu3  ;;  %v1123_v13 = vpop.f32.mrf.mxu1 }
 0x117   :  { %v1220_v6 = vadd.f32 %v1219_v17, %v1171_v16  ;;  %v1124_v26 = vadd.f32 %v1123_v13, %v2970_v22  ;;  %v1907_v22 = vor.u32 %v2294_v29, %v1906_v28 }
 0x118   :  { %v1270_v19 = vpop.f32.mrf.mxu0 }
 0x119   :  { %v3127_v21 = vadd.f32 %v1268_v7, %v1220_v6 }
 0x11c   :  { %v1172_v30 = vpop.f32.mrf.mxu2 }
 0x11d   :  { %v1173_v31 = vadd.f32 %v1172_v30, %v1124_v26 }
 0x11e   :  { %v1221_v32 = vpop.f32.mrf.mxu3  ;;  %v1126_v36 = vpop.f32.mrf.mxu1 }
 0x11f   :  { %v1222_v39 = vadd.f32 %v1221_v32, %v1173_v31  ;;  %v1127_v43 = vadd.f32 %v1126_v36, %v2906_v55  ;;  %v1934_v55 = vld [vmem:[%s3353_s0 + $0x210] sm:$0xf] }
 0x120   :  { %v1273_v41 = vpop.f32.mrf.mxu0  ;;  %v1935_v5 = vor.u32 %v2302_v53, %v1934_v55 }
 0x121   :  { %1321 = vmatmul.bf16.gmra.mxu1 %v1895_v33  ;;  %1370 = vmatmul.bf16.gmra.mxu2 %v1899_v35  ;;  %v3148_v42 = vadd.f32 %v1270_v19, %v1222_v39 }
 0x123   :  { %1419 = vmatmul.bf16.gmra.mxu3 %v1903_v38  ;;  %1468 = vmatmul.bf16.gmra.mxu0 %v1907_v22 }
 0x124   :  { %v1175_v50 = vpop.f32.mrf.mxu2 }
 0x125   :  { %v1176_v45 = vadd.f32 %v1175_v50, %v1127_v43 }
 0x126   :  { %v1224_v46 = vpop.f32.mrf.mxu3  ;;  %v1128_v56 = vpop.f32.mrf.mxu1 }
 0x127   :  { %v1225_v54 = vadd.f32 %v1224_v46, %v1176_v45  ;;  %v1129_v58 = vadd.f32 %v1128_v56, %v2936_v3  ;;  %v1943_v3 = vor.u32 %v2303_v61, %v1942_v60 }
 0x128   :  { %v1275_v48 = vpop.f32.mrf.mxu0 }
 0x129   :  { %v3157_v52 = vadd.f32 %v1273_v41, %v1225_v54 }
 0x12c   :  { %v1177_v63 = vpop.f32.mrf.mxu2 }
 0x12d   :  { %v1178_v0 = vadd.f32 %v1177_v63, %v1129_v58 }
 0x12e   :  { %v1226_v1 = vpop.f32.mrf.mxu3  ;;  %v1131_v7 = vpop.f32.mrf.mxu1 }
 0x12f   :  { %v1227_v9 = vadd.f32 %v1226_v1, %v1178_v0  ;;  %v1132_v13 = vadd.f32 %v1131_v7, %v2942_v11 }
 0x130   :  { %v1278_v16 = vpop.f32.mrf.mxu0 }
 0x131   :  { %1326 = vmatmul.bf16.gmra.mxu1 %v1931_v2  ;;  %1375 = vmatmul.bf16.gmra.mxu2 %v1935_v5  ;;  %v3178_v17 = vadd.f32 %v1275_v48, %v1227_v9 }
 0x133   :  { %1424 = vmatmul.bf16.gmra.mxu3 %v1939_v14  ;;  %1473 = vmatmul.bf16.gmra.mxu0 %v1943_v3 }
 0x134   :  { %v1180_v6 = vpop.f32.mrf.mxu2 }
 0x135   :  { %v1181_v19 = vadd.f32 %v1180_v6, %v1132_v13 }
 0x136   :  { %v1229_v20 = vpop.f32.mrf.mxu3  ;;  %v1133_v12 = vpop.f32.mrf.mxu1 }
 0x137   :  { %v1230_v10 = vadd.f32 %v1229_v20, %v1181_v19  ;;  %v1134_v26 = vadd.f32 %v1133_v12, %v2972_v23 }
 0x138   :  { %v1280_v24 = vpop.f32.mrf.mxu0 }
 0x139   :  { %v3181_v25 = vadd.f32 %v1278_v16, %v1230_v10 }
 0x13c   :  { %v1182_v27 = vpop.f32.mrf.mxu2 }
 0x13d   :  { %v1183_v28 = vadd.f32 %v1182_v27, %v1134_v26 }
 0x13e   :  { %v1231_v29 = vpop.f32.mrf.mxu3  ;;  %v1292_v30 = vpop.f32.mrf.mxu1 }
 0x13f   :  { %v1232_v31 = vadd.f32 %v1231_v29, %v1183_v28  ;;  %v1293_v32 = vadd.f32 %v1292_v30, %v2980_v40 }
 0x140   :  { %v1439_v33 = vpop.f32.mrf.mxu0 }
 0x141   :  { %v3185_v35 = vadd.f32 %v1280_v24, %v1232_v31 }
 0x144   :  { %v1341_v11 = vpop.f32.mrf.mxu2 }
 0x145   :  { %v1342_v36 = vadd.f32 %v1341_v11, %v1293_v32 }
 0x146   :  { %v1390_v38 = vpop.f32.mrf.mxu3  ;;  %v1294_v22 = vpop.f32.mrf.mxu1 }
 0x147   :  { %v1391_v39 = vadd.f32 %v1390_v38, %v1342_v36  ;;  %v1295_v41 = vadd.f32 %v1294_v22, %v3000_v62 }
 0x148   :  { %v1441_v43 = vpop.f32.mrf.mxu0 }
 0x149   :  { %v3188_v50 = vadd.f32 %v1439_v33, %v1391_v39 }
 0x14c   :  { %v1343_v23 = vpop.f32.mrf.mxu2 }
 0x14d   :  { %v1344_v45 = vadd.f32 %v1343_v23, %v1295_v41 }
 0x14e   :  { %v1392_v46 = vpop.f32.mrf.mxu3  ;;  %v1297_v56 = vpop.f32.mrf.mxu1 }
 0x14f   :  { %v1393_v54 = vadd.f32 %v1392_v46, %v1344_v45  ;;  %v1298_v40 = vadd.f32 %v1297_v56, %v3008_v15 }
 0x150   :  { %v1444_v48 = vpop.f32.mrf.mxu0 }
 0x151   :  { %v3191_v49 = vadd.f32 %v1441_v43, %v1393_v54 }
 0x153   :  { %v1479_v51 = vadd.f32 %v3191_v49, %v3188_v50 }
 0x154   :  { %v1346_v55 = vpop.f32.mrf.mxu2 }
 0x155   :  { %v1347_v53 = vadd.f32 %v1346_v55, %v1298_v40 }
 0x156   :  { %v1395_v57 = vpop.f32.mrf.mxu3  ;;  %v1299_v62 = vpop.f32.mrf.mxu1 }
 0x157   :  { %v1396_v58 = vadd.f32 %v1395_v57, %v1347_v53  ;;  %v1300_v59 = vadd.f32 %v1299_v62, %v3029_v34 }
 0x158   :  { %v1446_v60 = vpop.f32.mrf.mxu0 }
 0x159   :  { %v3196_v61 = vadd.f32 %v1444_v48, %v1396_v58 }
 0x15b   :  { %v1480_v63 = vadd.f32 %v1479_v51, %v3196_v61 }
 0x15c   :  { %v1348_v0 = vpop.f32.mrf.mxu2 }
 0x15d   :  { %v1349_v15 = vadd.f32 %v1348_v0, %v1300_v59 }
 0x15e   :  { %v1397_v1 = vpop.f32.mrf.mxu3  ;;  %v1302_v2 = vpop.f32.mrf.mxu1 }
 0x15f   :  { %v1398_v5 = vadd.f32 %v1397_v1, %v1349_v15  ;;  %v1303_v7 = vadd.f32 %v1302_v2, %v3038_v44 }
 0x160   :  { %v1449_v14 = vpop.f32.mrf.mxu0 }
 0x161   :  { %v3200_v3 = vadd.f32 %v1446_v60, %v1398_v5 }
 0x163   :  { %v1481_v9 = vadd.f32 %v1480_v63, %v3200_v3 }
 0x164   :  { %v1351_v16 = vpop.f32.mrf.mxu2 }
 0x165   :  { %v1352_v13 = vadd.f32 %v1351_v16, %v1303_v7 }
 0x166   :  { %v1400_v34 = vpop.f32.mrf.mxu3  ;;  %v1304_v6 = vpop.f32.mrf.mxu1 }
 0x167   :  { %v1401_v19 = vadd.f32 %v1400_v34, %v1352_v13  ;;  %v1305_v24 = vadd.f32 %v1304_v6, %v3059_v4 }
 0x168   :  { %v1451_v20 = vpop.f32.mrf.mxu0 }
 0x169   :  { %v3203_v12 = vadd.f32 %v1449_v14, %v1401_v19 }
 0x16b   :  { %v1482_v10 = vadd.f32 %v1481_v9, %v3203_v12 }
 0x16c   :  { %v1353_v26 = vpop.f32.mrf.mxu2 }
 0x16d   :  { %v1354_v27 = vadd.f32 %v1353_v26, %v1305_v24 }
 0x16e   :  { %v1402_v44 = vpop.f32.mrf.mxu3  ;;  %v1307_v28 = vpop.f32.mrf.mxu1 }
 0x16f   :  { %v1403_v29 = vadd.f32 %v1402_v44, %v1354_v27  ;;  %v1308_v33 = vadd.f32 %v1307_v28, %v3068_v18 }
 0x170   :  { %v1454_v30 = vpop.f32.mrf.mxu0 }
 0x171   :  { %v3207_v31 = vadd.f32 %v1451_v20, %v1403_v29 }
 0x173   :  { %v1483_v32 = vadd.f32 %v1482_v10, %v3207_v31 }
 0x174   :  { %v1356_v11 = vpop.f32.mrf.mxu2 }
 0x175   :  { %v1357_v36 = vadd.f32 %v1356_v11, %v1308_v33 }
 0x176   :  { %v1405_v38 = vpop.f32.mrf.mxu3  ;;  %v1309_v22 = vpop.f32.mrf.mxu1 }
 0x177   :  { %v1406_v39 = vadd.f32 %v1405_v38, %v1357_v36  ;;  %v1310_v23 = vadd.f32 %v1309_v22, %v3088_v37 }
 0x178   :  { %v1456_v41 = vpop.f32.mrf.mxu0 }
 0x179   :  { %v3211_v43 = vadd.f32 %v1454_v30, %v1406_v39 }
 0x17b   :  { %v1484_v4 = vadd.f32 %v1483_v32, %v3211_v43 }
 0x17c   :  { %v1358_v45 = vpop.f32.mrf.mxu2 }
 0x17d   :  { %v1359_v46 = vadd.f32 %v1358_v45, %v1310_v23 }
 0x17e   :  { %v1407_v56 = vpop.f32.mrf.mxu3  ;;  %v1312_v54 = vpop.f32.mrf.mxu1 }
 0x17f   :  { %v1408_v40 = vadd.f32 %v1407_v56, %v1359_v46  ;;  %v1313_v55 = vadd.f32 %v1312_v54, %v3097_v47 }
 0x180   :  { %v1459_v48 = vpop.f32.mrf.mxu0 }
 0x181   :  { %v3215_v51 = vadd.f32 %v1456_v41, %v1408_v40 }
 0x183   :  { %v1485_v18 = vadd.f32 %v1484_v4, %v3215_v51 }
 0x184   :  { %v1361_v53 = vpop.f32.mrf.mxu2 }
 0x185   :  { %v1362_v57 = vadd.f32 %v1361_v53, %v1313_v55 }
 0x186   :  { %v1410_v62 = vpop.f32.mrf.mxu3  ;;  %v1314_v58 = vpop.f32.mrf.mxu1 }
 0x187   :  { %v1411_v59 = vadd.f32 %v1410_v62, %v1362_v57  ;;  %v1315_v0 = vadd.f32 %v1314_v58, %v3118_v8 }
 0x188   :  { %v1461_v60 = vpop.f32.mrf.mxu0 }
 0x189   :  { %v3219_v63 = vadd.f32 %v1459_v48, %v1411_v59 }
 0x18b   :  { %v1486_v37 = vadd.f32 %v1485_v18, %v3219_v63 }
 0x18c   :  { %v1363_v15 = vpop.f32.mrf.mxu2 }
 0x18d   :  { %v1364_v1 = vadd.f32 %v1363_v15, %v1315_v0 }
 0x18e   :  { %v1412_v2 = vpop.f32.mrf.mxu3  ;;  %v1317_v5 = vpop.f32.mrf.mxu1 }
 0x18f   :  { %v1413_v7 = vadd.f32 %v1412_v2, %v1364_v1  ;;  %v1318_v16 = vadd.f32 %v1317_v5, %v3127_v21 }
 0x190   :  { %v1464_v14 = vpop.f32.mrf.mxu0 }
 0x191   :  { %v3223_v9 = vadd.f32 %v1461_v60, %v1413_v7 }
 0x193   :  { %v1487_v47 = vadd.f32 %v1486_v37, %v3223_v9 }
 0x194   :  { %v1366_v13 = vpop.f32.mrf.mxu2 }
 0x195   :  { %v1367_v34 = vadd.f32 %v1366_v13, %v1318_v16 }
 0x196   :  { %v1415_v6 = vpop.f32.mrf.mxu3  ;;  %v1319_v19 = vpop.f32.mrf.mxu1 }
 0x197   :  { %v1416_v20 = vadd.f32 %v1415_v6, %v1367_v34  ;;  %v1320_v26 = vadd.f32 %v1319_v19, %v3148_v42 }
 0x198   :  { %v1466_v10 = vpop.f32.mrf.mxu0 }
 0x199   :  { %v1465_v24 = vadd.f32 %v1464_v14, %v1416_v20 }
 0x19b   :  { %v1488_v8 = vadd.f32 %v1487_v47, %v1465_v24 }
 0x19c   :  { %v1368_v27 = vpop.f32.mrf.mxu2 }
 0x19d   :  { %v1369_v44 = vadd.f32 %v1368_v27, %v1320_v26 }
 0x19e   :  { %v1417_v28 = vpop.f32.mrf.mxu3  ;;  %v1322_v29 = vpop.f32.mrf.mxu1 }
 0x19f   :  { %v1418_v30 = vadd.f32 %v1417_v28, %v1369_v44  ;;  %v1323_v21 = vadd.f32 %v1322_v29, %v3157_v52 }
 0x1a0   :  { %v1469_v33 = vpop.f32.mrf.mxu0 }
 0x1a1   :  { %v1467_v32 = vadd.f32 %v1466_v10, %v1418_v30 }
 0x1a3   :  { %v1489_v11 = vadd.f32 %v1488_v8, %v1467_v32 }
 0x1a4   :  { %v1371_v36 = vpop.f32.mrf.mxu2 }
 0x1a5   :  { %v1372_v38 = vadd.f32 %v1371_v36, %v1323_v21 }
 0x1a6   :  { %v1420_v22 = vpop.f32.mrf.mxu3  ;;  %v1324_v39 = vpop.f32.mrf.mxu1 }
 0x1a7   :  { %v1421_v41 = vadd.f32 %v1420_v22, %v1372_v38  ;;  %v1325_v45 = vadd.f32 %v1324_v39, %v3178_v17 }
 0x1a8   :  { %v1471_v42 = vpop.f32.mrf.mxu0 }
 0x1a9   :  { %v1470_v4 = vadd.f32 %v1469_v33, %v1421_v41 }
 0x1ab   :  { %v1490_v23 = vadd.f32 %v1489_v11, %v1470_v4 }
 0x1ac   :  { %v1373_v46 = vpop.f32.mrf.mxu2 }
 0x1ad   :  { %v1374_v56 = vadd.f32 %v1373_v46, %v1325_v45 }
 0x1ae   :  { %v1422_v54 = vpop.f32.mrf.mxu3  ;;  %v1327_v40 = vpop.f32.mrf.mxu1 }
 0x1af   :  { %v1423_v48 = vadd.f32 %v1422_v54, %v1374_v56  ;;  %v1328_v53 = vadd.f32 %v1327_v40, %v3181_v25 }
 0x1b0   :  { %v1474_v58 = vpop.f32.mrf.mxu0 }
 0x1b1   :  { %v1472_v18 = vadd.f32 %v1471_v42, %v1423_v48 }
 0x1b3   :  { %v1491_v55 = vadd.f32 %v1490_v23, %v1472_v18 }
 0x1b4   :  { %v1376_v52 = vpop.f32.mrf.mxu2 }
 0x1b5   :  { %v1377_v57 = vadd.f32 %v1376_v52, %v1328_v53 }
 0x1b6   :  { %v1425_v62 = vpop.f32.mrf.mxu3  ;;  %v1329_v60 = vpop.f32.mrf.mxu1 }
 0x1b7   :  { %v1426_v59 = vadd.f32 %v1425_v62, %v1377_v57  ;;  %v1330_v17 = vadd.f32 %v1329_v60, %v3185_v35 }
 0x1b8   :  { %v1476_v7 = vpop.f32.mrf.mxu0 }
 0x1b9   :  { %v1475_v37 = vadd.f32 %v1474_v58, %v1426_v59 }
 0x1bb   :  { %v1492_v0 = vadd.f32 %v1491_v55, %v1475_v37 }
 0x1bc   :  { %v1378_v15 = vpop.f32.mrf.mxu2 }
 0x1bd   :  { %v1379_v1 = vadd.f32 %v1378_v15, %v1330_v17 }
 0x1be   :  { %v1427_v2 = vpop.f32.mrf.mxu3 }
 0x1bf   :  { %v1428_v5 = vadd.f32 %v1427_v2, %v1379_v1 }
 0x1c1   :  { %v1477_v14 = vadd.f32 %v1476_v7, %v1428_v5 }
 0x1c3   :  { %v1493_v47 = vadd.f32 %v1492_v0, %v1477_v14 }
 0x1c5   :  { %v1494_v16 = vrot.slane %v1493_v47, 4 }
 0x1c7   :  { %v1495_v13 = vadd.f32 %v1494_v16, %v1493_v47 }
 0x1c9   :  { %v1496_v25 = vrot.slane %v1495_v13, 2 }
 0x1cb   :  { %v1497_v34 = vadd.f32 %v1496_v25, %v1495_v13 }
 0x1cd   :  { %v1498_v6 = vrot.slane %v1497_v34, 1 }
 0x1cf   :  { %v1499_v19 = vadd.f32 %v1498_v6, %v1497_v34  ;;  %v1556_v6 = vld [vmem:[%s3354_s2] sm:$0x1] }
 0x1d1   :  { %v1500_v20 = vmul.f32 0.0078125, %v1499_v19 }
 0x1d3   :  { %v3233_v10 = vsub.f32 %v3188_v50, %v1500_v20  ;;  %v3236_v8 = vsub.f32 %v3191_v49, %v1500_v20  ;;  %v3239_v35 = vsub.f32 %v3196_v61, %v1500_v20  ;;  %v3242_v26 = vsub.f32 %v3200_v3, %v1500_v20 }
 0x1d4   :  { %v3245_v27 = vsub.f32 %v3203_v12, %v1500_v20  ;;  %v3248_v44 = vsub.f32 %v3207_v31, %v1500_v20  ;;  %v3251_v28 = vsub.f32 %v3211_v43, %v1500_v20  ;;  %v3254_v50 = vsub.f32 %v3215_v51, %v1500_v20 }
 0x1d5   :  { %v3257_v49 = vsub.f32 %v3219_v63, %v1500_v20  ;;  %v3260_v61 = vsub.f32 %v3223_v9, %v1500_v20  ;;  %v3262_v3 = vsub.f32 %v1465_v24, %v1500_v20  ;;  %v3264_v29 = vsub.f32 %v1467_v32, %v1500_v20 }
 0x1d6   :  { %v3266_v12 = vsub.f32 %v1470_v4, %v1500_v20  ;;  %v3268_v31 = vsub.f32 %v1472_v18, %v1500_v20  ;;  %v3270_v30 = vsub.f32 %v1475_v37, %v1500_v20  ;;  %v3272_v43 = vsub.f32 %v1477_v14, %v1500_v20 }
 0x1d7   :  { %v1517_v51 = vmul.f32 %v3233_v10, %v3233_v10  ;;  %v1518_v63 = vmul.f32 %v3236_v8, %v3236_v8  ;;  %v1519_v9 = vmul.f32 %v3239_v35, %v3239_v35  ;;  %v1520_v32 = vmul.f32 %v3242_v26, %v3242_v26 }
 0x1d8   :  { %v1521_v11 = vmul.f32 %v3245_v27, %v3245_v27  ;;  %v1522_v36 = vmul.f32 %v3248_v44, %v3248_v44  ;;  %v1523_v22 = vmul.f32 %v3251_v28, %v3251_v28  ;;  %v1524_v41 = vmul.f32 %v3254_v50, %v3254_v50 }
 0x1d9   :  { %v1533_v24 = vadd.f32 %v1518_v63, %v1517_v51  ;;  %v1525_v23 = vmul.f32 %v3257_v49, %v3257_v49  ;;  %v1526_v42 = vmul.f32 %v3260_v61, %v3260_v61  ;;  %v1527_v56 = vmul.f32 %v3262_v3, %v3262_v3 }
 0x1da   :  { %v1528_v40 = vmul.f32 %v3264_v29, %v3264_v29  ;;  %v1529_v18 = vmul.f32 %v3266_v12, %v3266_v12  ;;  %v1530_v53 = vmul.f32 %v3268_v31, %v3268_v31  ;;  %v1531_v57 = vmul.f32 %v3270_v30, %v3270_v30 }
 0x1db   :  { %v1534_v33 = vadd.f32 %v1533_v24, %v1519_v9  ;;  %v1532_v58 = vmul.f32 %v3272_v43, %v3272_v43 }
 0x1dd   :  { %v1535_v21 = vadd.f32 %v1534_v33, %v1520_v32 }
 0x1df   :  { %v1536_v38 = vadd.f32 %v1535_v21, %v1521_v11  ;;  %v2447_v11 = vld [vmem:[%s3354_s2 + $0x1] ss:$0 sm:$0xff] }
 0x1e1   :  { %v1537_v39 = vadd.f32 %v1536_v38, %v1522_v36 }
 0x1e3   :  { %v1538_v4 = vadd.f32 %v1537_v39, %v1523_v22 }
 0x1e5   :  { %v1539_v45 = vadd.f32 %v1538_v4, %v1524_v41 }
 0x1e7   :  { %v1540_v46 = vadd.f32 %v1539_v45, %v1525_v23 }
 0x1e9   :  { %v1541_v54 = vadd.f32 %v1540_v46, %v1526_v42 }
 0x1eb   :  { %v1542_v48 = vadd.f32 %v1541_v54, %v1527_v56 }
 0x1ed   :  { %v1543_v55 = vadd.f32 %v1542_v48, %v1528_v40 }
 0x1ef   :  { %v1544_v52 = vadd.f32 %v1543_v55, %v1529_v18 }
 0x1f1   :  { %v1545_v62 = vadd.f32 %v1544_v52, %v1530_v53 }
 0x1f3   :  { %v1546_v59 = vadd.f32 %v1545_v62, %v1531_v57 }
 0x1f5   :  { %v1547_v60 = vadd.f32 %v1546_v59, %v1532_v58 }
 0x1f7   :  { %v1548_v37 = vrot.slane %v1547_v60, 4 }
 0x1f9   :  { %v1549_v0 = vadd.f32 %v1548_v37, %v1547_v60 }
 0x1fb   :  { %v1550_v17 = vrot.slane %v1549_v0, 2 }
 0x1fd   :  { %v1551_v15 = vadd.f32 %v1550_v17, %v1549_v0 }
 0x1ff   :  { %v1552_v1 = vrot.slane %v1551_v15, 1 }
 0x201   :  { %v1553_v2 = vadd.f32 %v1552_v1, %v1551_v15 }
 0x203   :  { %v1554_v5 = vmul.f32 0.0078125, %v1553_v2 }
 0x205   :  { %v1555_v7 = vmax.f32 %v1554_v5, 0.0 }
 0x207   :  { %v1557_v14 = vadd.f32 1e-05, %v1555_v7 }
 0x209   :  { %2448 = vrsqrt.f32 %v1557_v14  ;;  %vm1564_vm1 = vweird.f32 %v1557_v14 }
 0x20f   :  { %v2449_v47 = vpop.eup %2448 }
 0x210   :  { %v1559_v16 = vmul.f32 %v2449_v47, %v1557_v14  ;;  %vm1565_vm0 = vweird.f32 %v2449_v47 }
 0x211   :  { %vm1566_vm2 = vmor %vm1564_vm1, %vm1565_vm0 }
 0x212   :  { %v1560_v13 = vmul.f32 %v2449_v47, %v1559_v16 }
 0x214   :  { %v1561_v25 = vmul.f32 0.5, %v1560_v13 }
 0x216   :  { %v1562_v34 = vsub.f32 1.5, %v1561_v25 }
 0x218   :  { %v1563_v19 = vmul.f32 %v2449_v47, %v1562_v34 }
 0x21a   :  { %v1567_v20 = vsel %vm1566_vm2, %v2449_v47, %v1563_v19 }
 0x21b   :  { %v1568_v51 = vmul.f32 %v1567_v20, %v1556_v6 }
 0x21d   :  { %v1570_v63 = vperm.slane %v1568_v51, 0 }
 0x21f   :  { %v1571_v9 = vmul.f32 %v1570_v63, %v3233_v10  ;;  %v1572_v24 = vmul.f32 %v1570_v63, %v3236_v8  ;;  %v1573_v32 = vmul.f32 %v1570_v63, %v3239_v35  ;;  %v1574_v33 = vmul.f32 %v1570_v63, %v3242_v26 }
 0x220   :  { %v1575_v21 = vmul.f32 %v1570_v63, %v3245_v27  ;;  %v1576_v36 = vmul.f32 %v1570_v63, %v3248_v44  ;;  %v1577_v38 = vmul.f32 %v1570_v63, %v3251_v28  ;;  %v1578_v22 = vmul.f32 %v1570_v63, %v3254_v50 }
 0x221   :  { %v1579_v10 = vmul.f32 %v1570_v63, %v3257_v49  ;;  %v1580_v8 = vmul.f32 %v1570_v63, %v3260_v61  ;;  %v1581_v35 = vmul.f32 %v1570_v63, %v3262_v3  ;;  %v1582_v26 = vmul.f32 %v1570_v63, %v3264_v29 }
 0x222   :  { %v1583_v39 = vmul.f32 %v1570_v63, %v3266_v12  ;;  %v1584_v41 = vmul.f32 %v1570_v63, %v3268_v31  ;;  %v1585_v27 = vmul.f32 %v1570_v63, %v3270_v30  ;;  %v1586_v44 = vmul.f32 %v1570_v63, %v3272_v43 }
 0x223   :  { %v1588_v4 = vadd.f32 %v2447_v11, %v1571_v9  ;;  %v1589_v28 = vadd.f32 %v2447_v11, %v1572_v24  ;;  %v1590_v23 = vadd.f32 %v2447_v11, %v1573_v32  ;;  %v1591_v50 = vadd.f32 %v2447_v11, %v1574_v33 }
 0x224   :  { %v1592_v45 = vadd.f32 %v2447_v11, %v1575_v21  ;;  %v1593_v49 = vadd.f32 %v2447_v11, %v1576_v36  ;;  %v1594_v42 = vadd.f32 %v2447_v11, %v1577_v38  ;;  %v1595_v61 = vadd.f32 %v2447_v11, %v1578_v22 }
 0x225   :  { %v1596_v46 = vadd.f32 %v2447_v11, %v1579_v10  ;;  %v1597_v3 = vadd.f32 %v2447_v11, %v1580_v8  ;;  %v1598_v56 = vadd.f32 %v2447_v11, %v1581_v35  ;;  %v1599_v29 = vadd.f32 %v2447_v11, %v1582_v26 }
 0x226   :  { %v1600_v54 = vadd.f32 %v2447_v11, %v1583_v39  ;;  %v1601_v12 = vadd.f32 %v2447_v11, %v1584_v41  ;;  %v1602_v40 = vadd.f32 %v2447_v11, %v1585_v27  ;;  %v1603_v31 = vadd.f32 %v2447_v11, %v1586_v44 }
 0x227   :  { %v1604_v48 = vmax.f32 %v1588_v4, 0.0  ;;  %v1605_v30 = vmax.f32 %v1589_v28, 0.0  ;;  %v1606_v18 = vmax.f32 %v1590_v23, 0.0  ;;  %v1607_v43 = vmax.f32 %v1591_v50, 0.0 }
 0x228   :  { %v1608_v55 = vmax.f32 %v1592_v45, 0.0  ;;  %v1609_v53 = vmax.f32 %v1593_v49, 0.0  ;;  %v1610_v52 = vmax.f32 %v1594_v42, 0.0  ;;  %v1611_v57 = vmax.f32 %v1595_v61, 0.0 }
 0x229   :  { %v1612_v62 = vmax.f32 %v1596_v46, 0.0  ;;  %v1613_v58 = vmax.f32 %v1597_v3, 0.0  ;;  %v1614_v59 = vmax.f32 %v1598_v56, 0.0  ;;  %v1615_v60 = vmax.f32 %v1599_v29, 0.0 }
 0x22a   :  { %v1616_v37 = vmax.f32 %v1600_v54, 0.0  ;;  %v1617_v0 = vmax.f32 %v1601_v12, 0.0  ;;  %v1618_v17 = vmax.f32 %v1602_v40, 0.0  ;;  %v1619_v15 = vmax.f32 %v1603_v31, 0.0 }
 0x22b   :  { %v2379_v1 = vpack.c.bf16 %v1605_v30, %v1604_v48  ;;  %v2384_v2 = vpack.c.bf16 %v1607_v43, %v1606_v18  ;;  %v2389_v5 = vpack.c.bf16 %v1609_v53, %v1608_v55  ;;  %v2394_v7 = vpack.c.bf16 %v1611_v57, %v1610_v52 }
 0x22c   :  { %v2399_v14 = vpack.c.bf16 %v1613_v58, %v1612_v62  ;;  %v2404_v47 = vpack.c.bf16 %v1615_v60, %v1614_v59  ;;  %v2409_v16 = vpack.c.bf16 %v1617_v0, %v1616_v37  ;;  %v2414_v13 = vpack.c.bf16 %v1619_v15, %v1618_v17 }
 0x22d   :  { %2380 = vst [vmem:[%s3355_s3] sm:$0xff] %v2379_v1  }
 0x22e   :  { %2416 = vst [vmem:[%s3355_s3 + $0x8] sm:$0xff] %v2384_v2  }
 0x22f   :  { %2417 = vst [vmem:[%s3355_s3 + $0x10] sm:$0xff] %v2389_v5  }
 0x230   :  { %2418 = vst [vmem:[%s3355_s3 + $0x18] sm:$0xff] %v2394_v7  }
 0x231   :  { %2419 = vst [vmem:[%s3355_s3 + $0x20] sm:$0xff] %v2399_v14  }
 0x232   :  { %2420 = vst [vmem:[%s3355_s3 + $0x28] sm:$0xff] %v2404_v47  }
 0x233   :  { %2421 = vst [vmem:[%s3355_s3 + $0x30] sm:$0xff] %v2409_v16  }
 0x234   :  { %2422 = vst [vmem:[%s3355_s3 + $0x38] sm:$0xff] %v2414_v13  }

// kernel: vgg_backbone_forward.12
= control target key start
LH: loop header
LB: loop body
LE: loop exit
PB: predicated region body
PF: predicated region fallthrough
CT: control target
= control target key end

     0   :  { %s1770_s1 = inlined_call_operand.vmem [shape: bf16[1152,128], index: 1, kind: input, shape index: {}]   ;;  %s1771_s0 = inlined_call_operand.vmem [shape: bf16[32,1152], index: 0, kind: input, shape index: {}]   ;;  %s1772_s2 = inlined_call_operand.vmem [shape: f32[2,128], index: 2, kind: input, shape index: {}]   ;;  %s1773_s3 = inlined_call_operand.vmem [shape: bf16[32,128], index: 3, kind: output, shape index: {}]  }
   0x1   :  { %v1327_v0 = vld [vmem:[%s1770_s1 + $0x38] sm:$0xff]  ;;  %v1326_v4 = vld [vmem:[%s1770_s1 + $0x30] sm:$0xff]  ;;  %v1325_v8 = vld [vmem:[%s1770_s1 + $0x28] sm:$0xff] }
   0x2   :  { %v1335_v1 = vld [vmem:[%s1770_s1 + $0x78] sm:$0xff]  ;;  %702 = vmatpush.bf16.msra.mxu0 %v1327_v0  ;;  %v1334_v5 = vld [vmem:[%s1770_s1 + $0x70] sm:$0xff]  ;;  %v1333_v9 = vld [vmem:[%s1770_s1 + $0x68] sm:$0xff] }
   0x3   :  { %v1343_v2 = vld [vmem:[%s1770_s1 + $0xb8] sm:$0xff]  ;;  %721 = vmatpush.bf16.msra.mxu1 %v1335_v1  ;;  %v1342_v6 = vld [vmem:[%s1770_s1 + $0xb0] sm:$0xff]  ;;  %v1341_v10 = vld [vmem:[%s1770_s1 + $0xa8] sm:$0xff] }
   0x4   :  { %v1351_v3 = vld [vmem:[%s1770_s1 + $0xf8] sm:$0xff]  ;;  %740 = vmatpush.bf16.msra.mxu2 %v1343_v2  ;;  %v1350_v7 = vld [vmem:[%s1770_s1 + $0xf0] sm:$0xff]  ;;  %v1349_v11 = vld [vmem:[%s1770_s1 + $0xe8] sm:$0xff] }
   0x5   :  { %759 = vmatpush.bf16.msra.mxu3 %v1351_v3  ;;  %v1324_v12 = vld [vmem:[%s1770_s1 + $0x20] sm:$0xff]  ;;  %v1323_v16 = vld [vmem:[%s1770_s1 + $0x18] sm:$0xff]  ;;  %v1322_v20 = vld [vmem:[%s1770_s1 + $0x10] sm:$0xff] }
   0x6   :  { %703 = vmatpush.bf16.msra.mxu0 %v1326_v4  ;;  %v1332_v13 = vld [vmem:[%s1770_s1 + $0x60] sm:$0xff]  ;;  %v1331_v17 = vld [vmem:[%s1770_s1 + $0x58] sm:$0xff]  ;;  %v1330_v21 = vld [vmem:[%s1770_s1 + $0x50] sm:$0xff] }
   0x7   :  { %722 = vmatpush.bf16.msra.mxu1 %v1334_v5  ;;  %v1340_v14 = vld [vmem:[%s1770_s1 + $0xa0] sm:$0xff]  ;;  %v1339_v18 = vld [vmem:[%s1770_s1 + $0x98] sm:$0xff]  ;;  %v1338_v22 = vld [vmem:[%s1770_s1 + $0x90] sm:$0xff] }
   0x8   :  { %741 = vmatpush.bf16.msra.mxu2 %v1342_v6  ;;  %v1348_v15 = vld [vmem:[%s1770_s1 + $0xe0] sm:$0xff]  ;;  %v1347_v19 = vld [vmem:[%s1770_s1 + $0xd8] sm:$0xff]  ;;  %v1346_v23 = vld [vmem:[%s1770_s1 + $0xd0] sm:$0xff] }
   0x9   :  { %760 = vmatpush.bf16.msra.mxu3 %v1350_v7  ;;  %v1321_v24 = vld [vmem:[%s1770_s1 + $0x8] sm:$0xff]  ;;  %v1320_v28 = vld [vmem:[%s1770_s1] sm:$0xff]  ;;  %v954_v39 = vld [vmem:[%s1771_s0 + $0x2c] sm:$0xf0] }
   0xa   :  { %704 = vmatpush.bf16.msra.mxu0 %v1325_v8  ;;  %v1329_v25 = vld [vmem:[%s1770_s1 + $0x48] sm:$0xff]  ;;  %v1328_v29 = vld [vmem:[%s1770_s1 + $0x40] sm:$0xff]  ;;  %v1359_v40 = vld [vmem:[%s1770_s1 + $0x138] sm:$0xff] }
   0xb   :  { %723 = vmatpush.bf16.msra.mxu1 %v1333_v9  ;;  %v1337_v26 = vld [vmem:[%s1770_s1 + $0x88] sm:$0xff]  ;;  %v1336_v30 = vld [vmem:[%s1770_s1 + $0x80] sm:$0xff]  ;;  %v1367_v41 = vld [vmem:[%s1770_s1 + $0x178] sm:$0xff] }
   0xc   :  { %742 = vmatpush.bf16.msra.mxu2 %v1341_v10  ;;  %v1345_v27 = vld [vmem:[%s1770_s1 + $0xc8] sm:$0xff]  ;;  %v1344_v31 = vld [vmem:[%s1770_s1 + $0xc0] sm:$0xff]  ;;  %v1375_v46 = vld [vmem:[%s1770_s1 + $0x1b8] sm:$0xff] }
   0xd   :  { %761 = vmatpush.bf16.msra.mxu3 %v1349_v11  ;;  %v944_v32 = vld [vmem:[%s1771_s0] sm:$0xf]  ;;  %v1306_v33 = vld [vmem:[%s1771_s0 + $0x20] sm:$0xf0]  ;;  %v946_v35 = vld [vmem:[%s1771_s0 + $0x24] sm:$0xf0] }
   0xe   :  { %705 = vmatpush.bf16.msra.mxu0 %v1324_v12  ;;  %v1302_v34 = vld [vmem:[%s1771_s0 + $0x4] sm:$0xf]  ;;  %v952_v36 = vld [vmem:[%s1771_s0 + $0x8] sm:$0xf]  ;;  %v1307_v37 = vld [vmem:[%s1771_s0 + $0x28] sm:$0xf0]  ;;  %v945_v42 = vor.u32 %v1306_v33, %v944_v32 }
   0xf   :  { %724 = vmatpush.bf16.msra.mxu1 %v1332_v13  ;;  %v1303_v38 = vld [vmem:[%s1771_s0 + $0xc] sm:$0xf]  ;;  %v949_v43 = vor.u32 %v1302_v34, %v946_v35  ;;  %v953_v44 = vor.u32 %v1307_v37, %v952_v36  ;;  %v1383_v47 = vld [vmem:[%s1770_s1 + $0x1f8] sm:$0xff]  ;;  %v1358_v48 = vld [vmem:[%s1770_s1 + $0x130] sm:$0xff] }
  0x10   :  { %743 = vmatpush.bf16.msra.mxu2 %v1340_v14  ;;  %v957_v45 = vor.u32 %v1303_v38, %v954_v39  ;;  %v1366_v49 = vld [vmem:[%s1770_s1 + $0x170] sm:$0xff]  ;;  %v1357_v52 = vld [vmem:[%s1770_s1 + $0x128] sm:$0xff]  ;;  %v1356_v56 = vld [vmem:[%s1770_s1 + $0x120] sm:$0xff] }
  0x11   :  { %762 = vmatpush.bf16.msra.mxu3 %v1348_v15  ;;  %v1374_v50 = vld [vmem:[%s1770_s1 + $0x1b0] sm:$0xff]  ;;  %v1365_v53 = vld [vmem:[%s1770_s1 + $0x168] sm:$0xff]  ;;  %v1364_v57 = vld [vmem:[%s1770_s1 + $0x160] sm:$0xff] }
  0x12   :  { %706 = vmatpush.bf16.msra.mxu0 %v1323_v16  ;;  %v1382_v51 = vld [vmem:[%s1770_s1 + $0x1f0] sm:$0xff]  ;;  %v1373_v54 = vld [vmem:[%s1770_s1 + $0x1a8] sm:$0xff]  ;;  %v1372_v58 = vld [vmem:[%s1770_s1 + $0x1a0] sm:$0xff] }
  0x13   :  { %725 = vmatpush.bf16.msra.mxu1 %v1331_v17  ;;  %v1381_v55 = vld [vmem:[%s1770_s1 + $0x1e8] sm:$0xff]  ;;  %v1380_v59 = vld [vmem:[%s1770_s1 + $0x1e0] sm:$0xff]  ;;  %v982_v63 = vld [vmem:[%s1771_s0 + $0x6c] sm:$0xf0] }
  0x14   :  { %744 = vmatpush.bf16.msra.mxu2 %v1339_v18  ;;  %v980_v60 = vld [vmem:[%s1771_s0 + $0x48] sm:$0xf]  ;;  %v1315_v61 = vld [vmem:[%s1771_s0 + $0x68] sm:$0xf0]  ;;  %v988_v0 = vld [vmem:[%s1771_s0 + $0x50] sm:$0xf] }
  0x15   :  { %763 = vmatpush.bf16.msra.mxu3 %v1347_v19  ;;  %v1311_v62 = vld [vmem:[%s1771_s0 + $0x4c] sm:$0xf]  ;;  %v1316_v1 = vld [vmem:[%s1771_s0 + $0x70] sm:$0xf0]  ;;  %v990_v3 = vld [vmem:[%s1771_s0 + $0x74] sm:$0xf0]  ;;  %v981_v6 = vor.u32 %v1315_v61, %v980_v60 }
  0x16   :  { %707 = vmatpush.bf16.msra.mxu0 %v1322_v20  ;;  %v1312_v2 = vld [vmem:[%s1771_s0 + $0x54] sm:$0xf]  ;;  %v1355_v4 = vld [vmem:[%s1770_s1 + $0x118] sm:$0xff]  ;;  %v985_v7 = vor.u32 %v1311_v62, %v982_v63  ;;  %v989_v8 = vor.u32 %v1316_v1, %v988_v0  ;;  %v1353_v16 = vld [vmem:[%s1770_s1 + $0x108] sm:$0xff] }
  0x17   :  { %726 = vmatpush.bf16.msra.mxu1 %v1330_v21  ;;  %v1363_v5 = vld [vmem:[%s1770_s1 + $0x158] sm:$0xff]  ;;  %v993_v9 = vor.u32 %v1312_v2, %v990_v3  ;;  %v1354_v12 = vld [vmem:[%s1770_s1 + $0x110] sm:$0xff]  ;;  %v1361_v17 = vld [vmem:[%s1770_s1 + $0x148] sm:$0xff] }
  0x18   :  { %745 = vmatpush.bf16.msra.mxu2 %v1338_v22  ;;  %v1371_v10 = vld [vmem:[%s1770_s1 + $0x198] sm:$0xff]  ;;  %v1362_v13 = vld [vmem:[%s1770_s1 + $0x150] sm:$0xff]  ;;  %v1369_v18 = vld [vmem:[%s1770_s1 + $0x188] sm:$0xff] }
  0x19   :  { %764 = vmatpush.bf16.msra.mxu3 %v1346_v23  ;;  %v1379_v11 = vld [vmem:[%s1770_s1 + $0x1d8] sm:$0xff]  ;;  %v1370_v14 = vld [vmem:[%s1770_s1 + $0x190] sm:$0xff]  ;;  %v1377_v19 = vld [vmem:[%s1770_s1 + $0x1c8] sm:$0xff] }
  0x1a   :  { %708 = vmatpush.bf16.msra.mxu0 %v1321_v24  ;;  %v1378_v15 = vld [vmem:[%s1770_s1 + $0x1d0] sm:$0xff]  ;;  %v1352_v20 = vld [vmem:[%s1770_s1 + $0x100] sm:$0xff]  ;;  %v1389_v38 = vld [vmem:[%s1770_s1 + $0x228] sm:$0xff] }
  0x1b   :  { %727 = vmatpush.bf16.msra.mxu1 %v1329_v25  ;;  %v1360_v21 = vld [vmem:[%s1770_s1 + $0x140] sm:$0xff]  ;;  %v960_v24 = vld [vmem:[%s1771_s0 + $0x10] sm:$0xf]  ;;  %v1308_v25 = vld [vmem:[%s1771_s0 + $0x30] sm:$0xf0] }
  0x1c   :  { %746 = vmatpush.bf16.msra.mxu2 %v1337_v26  ;;  %v1368_v22 = vld [vmem:[%s1770_s1 + $0x180] sm:$0xff]  ;;  %v1391_v26 = vld [vmem:[%s1770_s1 + $0x238] sm:$0xff]  ;;  %v961_v33 = vor.u32 %v1308_v25, %v960_v24  ;;  %v1390_v37 = vld [vmem:[%s1770_s1 + $0x230] sm:$0xff] }
  0x1d   :  { %765 = vmatpush.bf16.msra.mxu3 %v1345_v27  ;;  %v1376_v23 = vld [vmem:[%s1770_s1 + $0x1c0] sm:$0xff]  ;;  %v1304_v27 = vld [vmem:[%s1771_s0 + $0x14] sm:$0xf] }
  0x1e   :  { %709 = vmatpush.bf16.msra.mxu0 %v1320_v28  ;;  %v962_v28 = vld [vmem:[%s1771_s0 + $0x34] sm:$0xf0]  ;;  %v970_v32 = vld [vmem:[%s1771_s0 + $0x3c] sm:$0xf0] }
  0x1f   :  { %728 = vmatpush.bf16.msra.mxu1 %v1328_v29  ;;  %v968_v29 = vld [vmem:[%s1771_s0 + $0x18] sm:$0xf]  ;;  %v965_v34 = vor.u32 %v1304_v27, %v962_v28  ;;  %v1388_v39 = vld [vmem:[%s1770_s1 + $0x220] sm:$0xff] }
  0x20   :  { %747 = vmatpush.bf16.msra.mxu2 %v1336_v30  ;;  %v1309_v30 = vld [vmem:[%s1771_s0 + $0x38] sm:$0xf0] }
  0x21   :  { %766 = vmatpush.bf16.msra.mxu3 %v1344_v31  ;;  %710 = vmatmul.bf16.vlgmr.msra.gmra.mxu0 %v945_v42  ;;  %v1305_v31 = vld [vmem:[%s1771_s0 + $0x1c] sm:$0xf]  ;;  %v969_v35 = vor.u32 %v1309_v30, %v968_v29 }
  0x22   :  { %778 = vmatpush.bf16.msrb.mxu0 %v1359_v40  ;;  %729 = vmatmul.bf16.vlgmr.msra.gmra.mxu1 %v949_v43  ;;  %v973_v36 = vor.u32 %v1305_v31, %v970_v32  ;;  %v996_v40 = vld [vmem:[%s1771_s0 + $0x58] sm:$0xf]  ;;  %v1313_v42 = vld [vmem:[%s1771_s0 + $0x5c] sm:$0xf]  ;;  %v998_v43 = vld [vmem:[%s1771_s0 + $0x7c] sm:$0xf0] }
  0x23   :  { %797 = vmatpush.bf16.msrb.mxu1 %v1367_v41  ;;  %748 = vmatmul.bf16.vlgmr.msra.gmra.mxu2 %v953_v44  ;;  %v1317_v41 = vld [vmem:[%s1771_s0 + $0x78] sm:$0xf0]  ;;  %v1004_v44 = vld [vmem:[%s1771_s0 + $0x60] sm:$0xf] }
  0x24   :  { %767 = vmatmul.bf16.vlgmr.msra.gmra.mxu3 %v957_v45  ;;  %816 = vmatpush.bf16.msrb.mxu2 %v1375_v46  ;;  %v1318_v45 = vld [vmem:[%s1771_s0 + $0x80] sm:$0xf0]  ;;  %v1387_v46 = vld [vmem:[%s1770_s1 + $0x218] sm:$0xff] }
  0x25   :  { %835 = vmatpush.bf16.msrb.mxu3 %v1383_v47  ;;  %v1314_v47 = vld [vmem:[%s1771_s0 + $0x64] sm:$0xf] }
  0x26   :  { %779 = vmatpush.bf16.msrb.mxu0 %v1358_v48  ;;  %v1006_v48 = vld [vmem:[%s1771_s0 + $0x84] sm:$0xf0] }
  0x27   :  { %798 = vmatpush.bf16.msrb.mxu1 %v1366_v49  ;;  %v997_v49 = vor.u32 %v1317_v41, %v996_v40 }
  0x28   :  { %817 = vmatpush.bf16.msrb.mxu2 %v1374_v50  ;;  %v1001_v50 = vor.u32 %v1313_v42, %v998_v43 }
  0x29   :  { %836 = vmatpush.bf16.msrb.mxu3 %v1382_v51  ;;  %v1005_v51 = vor.u32 %v1318_v45, %v1004_v44 }
  0x2a   :  { %780 = vmatpush.bf16.msrb.mxu0 %v1357_v52  ;;  %v1009_v52 = vor.u32 %v1314_v47, %v1006_v48 }
  0x2b   :  { %799 = vmatpush.bf16.msrb.mxu1 %v1365_v53  ;;  %v1386_v53 = vld [vmem:[%s1770_s1 + $0x210] sm:$0xff] }
  0x2c   :  { %818 = vmatpush.bf16.msrb.mxu2 %v1373_v54  ;;  %v1385_v54 = vld [vmem:[%s1770_s1 + $0x208] sm:$0xff] }
  0x2d   :  { %837 = vmatpush.bf16.msrb.mxu3 %v1381_v55  ;;  %v1384_v55 = vld [vmem:[%s1770_s1 + $0x200] sm:$0xff] }
  0x2e   :  { %781 = vmatpush.bf16.msrb.mxu0 %v1356_v56  ;;  %v976_v56 = vld [vmem:[%s1771_s0 + $0x20] sm:$0xf] }
  0x2f   :  { %800 = vmatpush.bf16.msrb.mxu1 %v1364_v57  ;;  %v1310_v57 = vld [vmem:[%s1771_s0 + $0x40] sm:$0xf0] }
  0x30   :  { %819 = vmatpush.bf16.msrb.mxu2 %v1372_v58  ;;  %v1012_v58 = vld [vmem:[%s1771_s0 + $0x68] sm:$0xf]  ;;  %v977_v60 = vor.u32 %v1310_v57, %v976_v56 }
  0x31   :  { %838 = vmatpush.bf16.msrb.mxu3 %v1380_v59  ;;  %715 = vmatmul.bf16.gmra.mxu0 %v981_v6  ;;  %v1319_v59 = vld [vmem:[%s1771_s0 + $0x88] sm:$0xf0] }
  0x32   :  { %782 = vmatpush.bf16.msrb.mxu0 %v1355_v4  ;;  %734 = vmatmul.bf16.gmra.mxu1 %v985_v7  ;;  %v1013_v61 = vor.u32 %v1319_v59, %v1012_v58 }
  0x33   :  { %801 = vmatpush.bf16.msrb.mxu1 %v1363_v5  ;;  %753 = vmatmul.bf16.gmra.mxu2 %v989_v8 }
  0x34   :  { %772 = vmatmul.bf16.gmra.mxu3 %v993_v9  ;;  %820 = vmatpush.bf16.msrb.mxu2 %v1371_v10 }
  0x35   :  { %839 = vmatpush.bf16.msrb.mxu3 %v1379_v11 }
  0x36   :  { %783 = vmatpush.bf16.msrb.mxu0 %v1354_v12 }
  0x37   :  { %802 = vmatpush.bf16.msrb.mxu1 %v1362_v13 }
  0x38   :  { %821 = vmatpush.bf16.msrb.mxu2 %v1370_v14 }
  0x39   :  { %840 = vmatpush.bf16.msrb.mxu3 %v1378_v15 }
  0x3a   :  { %784 = vmatpush.bf16.msrb.mxu0 %v1353_v16 }
  0x3b   :  { %803 = vmatpush.bf16.msrb.mxu1 %v1361_v17 }
  0x3c   :  { %822 = vmatpush.bf16.msrb.mxu2 %v1369_v18 }
  0x3d   :  { %841 = vmatpush.bf16.msrb.mxu3 %v1377_v19 }
  0x3e   :  { %785 = vmatpush.bf16.msrb.mxu0 %v1352_v20 }
  0x3f   :  { %804 = vmatpush.bf16.msrb.mxu1 %v1360_v21 }
  0x40   :  { %823 = vmatpush.bf16.msrb.mxu2 %v1368_v22 }
  0x41   :  { %842 = vmatpush.bf16.msrb.mxu3 %v1376_v23  ;;  %786 = vmatmul.bf16.vlgmr.msrb.gmra.mxu0 %v961_v33 }
  0x42   :  { %854 = vmatpush.bf16.msra.mxu0 %v1391_v26  ;;  %805 = vmatmul.bf16.vlgmr.msrb.gmra.mxu1 %v965_v34 }
  0x43   :  { %1403 = vmatpush.bf16.msra.mxu1 %v1391_v26  ;;  %824 = vmatmul.bf16.vlgmr.msrb.gmra.mxu2 %v969_v35 }
  0x44   :  { %843 = vmatmul.bf16.vlgmr.msrb.gmra.mxu3 %v973_v36 }
  0x46   :  { %855 = vmatpush.bf16.msra.mxu0 %v1390_v37 }
  0x47   :  { %1404 = vmatpush.bf16.msra.mxu1 %v1390_v37 }
  0x4a   :  { %856 = vmatpush.bf16.msra.mxu0 %v1389_v38 }
  0x4b   :  { %1405 = vmatpush.bf16.msra.mxu1 %v1389_v38 }
  0x4e   :  { %857 = vmatpush.bf16.msra.mxu0 %v1388_v39 }
  0x4f   :  { %1406 = vmatpush.bf16.msra.mxu1 %v1388_v39 }
  0x51   :  { %791 = vmatmul.bf16.gmra.mxu0 %v997_v49 }
  0x52   :  { %858 = vmatpush.bf16.msra.mxu0 %v1387_v46  ;;  %810 = vmatmul.bf16.gmra.mxu1 %v1001_v50 }
  0x53   :  { %1407 = vmatpush.bf16.msra.mxu1 %v1387_v46  ;;  %829 = vmatmul.bf16.gmra.mxu2 %v1005_v51 }
  0x54   :  { %848 = vmatmul.bf16.gmra.mxu3 %v1009_v52 }
  0x56   :  { %859 = vmatpush.bf16.msra.mxu0 %v1386_v53 }
  0x57   :  { %1408 = vmatpush.bf16.msra.mxu1 %v1386_v53 }
  0x5a   :  { %860 = vmatpush.bf16.msra.mxu0 %v1385_v54 }
  0x5b   :  { %1409 = vmatpush.bf16.msra.mxu1 %v1385_v54 }
  0x5e   :  { %861 = vmatpush.bf16.msra.mxu0 %v1384_v55 }
  0x5f   :  { %1410 = vmatpush.bf16.msra.mxu1 %v1384_v55 }
  0x61   :  { %862 = vmatmul.bf16.vlgmr.msra.gmra.mxu0 %v977_v60 }
  0x62   :  { %867 = vmatmul.bf16.vlgmr.msra.gmra.mxu1 %v1013_v61 }
  0x9e   :  { %v711_v62 = vpop.f32.mrf.mxu0 }
  0x9f   :  { %v730_v63 = vpop.f32.mrf.mxu1 }
  0xa0   :  { %v731_v24 = vadd.f32 %v730_v63, %v711_v62 }
  0xa6   :  { %v749_v0 = vpop.f32.mrf.mxu2  ;;  %v713_v2 = vpop.f32.mrf.mxu0 }
  0xa7   :  { %v768_v1 = vpop.f32.mrf.mxu3  ;;  %v732_v3 = vpop.f32.mrf.mxu1  ;;  %v750_v26 = vadd.f32 %v749_v0, %v731_v24 }
  0xa8   :  { %v733_v25 = vadd.f32 %v732_v3, %v713_v2 }
  0xa9   :  { %v769_v34 = vadd.f32 %v768_v1, %v750_v26 }
  0xae   :  { %v751_v4 = vpop.f32.mrf.mxu2  ;;  %v716_v6 = vpop.f32.mrf.mxu0 }
  0xaf   :  { %v770_v5 = vpop.f32.mrf.mxu3  ;;  %v735_v7 = vpop.f32.mrf.mxu1  ;;  %v752_v27 = vadd.f32 %v751_v4, %v733_v25 }
  0xb0   :  { %v736_v28 = vadd.f32 %v735_v7, %v716_v6 }
  0xb1   :  { %v771_v35 = vadd.f32 %v770_v5, %v752_v27 }
  0xb6   :  { %v754_v8 = vpop.f32.mrf.mxu2  ;;  %v718_v10 = vpop.f32.mrf.mxu0 }
  0xb7   :  { %v773_v9 = vpop.f32.mrf.mxu3  ;;  %v737_v11 = vpop.f32.mrf.mxu1  ;;  %v755_v31 = vadd.f32 %v754_v8, %v736_v28 }
  0xb8   :  { %v738_v32 = vadd.f32 %v737_v11, %v718_v10 }
  0xb9   :  { %v774_v37 = vadd.f32 %v773_v9, %v755_v31 }
  0xbe   :  { %v756_v12 = vpop.f32.mrf.mxu2  ;;  %v787_v14 = vpop.f32.mrf.mxu0 }
  0xbf   :  { %v775_v13 = vpop.f32.mrf.mxu3  ;;  %v806_v15 = vpop.f32.mrf.mxu1  ;;  %v757_v36 = vadd.f32 %v756_v12, %v738_v32  ;;  %v788_v38 = vadd.f32 %v787_v14, %v769_v34 }
  0xc1   :  { %v776_v41 = vadd.f32 %v775_v13, %v757_v36  ;;  %v807_v45 = vadd.f32 %v806_v15, %v788_v38 }
  0xc6   :  { %v825_v16 = vpop.f32.mrf.mxu2  ;;  %v789_v17 = vpop.f32.mrf.mxu0 }
  0xc7   :  { %v808_v18 = vpop.f32.mrf.mxu1  ;;  %v844_v19 = vpop.f32.mrf.mxu3  ;;  %v790_v39 = vadd.f32 %v789_v17, %v771_v35  ;;  %v826_v48 = vadd.f32 %v825_v16, %v807_v45 }
  0xc9   :  { %v809_v46 = vadd.f32 %v808_v18, %v790_v39  ;;  %v845_v54 = vadd.f32 %v844_v19, %v826_v48 }
  0xce   :  { %v827_v20 = vpop.f32.mrf.mxu2  ;;  %v792_v21 = vpop.f32.mrf.mxu0 }
  0xcf   :  { %v811_v22 = vpop.f32.mrf.mxu1  ;;  %v846_v23 = vpop.f32.mrf.mxu3  ;;  %v793_v42 = vadd.f32 %v792_v21, %v774_v37  ;;  %v828_v49 = vadd.f32 %v827_v20, %v809_v46  ;;  %v902_v37 = vld [vmem:[%s1772_s2] sm:$0x1] }
  0xd1   :  { %v812_v50 = vadd.f32 %v811_v22, %v793_v42  ;;  %v847_v55 = vadd.f32 %v846_v23, %v828_v49  ;;  %v1411_v42 = vld [vmem:[%s1772_s2 + $0x1] ss:$0 sm:$0xff] }
  0xd6   :  { %v794_v29 = vpop.f32.mrf.mxu0  ;;  %v830_v33 = vpop.f32.mrf.mxu2 }
  0xd7   :  { %v813_v30 = vpop.f32.mrf.mxu1  ;;  %v849_v40 = vpop.f32.mrf.mxu3  ;;  %v795_v47 = vadd.f32 %v794_v29, %v776_v41  ;;  %v831_v52 = vadd.f32 %v830_v33, %v812_v50 }
  0xd9   :  { %v814_v53 = vadd.f32 %v813_v30, %v795_v47  ;;  %v850_v59 = vadd.f32 %v849_v40, %v831_v52 }
  0xde   :  { %v863_v43 = vpop.f32.mrf.mxu0  ;;  %v832_v51 = vpop.f32.mrf.mxu2 }
  0xdf   :  { %v868_v44 = vpop.f32.mrf.mxu1  ;;  %v833_v56 = vadd.f32 %v832_v51, %v814_v53  ;;  %v851_v57 = vpop.f32.mrf.mxu3  ;;  %v864_v60 = vadd.f32 %v863_v43, %v845_v54 }
  0xe0   :  { %v869_v0 = vadd.f32 %v868_v44, %v850_v59 }
  0xe1   :  { %v852_v63 = vadd.f32 %v851_v57, %v833_v56 }
  0xe6   :  { %v865_v58 = vpop.f32.mrf.mxu0 }
  0xe7   :  { %v866_v61 = vadd.f32 %v865_v58, %v847_v55  ;;  %v870_v62 = vpop.f32.mrf.mxu1 }
  0xe8   :  { %v871_v2 = vadd.f32 %v870_v62, %v852_v63 }
  0xe9   :  { %v873_v1 = vadd.f32 %v866_v61, %v864_v60 }
  0xeb   :  { %v874_v3 = vadd.f32 %v873_v1, %v869_v0 }
  0xed   :  { %v875_v4 = vadd.f32 %v874_v3, %v871_v2 }
  0xef   :  { %v876_v5 = vrot.slane %v875_v4, 4 }
  0xf1   :  { %v877_v6 = vadd.f32 %v876_v5, %v875_v4 }
  0xf3   :  { %v878_v7 = vrot.slane %v877_v6, 2 }
  0xf5   :  { %v879_v8 = vadd.f32 %v878_v7, %v877_v6 }
  0xf7   :  { %v880_v9 = vrot.slane %v879_v8, 1 }
  0xf9   :  { %v881_v10 = vadd.f32 %v880_v9, %v879_v8 }
  0xfb   :  { %v882_v11 = vmul.f32 0.03125, %v881_v10 }
  0xfd   :  { %v883_v12 = vsub.f32 %v864_v60, %v882_v11  ;;  %v884_v13 = vsub.f32 %v866_v61, %v882_v11  ;;  %v885_v14 = vsub.f32 %v869_v0, %v882_v11  ;;  %v886_v15 = vsub.f32 %v871_v2, %v882_v11 }
  0xff   :  { %v887_v16 = vmul.f32 %v883_v12, %v883_v12  ;;  %v888_v17 = vmul.f32 %v884_v13, %v884_v13  ;;  %v889_v18 = vmul.f32 %v885_v14, %v885_v14  ;;  %v890_v20 = vmul.f32 %v886_v15, %v886_v15 }
 0x101   :  { %v891_v19 = vadd.f32 %v888_v17, %v887_v16 }
 0x103   :  { %v892_v21 = vadd.f32 %v891_v19, %v889_v18 }
 0x105   :  { %v893_v22 = vadd.f32 %v892_v21, %v890_v20 }
 0x107   :  { %v894_v23 = vrot.slane %v893_v22, 4 }
 0x109   :  { %v895_v24 = vadd.f32 %v894_v23, %v893_v22 }
 0x10b   :  { %v896_v25 = vrot.slane %v895_v24, 2 }
 0x10d   :  { %v897_v26 = vadd.f32 %v896_v25, %v895_v24 }
 0x10f   :  { %v898_v27 = vrot.slane %v897_v26, 1 }
 0x111   :  { %v899_v28 = vadd.f32 %v898_v27, %v897_v26 }
 0x113   :  { %v900_v29 = vmul.f32 0.03125, %v899_v28 }
 0x115   :  { %v901_v30 = vmax.f32 %v900_v29, 0.0 }
 0x117   :  { %v903_v31 = vadd.f32 1e-05, %v901_v30 }
 0x119   :  { %1412 = vrsqrt.f32 %v903_v31  ;;  %vm910_vm1 = vweird.f32 %v903_v31 }
 0x11f   :  { %v1413_v32 = vpop.eup %1412 }
 0x120   :  { %v905_v33 = vmul.f32 %v1413_v32, %v903_v31  ;;  %vm911_vm0 = vweird.f32 %v1413_v32 }
 0x121   :  { %vm912_vm2 = vmor %vm910_vm1, %vm911_vm0 }
 0x122   :  { %v906_v34 = vmul.f32 %v1413_v32, %v905_v33 }
 0x124   :  { %v907_v35 = vmul.f32 0.5, %v906_v34 }
 0x126   :  { %v908_v36 = vsub.f32 1.5, %v907_v35 }
 0x128   :  { %v909_v38 = vmul.f32 %v1413_v32, %v908_v36 }
 0x12a   :  { %v913_v39 = vsel %vm912_vm2, %v1413_v32, %v909_v38 }
 0x12b   :  { %v914_v40 = vmul.f32 %v913_v39, %v902_v37 }
 0x12d   :  { %v916_v41 = vperm.slane %v914_v40, 0 }
 0x12f   :  { %v917_v43 = vmul.f32 %v916_v41, %v883_v12  ;;  %v918_v44 = vmul.f32 %v916_v41, %v884_v13  ;;  %v919_v45 = vmul.f32 %v916_v41, %v885_v14  ;;  %v920_v46 = vmul.f32 %v916_v41, %v886_v15 }
 0x131   :  { %v922_v47 = vadd.f32 %v1411_v42, %v917_v43  ;;  %v923_v48 = vadd.f32 %v1411_v42, %v918_v44  ;;  %v924_v49 = vadd.f32 %v1411_v42, %v919_v45  ;;  %v925_v50 = vadd.f32 %v1411_v42, %v920_v46 }
 0x133   :  { %v926_v51 = vmax.f32 %v922_v47, 0.0  ;;  %v927_v52 = vmax.f32 %v923_v48, 0.0  ;;  %v928_v53 = vmax.f32 %v924_v49, 0.0  ;;  %v929_v54 = vmax.f32 %v925_v50, 0.0 }
 0x135   :  { %v1395_v55 = vpack.c.bf16 %v927_v52, %v926_v51  ;;  %v1400_v56 = vpack.c.bf16 %v929_v54, %v928_v53 }
 0x137   :  { %1396 = vst [vmem:[%s1773_s3] sm:$0xff] %v1395_v55  }
 0x138   :  { %1402 = vst [vmem:[%s1773_s3 + $0x8] sm:$0xff] %v1400_v56  }

// kernel: vgg_backbone_forward.15
= control target key start
LH: loop header
LB: loop body
LE: loop exit
PB: predicated region body
PF: predicated region fallthrough
CT: control target
= control target key end

     0   :  { %s1538_s1 = inlined_call_operand.vmem [shape: bf16[1152,128], index: 1, kind: input, shape index: {}]   ;;  %s1539_s0 = inlined_call_operand.vmem [shape: bf16[16,1152], index: 0, kind: input, shape index: {}]   ;;  %s1540_s2 = inlined_call_operand.vmem [shape: f32[2,128], index: 2, kind: input, shape index: {}]   ;;  %s1541_s3 = inlined_call_operand.vmem [shape: bf16[16,128], index: 3, kind: output, shape index: {}]  }
   0x1   :  { %v1166_v0 = vld [vmem:[%s1538_s1 + $0x38] sm:$0xff]  ;;  %v1165_v4 = vld [vmem:[%s1538_s1 + $0x30] sm:$0xff]  ;;  %v1164_v8 = vld [vmem:[%s1538_s1 + $0x28] sm:$0xff] }
   0x2   :  { %v1182_v1 = vld [vmem:[%s1538_s1 + $0xb8] sm:$0xff]  ;;  %646 = vmatpush.bf16.msra.mxu0 %v1166_v0  ;;  %v1181_v5 = vld [vmem:[%s1538_s1 + $0xb0] sm:$0xff]  ;;  %v1180_v9 = vld [vmem:[%s1538_s1 + $0xa8] sm:$0xff] }
   0x3   :  { %v1174_v2 = vld [vmem:[%s1538_s1 + $0x78] sm:$0xff]  ;;  %674 = vmatpush.bf16.msra.mxu2 %v1182_v1  ;;  %v1173_v6 = vld [vmem:[%s1538_s1 + $0x70] sm:$0xff]  ;;  %v1172_v10 = vld [vmem:[%s1538_s1 + $0x68] sm:$0xff] }
   0x4   :  { %v1190_v3 = vld [vmem:[%s1538_s1 + $0xf8] sm:$0xff]  ;;  %660 = vmatpush.bf16.msra.mxu1 %v1174_v2  ;;  %v1189_v7 = vld [vmem:[%s1538_s1 + $0xf0] sm:$0xff]  ;;  %v1188_v11 = vld [vmem:[%s1538_s1 + $0xe8] sm:$0xff] }
   0x5   :  { %688 = vmatpush.bf16.msra.mxu3 %v1190_v3  ;;  %v1163_v12 = vld [vmem:[%s1538_s1 + $0x20] sm:$0xff]  ;;  %v1162_v16 = vld [vmem:[%s1538_s1 + $0x18] sm:$0xff]  ;;  %v1161_v20 = vld [vmem:[%s1538_s1 + $0x10] sm:$0xff] }
   0x6   :  { %647 = vmatpush.bf16.msra.mxu0 %v1165_v4  ;;  %v1179_v13 = vld [vmem:[%s1538_s1 + $0xa0] sm:$0xff]  ;;  %v1178_v17 = vld [vmem:[%s1538_s1 + $0x98] sm:$0xff]  ;;  %v1177_v21 = vld [vmem:[%s1538_s1 + $0x90] sm:$0xff] }
   0x7   :  { %675 = vmatpush.bf16.msra.mxu2 %v1181_v5  ;;  %v1171_v14 = vld [vmem:[%s1538_s1 + $0x60] sm:$0xff]  ;;  %v1170_v18 = vld [vmem:[%s1538_s1 + $0x58] sm:$0xff]  ;;  %v1169_v22 = vld [vmem:[%s1538_s1 + $0x50] sm:$0xff] }
   0x8   :  { %661 = vmatpush.bf16.msra.mxu1 %v1173_v6  ;;  %v1187_v15 = vld [vmem:[%s1538_s1 + $0xe0] sm:$0xff]  ;;  %v1186_v19 = vld [vmem:[%s1538_s1 + $0xd8] sm:$0xff]  ;;  %v1185_v23 = vld [vmem:[%s1538_s1 + $0xd0] sm:$0xff] }
   0x9   :  { %689 = vmatpush.bf16.msra.mxu3 %v1189_v7  ;;  %v1160_v24 = vld [vmem:[%s1538_s1 + $0x8] sm:$0xff]  ;;  %v1159_v28 = vld [vmem:[%s1538_s1] sm:$0xff]  ;;  %v1198_v30 = vld [vmem:[%s1538_s1 + $0x138] sm:$0xff] }
   0xa   :  { %648 = vmatpush.bf16.msra.mxu0 %v1164_v8  ;;  %v1176_v25 = vld [vmem:[%s1538_s1 + $0x88] sm:$0xff]  ;;  %v1175_v29 = vld [vmem:[%s1538_s1 + $0x80] sm:$0xff]  ;;  %v1214_v31 = vld [vmem:[%s1538_s1 + $0x1b8] sm:$0xff] }
   0xb   :  { %676 = vmatpush.bf16.msra.mxu2 %v1180_v9  ;;  %v1168_v26 = vld [vmem:[%s1538_s1 + $0x48] sm:$0xff]  ;;  %v1167_v32 = vld [vmem:[%s1538_s1 + $0x40] sm:$0xff]  ;;  %v1206_v38 = vld [vmem:[%s1538_s1 + $0x178] sm:$0xff] }
   0xc   :  { %662 = vmatpush.bf16.msra.mxu1 %v1172_v10  ;;  %v1184_v27 = vld [vmem:[%s1538_s1 + $0xc8] sm:$0xff]  ;;  %v1183_v33 = vld [vmem:[%s1538_s1 + $0xc0] sm:$0xff]  ;;  %v1222_v39 = vld [vmem:[%s1538_s1 + $0x1f8] sm:$0xff] }
   0xd   :  { %690 = vmatpush.bf16.msra.mxu3 %v1188_v11  ;;  %v828_v34 = vld [vmem:[%s1539_s0] sm:$0xf]  ;;  %v1154_v35 = vld [vmem:[%s1539_s0 + $0x20] sm:$0xf0]  ;;  %v836_v36 = vld [vmem:[%s1539_s0 + $0x8] sm:$0xf] }
   0xe   :  { %649 = vmatpush.bf16.msra.mxu0 %v1163_v12  ;;  %v1155_v37 = vld [vmem:[%s1539_s0 + $0x28] sm:$0xf0]  ;;  %v1150_v40 = vld [vmem:[%s1539_s0 + $0x4] sm:$0xf]  ;;  %v830_v41 = vld [vmem:[%s1539_s0 + $0x24] sm:$0xf0]  ;;  %v829_v44 = vor.u32 %v1154_v35, %v828_v34 }
   0xf   :  { %677 = vmatpush.bf16.msra.mxu2 %v1179_v13  ;;  %v1151_v42 = vld [vmem:[%s1539_s0 + $0xc] sm:$0xf]  ;;  %v838_v43 = vld [vmem:[%s1539_s0 + $0x2c] sm:$0xf0]  ;;  %v837_v45 = vor.u32 %v1155_v37, %v836_v36  ;;  %v833_v48 = vor.u32 %v1150_v40, %v830_v41  ;;  %v1195_v56 = vld [vmem:[%s1538_s1 + $0x120] sm:$0xff] }
  0x10   :  { %663 = vmatpush.bf16.msra.mxu1 %v1171_v14  ;;  %v1197_v46 = vld [vmem:[%s1538_s1 + $0x130] sm:$0xff]  ;;  %v841_v49 = vor.u32 %v1151_v42, %v838_v43  ;;  %v1196_v52 = vld [vmem:[%s1538_s1 + $0x128] sm:$0xff]  ;;  %v1211_v57 = vld [vmem:[%s1538_s1 + $0x1a0] sm:$0xff] }
  0x11   :  { %691 = vmatpush.bf16.msra.mxu3 %v1187_v15  ;;  %v1213_v47 = vld [vmem:[%s1538_s1 + $0x1b0] sm:$0xff]  ;;  %v1212_v53 = vld [vmem:[%s1538_s1 + $0x1a8] sm:$0xff]  ;;  %v1203_v58 = vld [vmem:[%s1538_s1 + $0x160] sm:$0xff] }
  0x12   :  { %650 = vmatpush.bf16.msra.mxu0 %v1162_v16  ;;  %v1205_v50 = vld [vmem:[%s1538_s1 + $0x170] sm:$0xff]  ;;  %v1204_v54 = vld [vmem:[%s1538_s1 + $0x168] sm:$0xff]  ;;  %v1219_v59 = vld [vmem:[%s1538_s1 + $0x1e0] sm:$0xff] }
  0x13   :  { %678 = vmatpush.bf16.msra.mxu2 %v1178_v17  ;;  %v1221_v51 = vld [vmem:[%s1538_s1 + $0x1f0] sm:$0xff]  ;;  %v1220_v55 = vld [vmem:[%s1538_s1 + $0x1e8] sm:$0xff]  ;;  %v1194_v60 = vld [vmem:[%s1538_s1 + $0x118] sm:$0xff] }
  0x14   :  { %664 = vmatpush.bf16.msra.mxu1 %v1170_v18  ;;  %v1210_v61 = vld [vmem:[%s1538_s1 + $0x198] sm:$0xff]  ;;  %v1193_v0 = vld [vmem:[%s1538_s1 + $0x110] sm:$0xff]  ;;  %v1192_v4 = vld [vmem:[%s1538_s1 + $0x108] sm:$0xff] }
  0x15   :  { %692 = vmatpush.bf16.msra.mxu3 %v1186_v19  ;;  %v1202_v62 = vld [vmem:[%s1538_s1 + $0x158] sm:$0xff]  ;;  %v1209_v1 = vld [vmem:[%s1538_s1 + $0x190] sm:$0xff]  ;;  %v1208_v5 = vld [vmem:[%s1538_s1 + $0x188] sm:$0xff] }
  0x16   :  { %651 = vmatpush.bf16.msra.mxu0 %v1161_v20  ;;  %v1218_v63 = vld [vmem:[%s1538_s1 + $0x1d8] sm:$0xff]  ;;  %v1201_v2 = vld [vmem:[%s1538_s1 + $0x150] sm:$0xff]  ;;  %v1200_v6 = vld [vmem:[%s1538_s1 + $0x148] sm:$0xff] }
  0x17   :  { %679 = vmatpush.bf16.msra.mxu2 %v1177_v21  ;;  %v1217_v3 = vld [vmem:[%s1538_s1 + $0x1d0] sm:$0xff]  ;;  %v1216_v7 = vld [vmem:[%s1538_s1 + $0x1c8] sm:$0xff]  ;;  %v1191_v8 = vld [vmem:[%s1538_s1 + $0x100] sm:$0xff] }
  0x18   :  { %665 = vmatpush.bf16.msra.mxu1 %v1169_v22  ;;  %v1207_v9 = vld [vmem:[%s1538_s1 + $0x180] sm:$0xff]  ;;  %v1230_v10 = vld [vmem:[%s1538_s1 + $0x238] sm:$0xff]  ;;  %v844_v11 = vld [vmem:[%s1539_s0 + $0x10] sm:$0xf] }
  0x19   :  { %693 = vmatpush.bf16.msra.mxu3 %v1185_v23  ;;  %v1156_v12 = vld [vmem:[%s1539_s0 + $0x30] sm:$0xf0]  ;;  %v852_v13 = vld [vmem:[%s1539_s0 + $0x18] sm:$0xf]  ;;  %v1157_v14 = vld [vmem:[%s1539_s0 + $0x38] sm:$0xf0] }
  0x1a   :  { %652 = vmatpush.bf16.msra.mxu0 %v1160_v24  ;;  %v1199_v15 = vld [vmem:[%s1538_s1 + $0x140] sm:$0xff]  ;;  %v1152_v17 = vld [vmem:[%s1539_s0 + $0x14] sm:$0xf]  ;;  %v846_v18 = vld [vmem:[%s1539_s0 + $0x34] sm:$0xf0]  ;;  %v845_v21 = vor.u32 %v1156_v12, %v844_v11  ;;  %v853_v22 = vor.u32 %v1157_v14, %v852_v13 }
  0x1b   :  { %680 = vmatpush.bf16.msra.mxu2 %v1176_v25  ;;  %v1215_v16 = vld [vmem:[%s1538_s1 + $0x1c0] sm:$0xff]  ;;  %v1153_v19 = vld [vmem:[%s1539_s0 + $0x1c] sm:$0xf]  ;;  %v849_v23 = vor.u32 %v1152_v17, %v846_v18  ;;  %v1229_v25 = vld [vmem:[%s1538_s1 + $0x230] sm:$0xff] }
  0x1c   :  { %666 = vmatpush.bf16.msra.mxu1 %v1168_v26  ;;  %v854_v20 = vld [vmem:[%s1539_s0 + $0x3c] sm:$0xf0]  ;;  %v1228_v26 = vld [vmem:[%s1538_s1 + $0x228] sm:$0xff] }
  0x1d   :  { %694 = vmatpush.bf16.msra.mxu3 %v1184_v27  ;;  %v857_v24 = vor.u32 %v1153_v19, %v854_v20  ;;  %v1227_v27 = vld [vmem:[%s1538_s1 + $0x220] sm:$0xff] }
  0x1e   :  { %653 = vmatpush.bf16.msra.mxu0 %v1159_v28  ;;  %v1226_v28 = vld [vmem:[%s1538_s1 + $0x218] sm:$0xff] }
  0x1f   :  { %681 = vmatpush.bf16.msra.mxu2 %v1175_v29  ;;  %v1225_v29 = vld [vmem:[%s1538_s1 + $0x210] sm:$0xff] }
  0x20   :  { %667 = vmatpush.bf16.msra.mxu1 %v1167_v32  ;;  %v860_v32 = vld [vmem:[%s1539_s0 + $0x20] sm:$0xf] }
  0x21   :  { %695 = vmatpush.bf16.msra.mxu3 %v1183_v33  ;;  %654 = vmatmul.bf16.vlgmr.msra.gmra.mxu0 %v829_v44  ;;  %v1158_v33 = vld [vmem:[%s1539_s0 + $0x40] sm:$0xf0] }
  0x22   :  { %702 = vmatpush.bf16.msrb.mxu0 %v1198_v30  ;;  %682 = vmatmul.bf16.vlgmr.msra.gmra.mxu2 %v837_v45  ;;  %v1224_v30 = vld [vmem:[%s1538_s1 + $0x208] sm:$0xff]  ;;  %v861_v34 = vor.u32 %v1158_v33, %v860_v32 }
  0x23   :  { %730 = vmatpush.bf16.msrb.mxu2 %v1214_v31  ;;  %668 = vmatmul.bf16.vlgmr.msra.gmra.mxu1 %v833_v48  ;;  %v1223_v31 = vld [vmem:[%s1538_s1 + $0x200] sm:$0xff] }
  0x24   :  { %716 = vmatpush.bf16.msrb.mxu1 %v1206_v38  ;;  %696 = vmatmul.bf16.vlgmr.msra.gmra.mxu3 %v841_v49 }
  0x25   :  { %744 = vmatpush.bf16.msrb.mxu3 %v1222_v39 }
  0x26   :  { %703 = vmatpush.bf16.msrb.mxu0 %v1197_v46 }
  0x27   :  { %731 = vmatpush.bf16.msrb.mxu2 %v1213_v47 }
  0x28   :  { %717 = vmatpush.bf16.msrb.mxu1 %v1205_v50 }
  0x29   :  { %745 = vmatpush.bf16.msrb.mxu3 %v1221_v51 }
  0x2a   :  { %704 = vmatpush.bf16.msrb.mxu0 %v1196_v52 }
  0x2b   :  { %732 = vmatpush.bf16.msrb.mxu2 %v1212_v53 }
  0x2c   :  { %718 = vmatpush.bf16.msrb.mxu1 %v1204_v54 }
  0x2d   :  { %746 = vmatpush.bf16.msrb.mxu3 %v1220_v55 }
  0x2e   :  { %705 = vmatpush.bf16.msrb.mxu0 %v1195_v56 }
  0x2f   :  { %733 = vmatpush.bf16.msrb.mxu2 %v1211_v57 }
  0x30   :  { %719 = vmatpush.bf16.msrb.mxu1 %v1203_v58 }
  0x31   :  { %747 = vmatpush.bf16.msrb.mxu3 %v1219_v59 }
  0x32   :  { %706 = vmatpush.bf16.msrb.mxu0 %v1194_v60 }
  0x33   :  { %734 = vmatpush.bf16.msrb.mxu2 %v1210_v61 }
  0x34   :  { %720 = vmatpush.bf16.msrb.mxu1 %v1202_v62 }
  0x35   :  { %748 = vmatpush.bf16.msrb.mxu3 %v1218_v63 }
  0x36   :  { %707 = vmatpush.bf16.msrb.mxu0 %v1193_v0 }
  0x37   :  { %735 = vmatpush.bf16.msrb.mxu2 %v1209_v1 }
  0x38   :  { %721 = vmatpush.bf16.msrb.mxu1 %v1201_v2 }
  0x39   :  { %749 = vmatpush.bf16.msrb.mxu3 %v1217_v3 }
  0x3a   :  { %708 = vmatpush.bf16.msrb.mxu0 %v1192_v4 }
  0x3b   :  { %736 = vmatpush.bf16.msrb.mxu2 %v1208_v5 }
  0x3c   :  { %722 = vmatpush.bf16.msrb.mxu1 %v1200_v6 }
  0x3d   :  { %750 = vmatpush.bf16.msrb.mxu3 %v1216_v7 }
  0x3e   :  { %709 = vmatpush.bf16.msrb.mxu0 %v1191_v8 }
  0x3f   :  { %737 = vmatpush.bf16.msrb.mxu2 %v1207_v9 }
  0x40   :  { %723 = vmatpush.bf16.msrb.mxu1 %v1199_v15 }
  0x41   :  { %751 = vmatpush.bf16.msrb.mxu3 %v1215_v16  ;;  %710 = vmatmul.bf16.vlgmr.msrb.gmra.mxu0 %v845_v21 }
  0x42   :  { %758 = vmatpush.bf16.msra.mxu0 %v1230_v10  ;;  %738 = vmatmul.bf16.vlgmr.msrb.gmra.mxu2 %v853_v22 }
  0x43   :  { %724 = vmatmul.bf16.vlgmr.msrb.gmra.mxu1 %v849_v23 }
  0x44   :  { %752 = vmatmul.bf16.vlgmr.msrb.gmra.mxu3 %v857_v24 }
  0x46   :  { %759 = vmatpush.bf16.msra.mxu0 %v1229_v25 }
  0x4a   :  { %760 = vmatpush.bf16.msra.mxu0 %v1228_v26 }
  0x4e   :  { %761 = vmatpush.bf16.msra.mxu0 %v1227_v27 }
  0x52   :  { %762 = vmatpush.bf16.msra.mxu0 %v1226_v28 }
  0x56   :  { %763 = vmatpush.bf16.msra.mxu0 %v1225_v29 }
  0x5a   :  { %764 = vmatpush.bf16.msra.mxu0 %v1224_v30 }
  0x5e   :  { %765 = vmatpush.bf16.msra.mxu0 %v1223_v31 }
  0x61   :  { %766 = vmatmul.bf16.vlgmr.msra.gmra.mxu0 %v861_v34 }
  0x9e   :  { %v655_v35 = vpop.f32.mrf.mxu0 }
  0xa0   :  { %v669_v36 = vpop.f32.mrf.mxu1 }
  0xa1   :  { %v670_v43 = vadd.f32 %v669_v36, %v655_v35  ;;  %v796_v35 = vld [vmem:[%s1540_s2] sm:$0x1] }
  0xa5   :  { %v683_v37 = vpop.f32.mrf.mxu2 }
  0xa6   :  { %v657_v38 = vpop.f32.mrf.mxu0  ;;  %v684_v45 = vadd.f32 %v683_v37, %v670_v43 }
  0xa7   :  { %v697_v39 = vpop.f32.mrf.mxu3 }
  0xa8   :  { %v671_v40 = vpop.f32.mrf.mxu1  ;;  %v698_v49 = vadd.f32 %v697_v39, %v684_v45 }
  0xa9   :  { %v672_v46 = vadd.f32 %v671_v40, %v657_v38  ;;  %v1236_v40 = vld [vmem:[%s1540_s2 + $0x1] ss:$0 sm:$0xff] }
  0xad   :  { %v685_v41 = vpop.f32.mrf.mxu2 }
  0xae   :  { %v686_v50 = vadd.f32 %v685_v41, %v672_v46 }
  0xaf   :  { %v699_v44 = vpop.f32.mrf.mxu3 }
  0xb0   :  { %v700_v53 = vadd.f32 %v699_v44, %v686_v50 }
  0xbe   :  { %v711_v42 = vpop.f32.mrf.mxu0 }
  0xbf   :  { %v712_v54 = vadd.f32 %v711_v42, %v698_v49 }
  0xc0   :  { %v725_v47 = vpop.f32.mrf.mxu1 }
  0xc1   :  { %v726_v57 = vadd.f32 %v725_v47, %v712_v54 }
  0xc5   :  { %v739_v48 = vpop.f32.mrf.mxu2 }
  0xc6   :  { %v713_v51 = vpop.f32.mrf.mxu0  ;;  %v740_v61 = vadd.f32 %v739_v48, %v726_v57 }
  0xc7   :  { %v753_v52 = vpop.f32.mrf.mxu3  ;;  %v714_v55 = vadd.f32 %v713_v51, %v700_v53 }
  0xc8   :  { %v727_v56 = vpop.f32.mrf.mxu1  ;;  %v754_v0 = vadd.f32 %v753_v52, %v740_v61 }
  0xc9   :  { %v728_v60 = vadd.f32 %v727_v56, %v714_v55 }
  0xcd   :  { %v741_v58 = vpop.f32.mrf.mxu2 }
  0xce   :  { %v742_v62 = vadd.f32 %v741_v58, %v728_v60 }
  0xcf   :  { %v755_v63 = vpop.f32.mrf.mxu3 }
  0xd0   :  { %v756_v1 = vadd.f32 %v755_v63, %v742_v62 }
  0xde   :  { %v767_v59 = vpop.f32.mrf.mxu0 }
  0xdf   :  { %v768_v3 = vadd.f32 %v767_v59, %v754_v0 }
  0xe6   :  { %v769_v2 = vpop.f32.mrf.mxu0 }
  0xe7   :  { %v770_v4 = vadd.f32 %v769_v2, %v756_v1 }
  0xe9   :  { %v772_v5 = vadd.f32 %v770_v4, %v768_v3 }
  0xeb   :  { %v773_v6 = vrot.slane %v772_v5, 4 }
  0xed   :  { %v774_v7 = vadd.f32 %v773_v6, %v772_v5 }
  0xef   :  { %v775_v8 = vrot.slane %v774_v7, 2 }
  0xf1   :  { %v776_v9 = vadd.f32 %v775_v8, %v774_v7 }
  0xf3   :  { %v777_v10 = vrot.slane %v776_v9, 1 }
  0xf5   :  { %v778_v11 = vadd.f32 %v777_v10, %v776_v9 }
  0xf7   :  { %v779_v12 = vmul.f32 0.125, %v778_v11 }
  0xf9   :  { %v780_v13 = vsub.f32 %v768_v3, %v779_v12  ;;  %v781_v14 = vsub.f32 %v770_v4, %v779_v12  ;;  %v791_v22 = vmul.f32 %v779_v12, %v779_v12 }
  0xfb   :  { %v782_v15 = vmul.f32 %v780_v13, %v780_v13  ;;  %v783_v16 = vmul.f32 %v781_v14, %v781_v14  ;;  %v792_v25 = vmul.f32 8.0, %v791_v22 }
  0xfd   :  { %v784_v17 = vadd.f32 %v783_v16, %v782_v15 }
  0xff   :  { %v785_v18 = vrot.slane %v784_v17, 4 }
 0x101   :  { %v786_v19 = vadd.f32 %v785_v18, %v784_v17 }
 0x103   :  { %v787_v20 = vrot.slane %v786_v19, 2 }
 0x105   :  { %v788_v21 = vadd.f32 %v787_v20, %v786_v19 }
 0x107   :  { %v789_v23 = vrot.slane %v788_v21, 1 }
 0x109   :  { %v790_v24 = vadd.f32 %v789_v23, %v788_v21 }
 0x10b   :  { %v793_v26 = vsub.f32 %v790_v24, %v792_v25 }
 0x10d   :  { %v794_v27 = vmul.f32 0.125, %v793_v26 }
 0x10f   :  { %v795_v28 = vmax.f32 %v794_v27, 0.0 }
 0x111   :  { %v797_v29 = vadd.f32 1e-05, %v795_v28 }
 0x113   :  { %1237 = vrsqrt.f32 %v797_v29  ;;  %vm804_vm1 = vweird.f32 %v797_v29 }
 0x119   :  { %v1238_v30 = vpop.eup %1237 }
 0x11a   :  { %v799_v31 = vmul.f32 %v1238_v30, %v797_v29  ;;  %vm805_vm0 = vweird.f32 %v1238_v30 }
 0x11b   :  { %vm806_vm2 = vmor %vm804_vm1, %vm805_vm0 }
 0x11c   :  { %v800_v32 = vmul.f32 %v1238_v30, %v799_v31 }
 0x11e   :  { %v801_v33 = vmul.f32 0.5, %v800_v32 }
 0x120   :  { %v802_v34 = vsub.f32 1.5, %v801_v33 }
 0x122   :  { %v803_v36 = vmul.f32 %v1238_v30, %v802_v34 }
 0x124   :  { %v807_v37 = vsel %vm806_vm2, %v1238_v30, %v803_v36 }
 0x125   :  { %v808_v38 = vmul.f32 %v807_v37, %v796_v35 }
 0x127   :  { %v810_v39 = vperm.slane %v808_v38, 0 }
 0x129   :  { %v811_v41 = vmul.f32 %v810_v39, %v780_v13  ;;  %v812_v42 = vmul.f32 %v810_v39, %v781_v14 }
 0x12b   :  { %v814_v43 = vadd.f32 %v1236_v40, %v811_v41  ;;  %v815_v44 = vadd.f32 %v1236_v40, %v812_v42 }
 0x12d   :  { %v816_v45 = vmax.f32 %v814_v43, 0.0  ;;  %v817_v46 = vmax.f32 %v815_v44, 0.0 }
 0x12f   :  { %v1234_v47 = vpack.c.bf16 %v817_v46, %v816_v45 }
 0x131   :  { %1235 = vst [vmem:[%s1541_s3] sm:$0xff] %v1234_v47  }

</bundles_post_ra>
